<compile_context>
chip_gen: v6e
topology: v6e:2x2x1
jax: 0.10.0
libtpu: 0.0.40
codegen_flags: <defaults>
</compile_context>

<pallas_src>
import functools
import math

import jax
import jax.numpy as jnp
from jax.experimental import pallas as pl
from jax.experimental.pallas import tpu as pltpu


def _layernorm(z, gamma, beta, eps=1e-5):
    """f32 LayerNorm over the last axis (matches torch.nn.LayerNorm, eps=1e-5)."""
    mu = jnp.mean(z, axis=-1, keepdims=True)
    var = jnp.mean((z - mu) ** 2, axis=-1, keepdims=True)
    zn = (z - mu) * jax.lax.rsqrt(var + eps)
    return zn * gamma + beta


def block_kernel(x_ref,
                 ln1_g_ref, ln1_b_ref,
                 wqkv_ref, bqkv_ref,
                 wp_ref, bp_ref,
                 ln2_g_ref, ln2_b_ref,
                 w1_ref, b1_ref, w2_ref, b2_ref,
                 o_ref,
                 yacc_ref,
                 *, n_head: int, bt: int, seq_len: int):
    T = seq_len
    x = x_ref[...].astype(jnp.float32)           # (bt*T, C) residual stream, f32
    C = x.shape[-1]
    D = C // n_head

    # ---- LayerNorm 1 (f32) ----
    xn = _layernorm(x, ln1_g_ref[...], ln1_b_ref[...])

    # ---- Fused QKV projection: one (bt*T, C) x (C, 3C) MXU op, f32 accumulate.
    # 1/sqrt(D) is already folded into the Q columns of wqkv/bqkv.
    qkv = jnp.dot(xn.astype(jnp.bfloat16), wqkv_ref[...],
                  preferred_element_type=jnp.float32) + bqkv_ref[...]
    qkv_b = qkv.astype(jnp.bfloat16)             # (bt*T, 3C), layout [Q | K | V]

    # ---- Per-(batch-element, head) attention with fused per-head output
    # projection accumulated in f32 (no head concatenate, no standalone proj).
    for b in range(bt):
        r0 = b * T
        acc = jnp.zeros((T, C), jnp.float32)
        for h in range(n_head):
            qh = qkv_b[r0:r0 + T, h * D:(h + 1) * D]                       # (T, D)
            kh = qkv_b[r0:r0 + T, C + h * D:C + (h + 1) * D]               # (T, D)
            vh = qkv_b[r0:r0 + T, 2 * C + h * D:2 * C + (h + 1) * D]       # (T, D)

            # q @ k^T without an explicit transpose: contract last dims.
            att = jax.lax.dot_general(qh, kh, (((1,), (1,)), ((), ())),
                                      preferred_element_type=jnp.float32)  # (T, T)
            att = att - jnp.max(att, axis=-1, keepdims=True)
            p = jnp.exp(att)                                               # f32, <= 1
            inv = pl.reciprocal(jnp.sum(p, axis=-1, keepdims=True),
                                approx=True)                               # EUP, (T, 1)
            # attn_drop: identity (eval mode)

            # Deferred normalization: unnormalized bf16 p (safe, values <= 1),
            # MXU matmul, then scale the (T, D) result by inv.
            yh = jnp.dot(p.astype(jnp.bfloat16), vh,
                         preferred_element_type=jnp.float32)               # (T, D)
            yh = (yh * inv).astype(jnp.bfloat16)

            # Fused per-head output projection: accumulate y_h @ Wp[hD:(h+1)D, :].
            acc = acc + jnp.dot(yh, wp_ref[h * D:(h + 1) * D, :],
                                preferred_element_type=jnp.float32)        # (T, C)
        yacc_ref[r0:r0 + T, :] = acc

    # ---- Residual add (proj bias added once) ----
    # resid_drop: identity (eval mode)
    x1 = x + yacc_ref[...] + bp_ref[...]

    # ---- LayerNorm 2 + MLP (bf16 matmul operands, f32 accumulate) ----
    xn2 = _layernorm(x1, ln2_g_ref[...], ln2_b_ref[...])
    h1 = jnp.dot(xn2.astype(jnp.bfloat16), w1_ref[...],
                 preferred_element_type=jnp.float32) + b1_ref[...]
    h1 = jnp.maximum(h1, 0.0)                    # ReLU in f32
    h2 = jnp.dot(h1.astype(jnp.bfloat16), w2_ref[...],
                 preferred_element_type=jnp.float32) + b2_ref[...]
    # MLP dropout: identity (eval mode)

    o_ref[...] = (x1 + h2).astype(o_ref.dtype)


def _choose_bt(B, T, row_target=256):
    """Largest divisor of B with bt*T <= row_target; then, if it can be done
    without dropping the matmul M dim below 128 rows, keep >= 2 grid steps so
    both v7x TensorCores get work."""
    bt = 1
    for cand in range(1, B + 1):
        if B % cand == 0 and cand * T <= row_target:
            bt = cand
    if B // bt < 2:
        for cand in range(bt - 1, 0, -1):
            if B % cand == 0 and B // cand >= 2 and cand * T >= 128:
                bt = cand
                break
    return bt


def _vmem_limit_bytes(bt, T, C, C3, Hm):
    """Rough working-set estimate, x2 headroom, floored at 32 MiB and capped
    at 56 MiB (leaves slack under v7x's 64 MiB physical VMEM)."""
    rows = bt * T
    weights = 2 * (C * C3 + C * C + C * Hm + Hm * C) + 4 * (C3 + 6 * C + Hm)
    io = 2 * 2 * rows * C * 4                       # double-buffered x / out tiles
    acts = rows * (4 * 3 * C      # qkv f32
                   + 2 * 3 * C    # qkv bf16
                   + 4 * Hm       # h1 f32
                   + 4 * 6 * C)   # x, xn, x1, xn2, yacc, h2 (f32)
    est = weights + io + acts
    return int(min(max(2 * est, 32 * 1024 * 1024), 56 * 1024 * 1024))


def transfuser_block(x, params, *, n_head, bt=None, single_buffer_weights=True):
    """x: (B, T, C) float32.  params: dict of weights (bf16 matmul weights, f32 biases)."""
    B, T, C = x.shape
    C3 = params['wqkv'].shape[1]                 # 3 * C
    Hm = params['w1'].shape[1]                   # block_exp * C

    if bt is None:
        bt = _choose_bt(B, T)
    assert B % bt == 0, "bt must divide B"
    n_steps = B // bt

    # Flatten to a lane-dense 2-D slab: the matmul M dimension becomes bt*T.
    x2 = x.reshape(B * T, C)

    def wspec(shape):
        # Constant-index weight/bias inputs: single-buffer them (no double
        # buffering in VMEM).  Fall back to default buffering if unsupported.
        if single_buffer_weights:
            return pl.BlockSpec(shape, lambda i: (0, 0),
                                pipeline_mode=pl.Buffered(1))
        return pl.BlockSpec(shape, lambda i: (0, 0))

    in_specs = [
        pl.BlockSpec((bt * T, C), lambda i: (i, 0)),    # x slab (pipelined)
        wspec((1, C)), wspec((1, C)),                   # ln1 gamma, beta
        wspec((C, C3)), wspec((1, C3)),                 # fused QKV weight, bias
        wspec((C, C)), wspec((1, C)),                   # proj weight, bias
        wspec((1, C)), wspec((1, C)),                   # ln2 gamma, beta
        wspec((C, Hm)), wspec((1, Hm)),                 # mlp fc1 weight, bias
        wspec((Hm, C)), wspec((1, C)),                  # mlp fc2 weight, bias
    ]

    kernel = functools.partial(block_kernel, n_head=n_head, bt=bt, seq_len=T)

    out2 = pl.pallas_call(
        kernel,
        out_shape=jax.ShapeDtypeStruct((B * T, C), x.dtype),
        grid_spec=pltpu.PrefetchScalarGridSpec(
            num_scalar_prefetch=0,
            grid=(n_steps,),
            in_specs=in_specs,
            out_specs=pl.BlockSpec((bt * T, C), lambda i: (i, 0)),
            scratch_shapes=[pltpu.VMEM((bt * T, C), jnp.float32)],
        ),
        compiler_params=pltpu.CompilerParams(
            dimension_semantics=("parallel",),
            vmem_limit_bytes=_vmem_limit_bytes(bt, T, C, C3, Hm),
        ),
    )(x2,
      params['ln1_g'], params['ln1_b'],
      params['wqkv'], params['bqkv'],
      params['wp'], params['bp'],
      params['ln2_g'], params['ln2_b'],
      params['w1'], params['b1'],
      params['w2'], params['b2'])
    return out2.reshape(B, T, C)


def init_params(key, n_embd, n_head, block_exp):
    """Deterministic synthetic parameters.

    Linear weights stored as (in, out); Q/K/V fused into one (C, 3C) bf16
    weight and one (1, 3C) f32 bias.  The 1/sqrt(D) attention scale is folded
    into the Q columns (weight AND bias), so the kernel applies no extra scale.
    Matmul weights are bf16, biases / LN params are f32.
    """
    C = n_embd
    H = block_exp * n_embd
    D = C // n_head
    scale = 1.0 / math.sqrt(D)
    keys = jax.random.split(key, 12)
    s = 0.02

    def w(k, shape):
        return (s * jax.random.normal(k, shape)).astype(jnp.float32)

    wq, bq = w(keys[0], (C, C)) * scale, w(keys[1], (1, C)) * scale   # scale folded
    wk, bk = w(keys[2], (C, C)), w(keys[3], (1, C))
    wv, bv = w(keys[4], (C, C)), w(keys[5], (1, C))
    wp, bp = w(keys[6], (C, C)), w(keys[7], (1, C))
    w1, b1 = w(keys[8], (C, H)), w(keys[9], (1, H))
    w2, b2 = w(keys[10], (H, C)), w(keys[11], (1, C))

    return dict(
        ln1_g=jnp.ones((1, C), jnp.float32),
        ln1_b=jnp.zeros((1, C), jnp.float32),
        wqkv=jnp.concatenate([wq, wk, wv], axis=1).astype(jnp.bfloat16),
        bqkv=jnp.concatenate([bq, bk, bv], axis=1),
        wp=wp.astype(jnp.bfloat16), bp=bp,
        ln2_g=jnp.ones((1, C), jnp.float32),
        ln2_b=jnp.zeros((1, C), jnp.float32),
        w1=w1.astype(jnp.bfloat16), b1=b1,
        w2=w2.astype(jnp.bfloat16), b2=b2,
    )


def reference_block(x, p, n_head):
    """Pure-JAX f32 reference (same bf16 weight values, upcast to f32).

    The 1/sqrt(D) scale is already folded into the Q columns of wqkv/bqkv,
    so no extra attention scaling is applied here (mathematically identical
    to the PyTorch module's q @ k^T / sqrt(D))."""
    B, T, C = x.shape
    D = C // n_head

    wqkv = p['wqkv'].astype(jnp.float32)
    wq, wk, wv = wqkv[:, :C], wqkv[:, C:2 * C], wqkv[:, 2 * C:]
    bq, bk, bv = p['bqkv'][:, :C], p['bqkv'][:, C:2 * C], p['bqkv'][:, 2 * C:]
    wp = p['wp'].astype(jnp.float32)
    w1 = p['w1'].astype(jnp.float32)
    w2 = p['w2'].astype(jnp.float32)

    def ln(z, g, b):
        mu = jnp.mean(z, -1, keepdims=True)
        var = jnp.mean((z - mu) ** 2, -1, keepdims=True)
        return (z - mu) / jnp.sqrt(var + 1e-5) * g + b

    xn = ln(x, p['ln1_g'], p['ln1_b'])
    q = (xn @ wq + bq).reshape(B, T, n_head, D).transpose(0, 2, 1, 3)
    k = (xn @ wk + bk).reshape(B, T, n_head, D).transpose(0, 2, 1, 3)
    v = (xn @ wv + bv).reshape(B, T, n_head, D).transpose(0, 2, 1, 3)
    att = jnp.einsum('bhtd,bhsd->bhts', q, k)        # scale already in q
    att = jax.nn.softmax(att, axis=-1)
    y = jnp.einsum('bhts,bhsd->bhtd', att, v).transpose(0, 2, 1, 3).reshape(B, T, C)
    y = y @ wp + p['bp']
    x1 = x + y
    xn2 = ln(x1, p['ln2_g'], p['ln2_b'])
    h = jnp.maximum(xn2 @ w1 + p['b1'], 0.0) @ w2 + p['b2']
    return x1 + h


if __name__ == "__main__":
    # small shapes: B=2, T=8, C=32, n_head=4, block_exp=4
    B, T, C = 2, 8, 32
    n_head, block_exp = 4, 4

    key = jax.random.PRNGKey(0)
    kx, kp = jax.random.split(key)
    x = jax.random.normal(kx, (B, T, C), dtype=jnp.float32)
    params = init_params(kp, C, n_head, block_exp)

    try:
        out = jax.block_until_ready(transfuser_block(x, params, n_head=n_head))
    except Exception:
        # Fallback for Pallas builds that reject single-buffered (Buffered(1)) specs.
        out = jax.block_until_ready(
            transfuser_block(x, params, n_head=n_head, single_buffer_weights=False))

    ref = reference_block(x, params, n_head)
    assert out.shape == (B, T, C)
    # bf16 matmul operands + approx reciprocal -> slightly looser tolerance vs f32 ref.
    assert jnp.allclose(out, ref, atol=2e-2, rtol=2e-2), "mismatch vs reference"

    print("KERNEL_OK")
</pallas_src>

<mosaic_0001>
module attributes {stable_mosaic.version = 11 : i64} {
  func.func @block_kernel(%arg0: i32, %arg1: memref<16x32xf32, #tpu.memory_space<vmem>>, %arg2: memref<1x32xf32, #tpu.memory_space<vmem>>, %arg3: memref<1x32xf32, #tpu.memory_space<vmem>>, %arg4: memref<32x96xbf16, #tpu.memory_space<vmem>>, %arg5: memref<1x96xf32, #tpu.memory_space<vmem>>, %arg6: memref<32x32xbf16, #tpu.memory_space<vmem>>, %arg7: memref<1x32xf32, #tpu.memory_space<vmem>>, %arg8: memref<1x32xf32, #tpu.memory_space<vmem>>, %arg9: memref<1x32xf32, #tpu.memory_space<vmem>>, %arg10: memref<32x128xbf16, #tpu.memory_space<vmem>>, %arg11: memref<1x128xf32, #tpu.memory_space<vmem>>, %arg12: memref<128x32xbf16, #tpu.memory_space<vmem>>, %arg13: memref<1x32xf32, #tpu.memory_space<vmem>>, %arg14: memref<16x32xf32, #tpu.memory_space<vmem>>, %arg15: memref<16x32xf32, #tpu.memory_space<vmem>>) attributes {dimension_semantics = [#tpu.dimension_semantics<parallel>], iteration_bounds = array<i64: 1>, scalar_prefetch = 0 : i64, scratch_operands = 1 : i64, tpu.core_type = #tpu.core_type<tc>, window_params = [{transform_indices = @transform_0, window_bounds = array<i64: 16, 32>}, {pipeline_mode = #tpu.pipeline_mode<synchronous>, transform_indices = @transform_1, window_bounds = array<i64: 1, 32>}, {pipeline_mode = #tpu.pipeline_mode<synchronous>, transform_indices = @transform_2, window_bounds = array<i64: 1, 32>}, {pipeline_mode = #tpu.pipeline_mode<synchronous>, transform_indices = @transform_3, window_bounds = array<i64: 32, 96>}, {pipeline_mode = #tpu.pipeline_mode<synchronous>, transform_indices = @transform_4, window_bounds = array<i64: 1, 96>}, {pipeline_mode = #tpu.pipeline_mode<synchronous>, transform_indices = @transform_5, window_bounds = array<i64: 32, 32>}, {pipeline_mode = #tpu.pipeline_mode<synchronous>, transform_indices = @transform_6, window_bounds = array<i64: 1, 32>}, {pipeline_mode = #tpu.pipeline_mode<synchronous>, transform_indices = @transform_7, window_bounds = array<i64: 1, 32>}, {pipeline_mode = #tpu.pipeline_mode<synchronous>, transform_indices = @transform_8, window_bounds = array<i64: 1, 32>}, {pipeline_mode = #tpu.pipeline_mode<synchronous>, transform_indices = @transform_9, window_bounds = array<i64: 32, 128>}, {pipeline_mode = #tpu.pipeline_mode<synchronous>, transform_indices = @transform_10, window_bounds = array<i64: 1, 128>}, {pipeline_mode = #tpu.pipeline_mode<synchronous>, transform_indices = @transform_11, window_bounds = array<i64: 128, 32>}, {pipeline_mode = #tpu.pipeline_mode<synchronous>, transform_indices = @transform_12, window_bounds = array<i64: 1, 32>}, {transform_indices = @transform_13, window_bounds = array<i64: 16, 32>}]} {
    %c0 = arith.constant 0 : index
    %c0_0 = arith.constant 0 : index
    %0 = vector.load %arg1[%c0, %c0_0] : memref<16x32xf32, #tpu.memory_space<vmem>>, vector<16x32xf32>
    %c0_1 = arith.constant 0 : index
    %c0_2 = arith.constant 0 : index
    %1 = vector.load %arg2[%c0_1, %c0_2] : memref<1x32xf32, #tpu.memory_space<vmem>>, vector<1x32xf32>
    %c0_3 = arith.constant 0 : index
    %c0_4 = arith.constant 0 : index
    %2 = vector.load %arg3[%c0_3, %c0_4] : memref<1x32xf32, #tpu.memory_space<vmem>>, vector<1x32xf32>
    %cst = arith.constant dense<0.000000e+00> : vector<16xf32>
    %3 = vector.multi_reduction <add>, %0, %cst [1] : vector<16x32xf32> to vector<16xf32>
    %4 = vector.shape_cast %3 : vector<16xf32> to vector<16x1xf32>
    %cst_5 = arith.constant 3.200000e+01 : f32
    %5 = vector.broadcast %cst_5 : f32 to vector<16x1xf32>
    %6 = arith.divf %4, %5 : vector<16x1xf32>
    %7 = vector.broadcast %6 : vector<16x1xf32> to vector<16x32xf32>
    %8 = arith.subf %0, %7 : vector<16x32xf32>
    %9 = arith.mulf %8, %8 : vector<16x32xf32>
    %cst_6 = arith.constant dense<0.000000e+00> : vector<16xf32>
    %10 = vector.multi_reduction <add>, %9, %cst_6 [1] : vector<16x32xf32> to vector<16xf32>
    %11 = vector.shape_cast %10 : vector<16xf32> to vector<16x1xf32>
    %cst_7 = arith.constant 3.200000e+01 : f32
    %12 = vector.broadcast %cst_7 : f32 to vector<16x1xf32>
    %13 = arith.divf %11, %12 : vector<16x1xf32>
    %14 = vector.broadcast %6 : vector<16x1xf32> to vector<16x32xf32>
    %15 = arith.subf %0, %14 : vector<16x32xf32>
    %cst_8 = arith.constant 9.99999974E-6 : f32
    %16 = vector.broadcast %cst_8 : f32 to vector<16x1xf32>
    %17 = arith.addf %13, %16 : vector<16x1xf32>
    %18 = math.rsqrt %17 : vector<16x1xf32>
    %19 = vector.broadcast %18 : vector<16x1xf32> to vector<16x32xf32>
    %20 = arith.mulf %15, %19 : vector<16x32xf32>
    %21 = vector.broadcast %1 : vector<1x32xf32> to vector<16x32xf32>
    %22 = arith.mulf %20, %21 : vector<16x32xf32>
    %23 = vector.broadcast %2 : vector<1x32xf32> to vector<16x32xf32>
    %24 = arith.addf %22, %23 : vector<16x32xf32>
    %25 = arith.truncf %24 : vector<16x32xf32> to vector<16x32xbf16>
    %c0_9 = arith.constant 0 : index
    %c0_10 = arith.constant 0 : index
    %26 = vector.load %arg4[%c0_9, %c0_10] : memref<32x96xbf16, #tpu.memory_space<vmem>>, vector<32x96xbf16>
    %cst_11 = arith.constant dense<0.000000e+00> : vector<16x96xf32>
    %27 = tpu.matmul %25, %26, %cst_11 {dimension_numbers = #tpu.dot_dimension_numbers<[1], [0], [0], [1], [0, 0, 1, 1], [], []>} : vector<16x32xbf16>, vector<32x96xbf16>, vector<16x96xf32> -> vector<16x96xf32>
    %c0_12 = arith.constant 0 : index
    %c0_13 = arith.constant 0 : index
    %28 = vector.load %arg5[%c0_12, %c0_13] : memref<1x96xf32, #tpu.memory_space<vmem>>, vector<1x96xf32>
    %29 = vector.broadcast %28 : vector<1x96xf32> to vector<16x96xf32>
    %30 = arith.addf %27, %29 : vector<16x96xf32>
    %31 = arith.truncf %30 : vector<16x96xf32> to vector<16x96xbf16>
    %cst_14 = arith.constant 0.000000e+00 : f32
    %32 = vector.broadcast %cst_14 : f32 to vector<8x32xf32>
    %33 = vector.extract_strided_slice %31 {offsets = [0, 0], sizes = [8, 8], strides = [1, 1]} : vector<16x96xbf16> to vector<8x8xbf16>
    %34 = vector.extract_strided_slice %31 {offsets = [0, 32], sizes = [8, 8], strides = [1, 1]} : vector<16x96xbf16> to vector<8x8xbf16>
    %35 = vector.extract_strided_slice %31 {offsets = [0, 64], sizes = [8, 8], strides = [1, 1]} : vector<16x96xbf16> to vector<8x8xbf16>
    %cst_15 = arith.constant dense<0.000000e+00> : vector<8x8xf32>
    %36 = tpu.matmul %33, %34, %cst_15 {dimension_numbers = #tpu.dot_dimension_numbers<[1], [1], [0], [0], [0, 0, 1, 0], [], []>} : vector<8x8xbf16>, vector<8x8xbf16>, vector<8x8xf32> -> vector<8x8xf32>
    %cst_16 = arith.constant dense<0xFF800000> : vector<8xf32>
    %37 = vector.multi_reduction <maximumf>, %36, %cst_16 [1] : vector<8x8xf32> to vector<8xf32>
    %38 = vector.shape_cast %37 : vector<8xf32> to vector<8x1xf32>
    %39 = vector.broadcast %38 : vector<8x1xf32> to vector<8x8xf32>
    %40 = arith.subf %36, %39 : vector<8x8xf32>
    %41 = math.exp %40 : vector<8x8xf32>
    %cst_17 = arith.constant dense<0.000000e+00> : vector<8xf32>
    %42 = vector.multi_reduction <add>, %41, %cst_17 [1] : vector<8x8xf32> to vector<8xf32>
    %43 = vector.shape_cast %42 : vector<8xf32> to vector<8x1xf32>
    %44 = tpu.reciprocal %43 {approx = true} : vector<8x1xf32> -> vector<8x1xf32>
    %45 = arith.truncf %41 : vector<8x8xf32> to vector<8x8xbf16>
    %cst_18 = arith.constant dense<0.000000e+00> : vector<8x8xf32>
    %46 = tpu.matmul %45, %35, %cst_18 {dimension_numbers = #tpu.dot_dimension_numbers<[1], [0], [0], [1], [0, 0, 1, 1], [], []>} : vector<8x8xbf16>, vector<8x8xbf16>, vector<8x8xf32> -> vector<8x8xf32>
    %47 = vector.broadcast %44 : vector<8x1xf32> to vector<8x8xf32>
    %48 = arith.mulf %46, %47 : vector<8x8xf32>
    %49 = arith.truncf %48 : vector<8x8xf32> to vector<8x8xbf16>
    %c0_19 = arith.constant 0 : index
    %c0_20 = arith.constant 0 : index
    %50 = vector.load %arg6[%c0_19, %c0_20] : memref<32x32xbf16, #tpu.memory_space<vmem>>, vector<8x32xbf16>
    %cst_21 = arith.constant dense<0.000000e+00> : vector<8x32xf32>
    %51 = tpu.matmul %49, %50, %cst_21 {dimension_numbers = #tpu.dot_dimension_numbers<[1], [0], [0], [1], [0, 0, 1, 1], [], []>} : vector<8x8xbf16>, vector<8x32xbf16>, vector<8x32xf32> -> vector<8x32xf32>
    %52 = arith.addf %32, %51 : vector<8x32xf32>
    %53 = vector.extract_strided_slice %31 {offsets = [0, 8], sizes = [8, 8], strides = [1, 1]} : vector<16x96xbf16> to vector<8x8xbf16>
    %54 = vector.extract_strided_slice %31 {offsets = [0, 40], sizes = [8, 8], strides = [1, 1]} : vector<16x96xbf16> to vector<8x8xbf16>
    %55 = vector.extract_strided_slice %31 {offsets = [0, 72], sizes = [8, 8], strides = [1, 1]} : vector<16x96xbf16> to vector<8x8xbf16>
    %cst_22 = arith.constant dense<0.000000e+00> : vector<8x8xf32>
    %56 = tpu.matmul %53, %54, %cst_22 {dimension_numbers = #tpu.dot_dimension_numbers<[1], [1], [0], [0], [0, 0, 1, 0], [], []>} : vector<8x8xbf16>, vector<8x8xbf16>, vector<8x8xf32> -> vector<8x8xf32>
    %cst_23 = arith.constant dense<0xFF800000> : vector<8xf32>
    %57 = vector.multi_reduction <maximumf>, %56, %cst_23 [1] : vector<8x8xf32> to vector<8xf32>
    %58 = vector.shape_cast %57 : vector<8xf32> to vector<8x1xf32>
    %59 = vector.broadcast %58 : vector<8x1xf32> to vector<8x8xf32>
    %60 = arith.subf %56, %59 : vector<8x8xf32>
    %61 = math.exp %60 : vector<8x8xf32>
    %cst_24 = arith.constant dense<0.000000e+00> : vector<8xf32>
    %62 = vector.multi_reduction <add>, %61, %cst_24 [1] : vector<8x8xf32> to vector<8xf32>
    %63 = vector.shape_cast %62 : vector<8xf32> to vector<8x1xf32>
    %64 = tpu.reciprocal %63 {approx = true} : vector<8x1xf32> -> vector<8x1xf32>
    %65 = arith.truncf %61 : vector<8x8xf32> to vector<8x8xbf16>
    %cst_25 = arith.constant dense<0.000000e+00> : vector<8x8xf32>
    %66 = tpu.matmul %65, %55, %cst_25 {dimension_numbers = #tpu.dot_dimension_numbers<[1], [0], [0], [1], [0, 0, 1, 1], [], []>} : vector<8x8xbf16>, vector<8x8xbf16>, vector<8x8xf32> -> vector<8x8xf32>
    %67 = vector.broadcast %64 : vector<8x1xf32> to vector<8x8xf32>
    %68 = arith.mulf %66, %67 : vector<8x8xf32>
    %69 = arith.truncf %68 : vector<8x8xf32> to vector<8x8xbf16>
    %c8 = arith.constant 8 : index
    %c0_26 = arith.constant 0 : index
    %70 = vector.load %arg6[%c8, %c0_26] : memref<32x32xbf16, #tpu.memory_space<vmem>>, vector<8x32xbf16>
    %cst_27 = arith.constant dense<0.000000e+00> : vector<8x32xf32>
    %71 = tpu.matmul %69, %70, %cst_27 {dimension_numbers = #tpu.dot_dimension_numbers<[1], [0], [0], [1], [0, 0, 1, 1], [], []>} : vector<8x8xbf16>, vector<8x32xbf16>, vector<8x32xf32> -> vector<8x32xf32>
    %72 = arith.addf %52, %71 : vector<8x32xf32>
    %73 = vector.extract_strided_slice %31 {offsets = [0, 16], sizes = [8, 8], strides = [1, 1]} : vector<16x96xbf16> to vector<8x8xbf16>
    %74 = vector.extract_strided_slice %31 {offsets = [0, 48], sizes = [8, 8], strides = [1, 1]} : vector<16x96xbf16> to vector<8x8xbf16>
    %75 = vector.extract_strided_slice %31 {offsets = [0, 80], sizes = [8, 8], strides = [1, 1]} : vector<16x96xbf16> to vector<8x8xbf16>
    %cst_28 = arith.constant dense<0.000000e+00> : vector<8x8xf32>
    %76 = tpu.matmul %73, %74, %cst_28 {dimension_numbers = #tpu.dot_dimension_numbers<[1], [1], [0], [0], [0, 0, 1, 0], [], []>} : vector<8x8xbf16>, vector<8x8xbf16>, vector<8x8xf32> -> vector<8x8xf32>
    %cst_29 = arith.constant dense<0xFF800000> : vector<8xf32>
    %77 = vector.multi_reduction <maximumf>, %76, %cst_29 [1] : vector<8x8xf32> to vector<8xf32>
    %78 = vector.shape_cast %77 : vector<8xf32> to vector<8x1xf32>
    %79 = vector.broadcast %78 : vector<8x1xf32> to vector<8x8xf32>
    %80 = arith.subf %76, %79 : vector<8x8xf32>
    %81 = math.exp %80 : vector<8x8xf32>
    %cst_30 = arith.constant dense<0.000000e+00> : vector<8xf32>
    %82 = vector.multi_reduction <add>, %81, %cst_30 [1] : vector<8x8xf32> to vector<8xf32>
    %83 = vector.shape_cast %82 : vector<8xf32> to vector<8x1xf32>
    %84 = tpu.reciprocal %83 {approx = true} : vector<8x1xf32> -> vector<8x1xf32>
    %85 = arith.truncf %81 : vector<8x8xf32> to vector<8x8xbf16>
    %cst_31 = arith.constant dense<0.000000e+00> : vector<8x8xf32>
    %86 = tpu.matmul %85, %75, %cst_31 {dimension_numbers = #tpu.dot_dimension_numbers<[1], [0], [0], [1], [0, 0, 1, 1], [], []>} : vector<8x8xbf16>, vector<8x8xbf16>, vector<8x8xf32> -> vector<8x8xf32>
    %87 = vector.broadcast %84 : vector<8x1xf32> to vector<8x8xf32>
    %88 = arith.mulf %86, %87 : vector<8x8xf32>
    %89 = arith.truncf %88 : vector<8x8xf32> to vector<8x8xbf16>
    %c16 = arith.constant 16 : index
    %c0_32 = arith.constant 0 : index
    %90 = vector.load %arg6[%c16, %c0_32] : memref<32x32xbf16, #tpu.memory_space<vmem>>, vector<8x32xbf16>
    %cst_33 = arith.constant dense<0.000000e+00> : vector<8x32xf32>
    %91 = tpu.matmul %89, %90, %cst_33 {dimension_numbers = #tpu.dot_dimension_numbers<[1], [0], [0], [1], [0, 0, 1, 1], [], []>} : vector<8x8xbf16>, vector<8x32xbf16>, vector<8x32xf32> -> vector<8x32xf32>
    %92 = arith.addf %72, %91 : vector<8x32xf32>
    %93 = vector.extract_strided_slice %31 {offsets = [0, 24], sizes = [8, 8], strides = [1, 1]} : vector<16x96xbf16> to vector<8x8xbf16>
    %94 = vector.extract_strided_slice %31 {offsets = [0, 56], sizes = [8, 8], strides = [1, 1]} : vector<16x96xbf16> to vector<8x8xbf16>
    %95 = vector.extract_strided_slice %31 {offsets = [0, 88], sizes = [8, 8], strides = [1, 1]} : vector<16x96xbf16> to vector<8x8xbf16>
    %cst_34 = arith.constant dense<0.000000e+00> : vector<8x8xf32>
    %96 = tpu.matmul %93, %94, %cst_34 {dimension_numbers = #tpu.dot_dimension_numbers<[1], [1], [0], [0], [0, 0, 1, 0], [], []>} : vector<8x8xbf16>, vector<8x8xbf16>, vector<8x8xf32> -> vector<8x8xf32>
    %cst_35 = arith.constant dense<0xFF800000> : vector<8xf32>
    %97 = vector.multi_reduction <maximumf>, %96, %cst_35 [1] : vector<8x8xf32> to vector<8xf32>
    %98 = vector.shape_cast %97 : vector<8xf32> to vector<8x1xf32>
    %99 = vector.broadcast %98 : vector<8x1xf32> to vector<8x8xf32>
    %100 = arith.subf %96, %99 : vector<8x8xf32>
    %101 = math.exp %100 : vector<8x8xf32>
    %cst_36 = arith.constant dense<0.000000e+00> : vector<8xf32>
    %102 = vector.multi_reduction <add>, %101, %cst_36 [1] : vector<8x8xf32> to vector<8xf32>
    %103 = vector.shape_cast %102 : vector<8xf32> to vector<8x1xf32>
    %104 = tpu.reciprocal %103 {approx = true} : vector<8x1xf32> -> vector<8x1xf32>
    %105 = arith.truncf %101 : vector<8x8xf32> to vector<8x8xbf16>
    %cst_37 = arith.constant dense<0.000000e+00> : vector<8x8xf32>
    %106 = tpu.matmul %105, %95, %cst_37 {dimension_numbers = #tpu.dot_dimension_numbers<[1], [0], [0], [1], [0, 0, 1, 1], [], []>} : vector<8x8xbf16>, vector<8x8xbf16>, vector<8x8xf32> -> vector<8x8xf32>
    %107 = vector.broadcast %104 : vector<8x1xf32> to vector<8x8xf32>
    %108 = arith.mulf %106, %107 : vector<8x8xf32>
    %109 = arith.truncf %108 : vector<8x8xf32> to vector<8x8xbf16>
    %c24 = arith.constant 24 : index
    %c0_38 = arith.constant 0 : index
    %110 = vector.load %arg6[%c24, %c0_38] : memref<32x32xbf16, #tpu.memory_space<vmem>>, vector<8x32xbf16>
    %cst_39 = arith.constant dense<0.000000e+00> : vector<8x32xf32>
    %111 = tpu.matmul %109, %110, %cst_39 {dimension_numbers = #tpu.dot_dimension_numbers<[1], [0], [0], [1], [0, 0, 1, 1], [], []>} : vector<8x8xbf16>, vector<8x32xbf16>, vector<8x32xf32> -> vector<8x32xf32>
    %112 = arith.addf %92, %111 : vector<8x32xf32>
    %c0_40 = arith.constant 0 : index
    %c0_41 = arith.constant 0 : index
    %113 = vector.load %arg15[%c0_40, %c0_41] : memref<16x32xf32, #tpu.memory_space<vmem>>, vector<8x32xf32>
    tpu.vector_store %arg15[%c0_40, %c0_41], %112 {strides = array<i32>} : memref<16x32xf32, #tpu.memory_space<vmem>>, vector<8x32xf32>,
    %cst_42 = arith.constant 0.000000e+00 : f32
    %114 = vector.broadcast %cst_42 : f32 to vector<8x32xf32>
    %115 = vector.extract_strided_slice %31 {offsets = [8, 0], sizes = [8, 8], strides = [1, 1]} : vector<16x96xbf16> to vector<8x8xbf16>
    %116 = vector.extract_strided_slice %31 {offsets = [8, 32], sizes = [8, 8], strides = [1, 1]} : vector<16x96xbf16> to vector<8x8xbf16>
    %117 = vector.extract_strided_slice %31 {offsets = [8, 64], sizes = [8, 8], strides = [1, 1]} : vector<16x96xbf16> to vector<8x8xbf16>
    %cst_43 = arith.constant dense<0.000000e+00> : vector<8x8xf32>
    %118 = tpu.matmul %115, %116, %cst_43 {dimension_numbers = #tpu.dot_dimension_numbers<[1], [1], [0], [0], [0, 0, 1, 0], [], []>} : vector<8x8xbf16>, vector<8x8xbf16>, vector<8x8xf32> -> vector<8x8xf32>
    %cst_44 = arith.constant dense<0xFF800000> : vector<8xf32>
    %119 = vector.multi_reduction <maximumf>, %118, %cst_44 [1] : vector<8x8xf32> to vector<8xf32>
    %120 = vector.shape_cast %119 : vector<8xf32> to vector<8x1xf32>
    %121 = vector.broadcast %120 : vector<8x1xf32> to vector<8x8xf32>
    %122 = arith.subf %118, %121 : vector<8x8xf32>
    %123 = math.exp %122 : vector<8x8xf32>
    %cst_45 = arith.constant dense<0.000000e+00> : vector<8xf32>
    %124 = vector.multi_reduction <add>, %123, %cst_45 [1] : vector<8x8xf32> to vector<8xf32>
    %125 = vector.shape_cast %124 : vector<8xf32> to vector<8x1xf32>
    %126 = tpu.reciprocal %125 {approx = true} : vector<8x1xf32> -> vector<8x1xf32>
    %127 = arith.truncf %123 : vector<8x8xf32> to vector<8x8xbf16>
    %cst_46 = arith.constant dense<0.000000e+00> : vector<8x8xf32>
    %128 = tpu.matmul %127, %117, %cst_46 {dimension_numbers = #tpu.dot_dimension_numbers<[1], [0], [0], [1], [0, 0, 1, 1], [], []>} : vector<8x8xbf16>, vector<8x8xbf16>, vector<8x8xf32> -> vector<8x8xf32>
    %129 = vector.broadcast %126 : vector<8x1xf32> to vector<8x8xf32>
    %130 = arith.mulf %128, %129 : vector<8x8xf32>
    %131 = arith.truncf %130 : vector<8x8xf32> to vector<8x8xbf16>
    %c0_47 = arith.constant 0 : index
    %c0_48 = arith.constant 0 : index
    %132 = vector.load %arg6[%c0_47, %c0_48] : memref<32x32xbf16, #tpu.memory_space<vmem>>, vector<8x32xbf16>
    %cst_49 = arith.constant dense<0.000000e+00> : vector<8x32xf32>
    %133 = tpu.matmul %131, %132, %cst_49 {dimension_numbers = #tpu.dot_dimension_numbers<[1], [0], [0], [1], [0, 0, 1, 1], [], []>} : vector<8x8xbf16>, vector<8x32xbf16>, vector<8x32xf32> -> vector<8x32xf32>
    %134 = arith.addf %114, %133 : vector<8x32xf32>
    %135 = vector.extract_strided_slice %31 {offsets = [8, 8], sizes = [8, 8], strides = [1, 1]} : vector<16x96xbf16> to vector<8x8xbf16>
    %136 = vector.extract_strided_slice %31 {offsets = [8, 40], sizes = [8, 8], strides = [1, 1]} : vector<16x96xbf16> to vector<8x8xbf16>
    %137 = vector.extract_strided_slice %31 {offsets = [8, 72], sizes = [8, 8], strides = [1, 1]} : vector<16x96xbf16> to vector<8x8xbf16>
    %cst_50 = arith.constant dense<0.000000e+00> : vector<8x8xf32>
    %138 = tpu.matmul %135, %136, %cst_50 {dimension_numbers = #tpu.dot_dimension_numbers<[1], [1], [0], [0], [0, 0, 1, 0], [], []>} : vector<8x8xbf16>, vector<8x8xbf16>, vector<8x8xf32> -> vector<8x8xf32>
    %cst_51 = arith.constant dense<0xFF800000> : vector<8xf32>
    %139 = vector.multi_reduction <maximumf>, %138, %cst_51 [1] : vector<8x8xf32> to vector<8xf32>
    %140 = vector.shape_cast %139 : vector<8xf32> to vector<8x1xf32>
    %141 = vector.broadcast %140 : vector<8x1xf32> to vector<8x8xf32>
    %142 = arith.subf %138, %141 : vector<8x8xf32>
    %143 = math.exp %142 : vector<8x8xf32>
    %cst_52 = arith.constant dense<0.000000e+00> : vector<8xf32>
    %144 = vector.multi_reduction <add>, %143, %cst_52 [1] : vector<8x8xf32> to vector<8xf32>
    %145 = vector.shape_cast %144 : vector<8xf32> to vector<8x1xf32>
    %146 = tpu.reciprocal %145 {approx = true} : vector<8x1xf32> -> vector<8x1xf32>
    %147 = arith.truncf %143 : vector<8x8xf32> to vector<8x8xbf16>
    %cst_53 = arith.constant dense<0.000000e+00> : vector<8x8xf32>
    %148 = tpu.matmul %147, %137, %cst_53 {dimension_numbers = #tpu.dot_dimension_numbers<[1], [0], [0], [1], [0, 0, 1, 1], [], []>} : vector<8x8xbf16>, vector<8x8xbf16>, vector<8x8xf32> -> vector<8x8xf32>
    %149 = vector.broadcast %146 : vector<8x1xf32> to vector<8x8xf32>
    %150 = arith.mulf %148, %149 : vector<8x8xf32>
    %151 = arith.truncf %150 : vector<8x8xf32> to vector<8x8xbf16>
    %c8_54 = arith.constant 8 : index
    %c0_55 = arith.constant 0 : index
    %152 = vector.load %arg6[%c8_54, %c0_55] : memref<32x32xbf16, #tpu.memory_space<vmem>>, vector<8x32xbf16>
    %cst_56 = arith.constant dense<0.000000e+00> : vector<8x32xf32>
    %153 = tpu.matmul %151, %152, %cst_56 {dimension_numbers = #tpu.dot_dimension_numbers<[1], [0], [0], [1], [0, 0, 1, 1], [], []>} : vector<8x8xbf16>, vector<8x32xbf16>, vector<8x32xf32> -> vector<8x32xf32>
    %154 = arith.addf %134, %153 : vector<8x32xf32>
    %155 = vector.extract_strided_slice %31 {offsets = [8, 16], sizes = [8, 8], strides = [1, 1]} : vector<16x96xbf16> to vector<8x8xbf16>
    %156 = vector.extract_strided_slice %31 {offsets = [8, 48], sizes = [8, 8], strides = [1, 1]} : vector<16x96xbf16> to vector<8x8xbf16>
    %157 = vector.extract_strided_slice %31 {offsets = [8, 80], sizes = [8, 8], strides = [1, 1]} : vector<16x96xbf16> to vector<8x8xbf16>
    %cst_57 = arith.constant dense<0.000000e+00> : vector<8x8xf32>
    %158 = tpu.matmul %155, %156, %cst_57 {dimension_numbers = #tpu.dot_dimension_numbers<[1], [1], [0], [0], [0, 0, 1, 0], [], []>} : vector<8x8xbf16>, vector<8x8xbf16>, vector<8x8xf32> -> vector<8x8xf32>
    %cst_58 = arith.constant dense<0xFF800000> : vector<8xf32>
    %159 = vector.multi_reduction <maximumf>, %158, %cst_58 [1] : vector<8x8xf32> to vector<8xf32>
    %160 = vector.shape_cast %159 : vector<8xf32> to vector<8x1xf32>
    %161 = vector.broadcast %160 : vector<8x1xf32> to vector<8x8xf32>
    %162 = arith.subf %158, %161 : vector<8x8xf32>
    %163 = math.exp %162 : vector<8x8xf32>
    %cst_59 = arith.constant dense<0.000000e+00> : vector<8xf32>
    %164 = vector.multi_reduction <add>, %163, %cst_59 [1] : vector<8x8xf32> to vector<8xf32>
    %165 = vector.shape_cast %164 : vector<8xf32> to vector<8x1xf32>
    %166 = tpu.reciprocal %165 {approx = true} : vector<8x1xf32> -> vector<8x1xf32>
    %167 = arith.truncf %163 : vector<8x8xf32> to vector<8x8xbf16>
    %cst_60 = arith.constant dense<0.000000e+00> : vector<8x8xf32>
    %168 = tpu.matmul %167, %157, %cst_60 {dimension_numbers = #tpu.dot_dimension_numbers<[1], [0], [0], [1], [0, 0, 1, 1], [], []>} : vector<8x8xbf16>, vector<8x8xbf16>, vector<8x8xf32> -> vector<8x8xf32>
    %169 = vector.broadcast %166 : vector<8x1xf32> to vector<8x8xf32>
    %170 = arith.mulf %168, %169 : vector<8x8xf32>
    %171 = arith.truncf %170 : vector<8x8xf32> to vector<8x8xbf16>
    %c16_61 = arith.constant 16 : index
    %c0_62 = arith.constant 0 : index
    %172 = vector.load %arg6[%c16_61, %c0_62] : memref<32x32xbf16, #tpu.memory_space<vmem>>, vector<8x32xbf16>
    %cst_63 = arith.constant dense<0.000000e+00> : vector<8x32xf32>
    %173 = tpu.matmul %171, %172, %cst_63 {dimension_numbers = #tpu.dot_dimension_numbers<[1], [0], [0], [1], [0, 0, 1, 1], [], []>} : vector<8x8xbf16>, vector<8x32xbf16>, vector<8x32xf32> -> vector<8x32xf32>
    %174 = arith.addf %154, %173 : vector<8x32xf32>
    %175 = vector.extract_strided_slice %31 {offsets = [8, 24], sizes = [8, 8], strides = [1, 1]} : vector<16x96xbf16> to vector<8x8xbf16>
    %176 = vector.extract_strided_slice %31 {offsets = [8, 56], sizes = [8, 8], strides = [1, 1]} : vector<16x96xbf16> to vector<8x8xbf16>
    %177 = vector.extract_strided_slice %31 {offsets = [8, 88], sizes = [8, 8], strides = [1, 1]} : vector<16x96xbf16> to vector<8x8xbf16>
    %cst_64 = arith.constant dense<0.000000e+00> : vector<8x8xf32>
    %178 = tpu.matmul %175, %176, %cst_64 {dimension_numbers = #tpu.dot_dimension_numbers<[1], [1], [0], [0], [0, 0, 1, 0], [], []>} : vector<8x8xbf16>, vector<8x8xbf16>, vector<8x8xf32> -> vector<8x8xf32>
    %cst_65 = arith.constant dense<0xFF800000> : vector<8xf32>
    %179 = vector.multi_reduction <maximumf>, %178, %cst_65 [1] : vector<8x8xf32> to vector<8xf32>
    %180 = vector.shape_cast %179 : vector<8xf32> to vector<8x1xf32>
    %181 = vector.broadcast %180 : vector<8x1xf32> to vector<8x8xf32>
    %182 = arith.subf %178, %181 : vector<8x8xf32>
    %183 = math.exp %182 : vector<8x8xf32>
    %cst_66 = arith.constant dense<0.000000e+00> : vector<8xf32>
    %184 = vector.multi_reduction <add>, %183, %cst_66 [1] : vector<8x8xf32> to vector<8xf32>
    %185 = vector.shape_cast %184 : vector<8xf32> to vector<8x1xf32>
    %186 = tpu.reciprocal %185 {approx = true} : vector<8x1xf32> -> vector<8x1xf32>
    %187 = arith.truncf %183 : vector<8x8xf32> to vector<8x8xbf16>
    %cst_67 = arith.constant dense<0.000000e+00> : vector<8x8xf32>
    %188 = tpu.matmul %187, %177, %cst_67 {dimension_numbers = #tpu.dot_dimension_numbers<[1], [0], [0], [1], [0, 0, 1, 1], [], []>} : vector<8x8xbf16>, vector<8x8xbf16>, vector<8x8xf32> -> vector<8x8xf32>
    %189 = vector.broadcast %186 : vector<8x1xf32> to vector<8x8xf32>
    %190 = arith.mulf %188, %189 : vector<8x8xf32>
    %191 = arith.truncf %190 : vector<8x8xf32> to vector<8x8xbf16>
    %c24_68 = arith.constant 24 : index
    %c0_69 = arith.constant 0 : index
    %192 = vector.load %arg6[%c24_68, %c0_69] : memref<32x32xbf16, #tpu.memory_space<vmem>>, vector<8x32xbf16>
    %cst_70 = arith.constant dense<0.000000e+00> : vector<8x32xf32>
    %193 = tpu.matmul %191, %192, %cst_70 {dimension_numbers = #tpu.dot_dimension_numbers<[1], [0], [0], [1], [0, 0, 1, 1], [], []>} : vector<8x8xbf16>, vector<8x32xbf16>, vector<8x32xf32> -> vector<8x32xf32>
    %194 = arith.addf %174, %193 : vector<8x32xf32>
    %c8_71 = arith.constant 8 : index
    %c0_72 = arith.constant 0 : index
    %195 = vector.load %arg15[%c8_71, %c0_72] : memref<16x32xf32, #tpu.memory_space<vmem>>, vector<8x32xf32>
    tpu.vector_store %arg15[%c8_71, %c0_72], %194 {strides = array<i32>} : memref<16x32xf32, #tpu.memory_space<vmem>>, vector<8x32xf32>,
    %c0_73 = arith.constant 0 : index
    %c0_74 = arith.constant 0 : index
    %196 = vector.load %arg15[%c0_73, %c0_74] : memref<16x32xf32, #tpu.memory_space<vmem>>, vector<16x32xf32>
    %197 = arith.addf %0, %196 : vector<16x32xf32>
    %c0_75 = arith.constant 0 : index
    %c0_76 = arith.constant 0 : index
    %198 = vector.load %arg7[%c0_75, %c0_76] : memref<1x32xf32, #tpu.memory_space<vmem>>, vector<1x32xf32>
    %199 = vector.broadcast %198 : vector<1x32xf32> to vector<16x32xf32>
    %200 = arith.addf %197, %199 : vector<16x32xf32>
    %c0_77 = arith.constant 0 : index
    %c0_78 = arith.constant 0 : index
    %201 = vector.load %arg8[%c0_77, %c0_78] : memref<1x32xf32, #tpu.memory_space<vmem>>, vector<1x32xf32>
    %c0_79 = arith.constant 0 : index
    %c0_80 = arith.constant 0 : index
    %202 = vector.load %arg9[%c0_79, %c0_80] : memref<1x32xf32, #tpu.memory_space<vmem>>, vector<1x32xf32>
    %cst_81 = arith.constant dense<0.000000e+00> : vector<16xf32>
    %203 = vector.multi_reduction <add>, %200, %cst_81 [1] : vector<16x32xf32> to vector<16xf32>
    %204 = vector.shape_cast %203 : vector<16xf32> to vector<16x1xf32>
    %cst_82 = arith.constant 3.200000e+01 : f32
    %205 = vector.broadcast %cst_82 : f32 to vector<16x1xf32>
    %206 = arith.divf %204, %205 : vector<16x1xf32>
    %207 = vector.broadcast %206 : vector<16x1xf32> to vector<16x32xf32>
    %208 = arith.subf %200, %207 : vector<16x32xf32>
    %209 = arith.mulf %208, %208 : vector<16x32xf32>
    %cst_83 = arith.constant dense<0.000000e+00> : vector<16xf32>
    %210 = vector.multi_reduction <add>, %209, %cst_83 [1] : vector<16x32xf32> to vector<16xf32>
    %211 = vector.shape_cast %210 : vector<16xf32> to vector<16x1xf32>
    %cst_84 = arith.constant 3.200000e+01 : f32
    %212 = vector.broadcast %cst_84 : f32 to vector<16x1xf32>
    %213 = arith.divf %211, %212 : vector<16x1xf32>
    %214 = vector.broadcast %206 : vector<16x1xf32> to vector<16x32xf32>
    %215 = arith.subf %200, %214 : vector<16x32xf32>
    %cst_85 = arith.constant 9.99999974E-6 : f32
    %216 = vector.broadcast %cst_85 : f32 to vector<16x1xf32>
    %217 = arith.addf %213, %216 : vector<16x1xf32>
    %218 = math.rsqrt %217 : vector<16x1xf32>
    %219 = vector.broadcast %218 : vector<16x1xf32> to vector<16x32xf32>
    %220 = arith.mulf %215, %219 : vector<16x32xf32>
    %221 = vector.broadcast %201 : vector<1x32xf32> to vector<16x32xf32>
    %222 = arith.mulf %220, %221 : vector<16x32xf32>
    %223 = vector.broadcast %202 : vector<1x32xf32> to vector<16x32xf32>
    %224 = arith.addf %222, %223 : vector<16x32xf32>
    %225 = arith.truncf %224 : vector<16x32xf32> to vector<16x32xbf16>
    %c0_86 = arith.constant 0 : index
    %c0_87 = arith.constant 0 : index
    %226 = vector.load %arg10[%c0_86, %c0_87] : memref<32x128xbf16, #tpu.memory_space<vmem>>, vector<32x128xbf16>
    %cst_88 = arith.constant dense<0.000000e+00> : vector<16x128xf32>
    %227 = tpu.matmul %225, %226, %cst_88 {dimension_numbers = #tpu.dot_dimension_numbers<[1], [0], [0], [1], [0, 0, 1, 1], [], []>} : vector<16x32xbf16>, vector<32x128xbf16>, vector<16x128xf32> -> vector<16x128xf32>
    %c0_89 = arith.constant 0 : index
    %c0_90 = arith.constant 0 : index
    %228 = vector.load %arg11[%c0_89, %c0_90] : memref<1x128xf32, #tpu.memory_space<vmem>>, vector<1x128xf32>
    %229 = vector.broadcast %228 : vector<1x128xf32> to vector<16x128xf32>
    %230 = arith.addf %227, %229 : vector<16x128xf32>
    %cst_91 = arith.constant 0.000000e+00 : f32
    %231 = vector.broadcast %cst_91 : f32 to vector<16x128xf32>
    %232 = arith.maximumf %230, %231 : vector<16x128xf32>
    %233 = arith.truncf %232 : vector<16x128xf32> to vector<16x128xbf16>
    %c0_92 = arith.constant 0 : index
    %c0_93 = arith.constant 0 : index
    %234 = vector.load %arg12[%c0_92, %c0_93] : memref<128x32xbf16, #tpu.memory_space<vmem>>, vector<128x32xbf16>
    %cst_94 = arith.constant dense<0.000000e+00> : vector<16x32xf32>
    %235 = tpu.matmul %233, %234, %cst_94 {dimension_numbers = #tpu.dot_dimension_numbers<[1], [0], [0], [1], [0, 0, 1, 1], [], []>} : vector<16x128xbf16>, vector<128x32xbf16>, vector<16x32xf32> -> vector<16x32xf32>
    %c0_95 = arith.constant 0 : index
    %c0_96 = arith.constant 0 : index
    %236 = vector.load %arg13[%c0_95, %c0_96] : memref<1x32xf32, #tpu.memory_space<vmem>>, vector<1x32xf32>
    %237 = vector.broadcast %236 : vector<1x32xf32> to vector<16x32xf32>
    %238 = arith.addf %235, %237 : vector<16x32xf32>
    %239 = arith.addf %200, %238 : vector<16x32xf32>
    %c0_97 = arith.constant 0 : index
    %c0_98 = arith.constant 0 : index
    %240 = vector.load %arg14[%c0_97, %c0_98] : memref<16x32xf32, #tpu.memory_space<vmem>>, vector<16x32xf32>
    tpu.vector_store %arg14[%c0_97, %c0_98], %239 {strides = array<i32>} : memref<16x32xf32, #tpu.memory_space<vmem>>, vector<16x32xf32>,
    return
  }
  func.func @transform_0(%arg0: i32) -> (i32, i32) {
    %c0_i32 = arith.constant 0 : i32
    %c0_i32_0 = arith.constant 0 : i32
    return %arg0, %c0_i32 : i32, i32
  }
  func.func @transform_1(%arg0: i32) -> (i32, i32) {
    %c0_i32 = arith.constant 0 : i32
    %c0_i32_0 = arith.constant 0 : i32
    %c0_i32_1 = arith.constant 0 : i32
    return %c0_i32, %c0_i32_0 : i32, i32
  }
  func.func @transform_2(%arg0: i32) -> (i32, i32) {
    %c0_i32 = arith.constant 0 : i32
    %c0_i32_0 = arith.constant 0 : i32
    %c0_i32_1 = arith.constant 0 : i32
    return %c0_i32, %c0_i32_0 : i32, i32
  }
  func.func @transform_3(%arg0: i32) -> (i32, i32) {
    %c0_i32 = arith.constant 0 : i32
    %c0_i32_0 = arith.constant 0 : i32
    %c0_i32_1 = arith.constant 0 : i32
    return %c0_i32, %c0_i32_0 : i32, i32
  }
  func.func @transform_4(%arg0: i32) -> (i32, i32) {
    %c0_i32 = arith.constant 0 : i32
    %c0_i32_0 = arith.constant 0 : i32
    %c0_i32_1 = arith.constant 0 : i32
    return %c0_i32, %c0_i32_0 : i32, i32
  }
  func.func @transform_5(%arg0: i32) -> (i32, i32) {
    %c0_i32 = arith.constant 0 : i32
    %c0_i32_0 = arith.constant 0 : i32
    %c0_i32_1 = arith.constant 0 : i32
    return %c0_i32, %c0_i32_0 : i32, i32
  }
  func.func @transform_6(%arg0: i32) -> (i32, i32) {
    %c0_i32 = arith.constant 0 : i32
    %c0_i32_0 = arith.constant 0 : i32
    %c0_i32_1 = arith.constant 0 : i32
    return %c0_i32, %c0_i32_0 : i32, i32
  }
  func.func @transform_7(%arg0: i32) -> (i32, i32) {
    %c0_i32 = arith.constant 0 : i32
    %c0_i32_0 = arith.constant 0 : i32
    %c0_i32_1 = arith.constant 0 : i32
    return %c0_i32, %c0_i32_0 : i32, i32
  }
  func.func @transform_8(%arg0: i32) -> (i32, i32) {
    %c0_i32 = arith.constant 0 : i32
    %c0_i32_0 = arith.constant 0 : i32
    %c0_i32_1 = arith.constant 0 : i32
    return %c0_i32, %c0_i32_0 : i32, i32
  }
  func.func @transform_9(%arg0: i32) -> (i32, i32) {
    %c0_i32 = arith.constant 0 : i32
    %c0_i32_0 = arith.constant 0 : i32
    %c0_i32_1 = arith.constant 0 : i32
    return %c0_i32, %c0_i32_0 : i32, i32
  }
  func.func @transform_10(%arg0: i32) -> (i32, i32) {
    %c0_i32 = arith.constant 0 : i32
    %c0_i32_0 = arith.constant 0 : i32
    %c0_i32_1 = arith.constant 0 : i32
    return %c0_i32, %c0_i32_0 : i32, i32
  }
  func.func @transform_11(%arg0: i32) -> (i32, i32) {
    %c0_i32 = arith.constant 0 : i32
    %c0_i32_0 = arith.constant 0 : i32
    %c0_i32_1 = arith.constant 0 : i32
    return %c0_i32, %c0_i32_0 : i32, i32
  }
  func.func @transform_12(%arg0: i32) -> (i32, i32) {
    %c0_i32 = arith.constant 0 : i32
    %c0_i32_0 = arith.constant 0 : i32
    %c0_i32_1 = arith.constant 0 : i32
    return %c0_i32, %c0_i32_0 : i32, i32
  }
  func.func @transform_13(%arg0: i32) -> (i32, i32) {
    %c0_i32 = arith.constant 0 : i32
    %c0_i32_0 = arith.constant 0 : i32
    return %arg0, %c0_i32 : i32, i32
  }
}

module attributes {stable_mosaic.version = 11 : i64} {
  func.func @block_kernel(%arg0: i32, %arg1: memref<16x32xf32, #tpu.memory_space<vmem>>, %arg2: memref<1x32xf32, #tpu.memory_space<vmem>>, %arg3: memref<1x32xf32, #tpu.memory_space<vmem>>, %arg4: memref<32x96xbf16, #tpu.memory_space<vmem>>, %arg5: memref<1x96xf32, #tpu.memory_space<vmem>>, %arg6: memref<32x32xbf16, #tpu.memory_space<vmem>>, %arg7: memref<1x32xf32, #tpu.memory_space<vmem>>, %arg8: memref<1x32xf32, #tpu.memory_space<vmem>>, %arg9: memref<1x32xf32, #tpu.memory_space<vmem>>, %arg10: memref<32x128xbf16, #tpu.memory_space<vmem>>, %arg11: memref<1x128xf32, #tpu.memory_space<vmem>>, %arg12: memref<128x32xbf16, #tpu.memory_space<vmem>>, %arg13: memref<1x32xf32, #tpu.memory_space<vmem>>, %arg14: memref<16x32xf32, #tpu.memory_space<vmem>>, %arg15: memref<16x32xf32, #tpu.memory_space<vmem>>) attributes {dimension_semantics = [#tpu.dimension_semantics<parallel>], iteration_bounds = array<i64: 1>, scalar_prefetch = 0 : i64, scratch_operands = 1 : i64, tpu.core_type = #tpu.core_type<tc>, window_params = [{transform_indices = @transform_0, window_bounds = array<i64: 16, 32>}, {pipeline_mode = #tpu.pipeline_mode<synchronous>, transform_indices = @transform_1, window_bounds = array<i64: 1, 32>}, {pipeline_mode = #tpu.pipeline_mode<synchronous>, transform_indices = @transform_2, window_bounds = array<i64: 1, 32>}, {pipeline_mode = #tpu.pipeline_mode<synchronous>, transform_indices = @transform_3, window_bounds = array<i64: 32, 96>}, {pipeline_mode = #tpu.pipeline_mode<synchronous>, transform_indices = @transform_4, window_bounds = array<i64: 1, 96>}, {pipeline_mode = #tpu.pipeline_mode<synchronous>, transform_indices = @transform_5, window_bounds = array<i64: 32, 32>}, {pipeline_mode = #tpu.pipeline_mode<synchronous>, transform_indices = @transform_6, window_bounds = array<i64: 1, 32>}, {pipeline_mode = #tpu.pipeline_mode<synchronous>, transform_indices = @transform_7, window_bounds = array<i64: 1, 32>}, {pipeline_mode = #tpu.pipeline_mode<synchronous>, transform_indices = @transform_8, window_bounds = array<i64: 1, 32>}, {pipeline_mode = #tpu.pipeline_mode<synchronous>, transform_indices = @transform_9, window_bounds = array<i64: 32, 128>}, {pipeline_mode = #tpu.pipeline_mode<synchronous>, transform_indices = @transform_10, window_bounds = array<i64: 1, 128>}, {pipeline_mode = #tpu.pipeline_mode<synchronous>, transform_indices = @transform_11, window_bounds = array<i64: 128, 32>}, {pipeline_mode = #tpu.pipeline_mode<synchronous>, transform_indices = @transform_12, window_bounds = array<i64: 1, 32>}, {transform_indices = @transform_13, window_bounds = array<i64: 16, 32>}]} {
    %c0 = arith.constant 0 : index
    %c0_0 = arith.constant 0 : index
    %0 = vector.load %arg1[%c0, %c0_0] : memref<16x32xf32, #tpu.memory_space<vmem>>, vector<16x32xf32>
    %c0_1 = arith.constant 0 : index
    %c0_2 = arith.constant 0 : index
    %1 = vector.load %arg2[%c0_1, %c0_2] : memref<1x32xf32, #tpu.memory_space<vmem>>, vector<1x32xf32>
    %c0_3 = arith.constant 0 : index
    %c0_4 = arith.constant 0 : index
    %2 = vector.load %arg3[%c0_3, %c0_4] : memref<1x32xf32, #tpu.memory_space<vmem>>, vector<1x32xf32>
    %cst = arith.constant dense<0.000000e+00> : vector<16xf32>
    %3 = vector.multi_reduction <add>, %0, %cst [1] : vector<16x32xf32> to vector<16xf32>
    %4 = vector.shape_cast %3 : vector<16xf32> to vector<16x1xf32>
    %cst_5 = arith.constant 3.200000e+01 : f32
    %5 = vector.broadcast %cst_5 : f32 to vector<16x1xf32>
    %6 = arith.divf %4, %5 : vector<16x1xf32>
    %7 = vector.broadcast %6 : vector<16x1xf32> to vector<16x32xf32>
    %8 = arith.subf %0, %7 : vector<16x32xf32>
    %9 = arith.mulf %8, %8 : vector<16x32xf32>
    %cst_6 = arith.constant dense<0.000000e+00> : vector<16xf32>
    %10 = vector.multi_reduction <add>, %9, %cst_6 [1] : vector<16x32xf32> to vector<16xf32>
    %11 = vector.shape_cast %10 : vector<16xf32> to vector<16x1xf32>
    %cst_7 = arith.constant 3.200000e+01 : f32
    %12 = vector.broadcast %cst_7 : f32 to vector<16x1xf32>
    %13 = arith.divf %11, %12 : vector<16x1xf32>
    %14 = vector.broadcast %6 : vector<16x1xf32> to vector<16x32xf32>
    %15 = arith.subf %0, %14 : vector<16x32xf32>
    %cst_8 = arith.constant 9.99999974E-6 : f32
    %16 = vector.broadcast %cst_8 : f32 to vector<16x1xf32>
    %17 = arith.addf %13, %16 : vector<16x1xf32>
    %18 = math.rsqrt %17 : vector<16x1xf32>
    %19 = vector.broadcast %18 : vector<16x1xf32> to vector<16x32xf32>
    %20 = arith.mulf %15, %19 : vector<16x32xf32>
    %21 = vector.broadcast %1 : vector<1x32xf32> to vector<16x32xf32>
    %22 = arith.mulf %20, %21 : vector<16x32xf32>
    %23 = vector.broadcast %2 : vector<1x32xf32> to vector<16x32xf32>
    %24 = arith.addf %22, %23 : vector<16x32xf32>
    %25 = arith.truncf %24 : vector<16x32xf32> to vector<16x32xbf16>
    %c0_9 = arith.constant 0 : index
    %c0_10 = arith.constant 0 : index
    %26 = vector.load %arg4[%c0_9, %c0_10] : memref<32x96xbf16, #tpu.memory_space<vmem>>, vector<32x96xbf16>
    %cst_11 = arith.constant dense<0.000000e+00> : vector<16x96xf32>
    %27 = tpu.matmul %25, %26, %cst_11 {dimension_numbers = #tpu.dot_dimension_numbers<[1], [0], [0], [1], [0, 0, 1, 1], [], []>} : vector<16x32xbf16>, vector<32x96xbf16>, vector<16x96xf32> -> vector<16x96xf32>
    %c0_12 = arith.constant 0 : index
    %c0_13 = arith.constant 0 : index
    %28 = vector.load %arg5[%c0_12, %c0_13] : memref<1x96xf32, #tpu.memory_space<vmem>>, vector<1x96xf32>
    %29 = vector.broadcast %28 : vector<1x96xf32> to vector<16x96xf32>
    %30 = arith.addf %27, %29 : vector<16x96xf32>
    %31 = arith.truncf %30 : vector<16x96xf32> to vector<16x96xbf16>
    %cst_14 = arith.constant 0.000000e+00 : f32
    %32 = vector.broadcast %cst_14 : f32 to vector<8x32xf32>
    %33 = vector.extract_strided_slice %31 {offsets = [0, 0], sizes = [8, 8], strides = [1, 1]} : vector<16x96xbf16> to vector<8x8xbf16>
    %34 = vector.extract_strided_slice %31 {offsets = [0, 32], sizes = [8, 8], strides = [1, 1]} : vector<16x96xbf16> to vector<8x8xbf16>
    %35 = vector.extract_strided_slice %31 {offsets = [0, 64], sizes = [8, 8], strides = [1, 1]} : vector<16x96xbf16> to vector<8x8xbf16>
    %cst_15 = arith.constant dense<0.000000e+00> : vector<8x8xf32>
    %36 = tpu.matmul %33, %34, %cst_15 {dimension_numbers = #tpu.dot_dimension_numbers<[1], [1], [0], [0], [0, 0, 1, 0], [], []>} : vector<8x8xbf16>, vector<8x8xbf16>, vector<8x8xf32> -> vector<8x8xf32>
    %cst_16 = arith.constant dense<0xFF800000> : vector<8xf32>
    %37 = vector.multi_reduction <maximumf>, %36, %cst_16 [1] : vector<8x8xf32> to vector<8xf32>
    %38 = vector.shape_cast %37 : vector<8xf32> to vector<8x1xf32>
    %39 = vector.broadcast %38 : vector<8x1xf32> to vector<8x8xf32>
    %40 = arith.subf %36, %39 : vector<8x8xf32>
    %41 = math.exp %40 : vector<8x8xf32>
    %cst_17 = arith.constant dense<0.000000e+00> : vector<8xf32>
    %42 = vector.multi_reduction <add>, %41, %cst_17 [1] : vector<8x8xf32> to vector<8xf32>
    %43 = vector.shape_cast %42 : vector<8xf32> to vector<8x1xf32>
    %44 = tpu.reciprocal %43 {approx = true} : vector<8x1xf32> -> vector<8x1xf32>
    %45 = arith.truncf %41 : vector<8x8xf32> to vector<8x8xbf16>
    %cst_18 = arith.constant dense<0.000000e+00> : vector<8x8xf32>
    %46 = tpu.matmul %45, %35, %cst_18 {dimension_numbers = #tpu.dot_dimension_numbers<[1], [0], [0], [1], [0, 0, 1, 1], [], []>} : vector<8x8xbf16>, vector<8x8xbf16>, vector<8x8xf32> -> vector<8x8xf32>
    %47 = vector.broadcast %44 : vector<8x1xf32> to vector<8x8xf32>
    %48 = arith.mulf %46, %47 : vector<8x8xf32>
    %49 = arith.truncf %48 : vector<8x8xf32> to vector<8x8xbf16>
    %c0_19 = arith.constant 0 : index
    %c0_20 = arith.constant 0 : index
    %50 = vector.load %arg6[%c0_19, %c0_20] : memref<32x32xbf16, #tpu.memory_space<vmem>>, vector<8x32xbf16>
    %cst_21 = arith.constant dense<0.000000e+00> : vector<8x32xf32>
    %51 = tpu.matmul %49, %50, %cst_21 {dimension_numbers = #tpu.dot_dimension_numbers<[1], [0], [0], [1], [0, 0, 1, 1], [], []>} : vector<8x8xbf16>, vector<8x32xbf16>, vector<8x32xf32> -> vector<8x32xf32>
    %52 = arith.addf %32, %51 : vector<8x32xf32>
    %53 = vector.extract_strided_slice %31 {offsets = [0, 8], sizes = [8, 8], strides = [1, 1]} : vector<16x96xbf16> to vector<8x8xbf16>
    %54 = vector.extract_strided_slice %31 {offsets = [0, 40], sizes = [8, 8], strides = [1, 1]} : vector<16x96xbf16> to vector<8x8xbf16>
    %55 = vector.extract_strided_slice %31 {offsets = [0, 72], sizes = [8, 8], strides = [1, 1]} : vector<16x96xbf16> to vector<8x8xbf16>
    %cst_22 = arith.constant dense<0.000000e+00> : vector<8x8xf32>
    %56 = tpu.matmul %53, %54, %cst_22 {dimension_numbers = #tpu.dot_dimension_numbers<[1], [1], [0], [0], [0, 0, 1, 0], [], []>} : vector<8x8xbf16>, vector<8x8xbf16>, vector<8x8xf32> -> vector<8x8xf32>
    %cst_23 = arith.constant dense<0xFF800000> : vector<8xf32>
    %57 = vector.multi_reduction <maximumf>, %56, %cst_23 [1] : vector<8x8xf32> to vector<8xf32>
    %58 = vector.shape_cast %57 : vector<8xf32> to vector<8x1xf32>
    %59 = vector.broadcast %58 : vector<8x1xf32> to vector<8x8xf32>
    %60 = arith.subf %56, %59 : vector<8x8xf32>
    %61 = math.exp %60 : vector<8x8xf32>
    %cst_24 = arith.constant dense<0.000000e+00> : vector<8xf32>
    %62 = vector.multi_reduction <add>, %61, %cst_24 [1] : vector<8x8xf32> to vector<8xf32>
    %63 = vector.shape_cast %62 : vector<8xf32> to vector<8x1xf32>
    %64 = tpu.reciprocal %63 {approx = true} : vector<8x1xf32> -> vector<8x1xf32>
    %65 = arith.truncf %61 : vector<8x8xf32> to vector<8x8xbf16>
    %cst_25 = arith.constant dense<0.000000e+00> : vector<8x8xf32>
    %66 = tpu.matmul %65, %55, %cst_25 {dimension_numbers = #tpu.dot_dimension_numbers<[1], [0], [0], [1], [0, 0, 1, 1], [], []>} : vector<8x8xbf16>, vector<8x8xbf16>, vector<8x8xf32> -> vector<8x8xf32>
    %67 = vector.broadcast %64 : vector<8x1xf32> to vector<8x8xf32>
    %68 = arith.mulf %66, %67 : vector<8x8xf32>
    %69 = arith.truncf %68 : vector<8x8xf32> to vector<8x8xbf16>
    %c8 = arith.constant 8 : index
    %c0_26 = arith.constant 0 : index
    %70 = vector.load %arg6[%c8, %c0_26] : memref<32x32xbf16, #tpu.memory_space<vmem>>, vector<8x32xbf16>
    %cst_27 = arith.constant dense<0.000000e+00> : vector<8x32xf32>
    %71 = tpu.matmul %69, %70, %cst_27 {dimension_numbers = #tpu.dot_dimension_numbers<[1], [0], [0], [1], [0, 0, 1, 1], [], []>} : vector<8x8xbf16>, vector<8x32xbf16>, vector<8x32xf32> -> vector<8x32xf32>
    %72 = arith.addf %52, %71 : vector<8x32xf32>
    %73 = vector.extract_strided_slice %31 {offsets = [0, 16], sizes = [8, 8], strides = [1, 1]} : vector<16x96xbf16> to vector<8x8xbf16>
    %74 = vector.extract_strided_slice %31 {offsets = [0, 48], sizes = [8, 8], strides = [1, 1]} : vector<16x96xbf16> to vector<8x8xbf16>
    %75 = vector.extract_strided_slice %31 {offsets = [0, 80], sizes = [8, 8], strides = [1, 1]} : vector<16x96xbf16> to vector<8x8xbf16>
    %cst_28 = arith.constant dense<0.000000e+00> : vector<8x8xf32>
    %76 = tpu.matmul %73, %74, %cst_28 {dimension_numbers = #tpu.dot_dimension_numbers<[1], [1], [0], [0], [0, 0, 1, 0], [], []>} : vector<8x8xbf16>, vector<8x8xbf16>, vector<8x8xf32> -> vector<8x8xf32>
    %cst_29 = arith.constant dense<0xFF800000> : vector<8xf32>
    %77 = vector.multi_reduction <maximumf>, %76, %cst_29 [1] : vector<8x8xf32> to vector<8xf32>
    %78 = vector.shape_cast %77 : vector<8xf32> to vector<8x1xf32>
    %79 = vector.broadcast %78 : vector<8x1xf32> to vector<8x8xf32>
    %80 = arith.subf %76, %79 : vector<8x8xf32>
    %81 = math.exp %80 : vector<8x8xf32>
    %cst_30 = arith.constant dense<0.000000e+00> : vector<8xf32>
    %82 = vector.multi_reduction <add>, %81, %cst_30 [1] : vector<8x8xf32> to vector<8xf32>
    %83 = vector.shape_cast %82 : vector<8xf32> to vector<8x1xf32>
    %84 = tpu.reciprocal %83 {approx = true} : vector<8x1xf32> -> vector<8x1xf32>
    %85 = arith.truncf %81 : vector<8x8xf32> to vector<8x8xbf16>
    %cst_31 = arith.constant dense<0.000000e+00> : vector<8x8xf32>
    %86 = tpu.matmul %85, %75, %cst_31 {dimension_numbers = #tpu.dot_dimension_numbers<[1], [0], [0], [1], [0, 0, 1, 1], [], []>} : vector<8x8xbf16>, vector<8x8xbf16>, vector<8x8xf32> -> vector<8x8xf32>
    %87 = vector.broadcast %84 : vector<8x1xf32> to vector<8x8xf32>
    %88 = arith.mulf %86, %87 : vector<8x8xf32>
    %89 = arith.truncf %88 : vector<8x8xf32> to vector<8x8xbf16>
    %c16 = arith.constant 16 : index
    %c0_32 = arith.constant 0 : index
    %90 = vector.load %arg6[%c16, %c0_32] : memref<32x32xbf16, #tpu.memory_space<vmem>>, vector<8x32xbf16>
    %cst_33 = arith.constant dense<0.000000e+00> : vector<8x32xf32>
    %91 = tpu.matmul %89, %90, %cst_33 {dimension_numbers = #tpu.dot_dimension_numbers<[1], [0], [0], [1], [0, 0, 1, 1], [], []>} : vector<8x8xbf16>, vector<8x32xbf16>, vector<8x32xf32> -> vector<8x32xf32>
    %92 = arith.addf %72, %91 : vector<8x32xf32>
    %93 = vector.extract_strided_slice %31 {offsets = [0, 24], sizes = [8, 8], strides = [1, 1]} : vector<16x96xbf16> to vector<8x8xbf16>
    %94 = vector.extract_strided_slice %31 {offsets = [0, 56], sizes = [8, 8], strides = [1, 1]} : vector<16x96xbf16> to vector<8x8xbf16>
    %95 = vector.extract_strided_slice %31 {offsets = [0, 88], sizes = [8, 8], strides = [1, 1]} : vector<16x96xbf16> to vector<8x8xbf16>
    %cst_34 = arith.constant dense<0.000000e+00> : vector<8x8xf32>
    %96 = tpu.matmul %93, %94, %cst_34 {dimension_numbers = #tpu.dot_dimension_numbers<[1], [1], [0], [0], [0, 0, 1, 0], [], []>} : vector<8x8xbf16>, vector<8x8xbf16>, vector<8x8xf32> -> vector<8x8xf32>
    %cst_35 = arith.constant dense<0xFF800000> : vector<8xf32>
    %97 = vector.multi_reduction <maximumf>, %96, %cst_35 [1] : vector<8x8xf32> to vector<8xf32>
    %98 = vector.shape_cast %97 : vector<8xf32> to vector<8x1xf32>
    %99 = vector.broadcast %98 : vector<8x1xf32> to vector<8x8xf32>
    %100 = arith.subf %96, %99 : vector<8x8xf32>
    %101 = math.exp %100 : vector<8x8xf32>
    %cst_36 = arith.constant dense<0.000000e+00> : vector<8xf32>
    %102 = vector.multi_reduction <add>, %101, %cst_36 [1] : vector<8x8xf32> to vector<8xf32>
    %103 = vector.shape_cast %102 : vector<8xf32> to vector<8x1xf32>
    %104 = tpu.reciprocal %103 {approx = true} : vector<8x1xf32> -> vector<8x1xf32>
    %105 = arith.truncf %101 : vector<8x8xf32> to vector<8x8xbf16>
    %cst_37 = arith.constant dense<0.000000e+00> : vector<8x8xf32>
    %106 = tpu.matmul %105, %95, %cst_37 {dimension_numbers = #tpu.dot_dimension_numbers<[1], [0], [0], [1], [0, 0, 1, 1], [], []>} : vector<8x8xbf16>, vector<8x8xbf16>, vector<8x8xf32> -> vector<8x8xf32>
    %107 = vector.broadcast %104 : vector<8x1xf32> to vector<8x8xf32>
    %108 = arith.mulf %106, %107 : vector<8x8xf32>
    %109 = arith.truncf %108 : vector<8x8xf32> to vector<8x8xbf16>
    %c24 = arith.constant 24 : index
    %c0_38 = arith.constant 0 : index
    %110 = vector.load %arg6[%c24, %c0_38] : memref<32x32xbf16, #tpu.memory_space<vmem>>, vector<8x32xbf16>
    %cst_39 = arith.constant dense<0.000000e+00> : vector<8x32xf32>
    %111 = tpu.matmul %109, %110, %cst_39 {dimension_numbers = #tpu.dot_dimension_numbers<[1], [0], [0], [1], [0, 0, 1, 1], [], []>} : vector<8x8xbf16>, vector<8x32xbf16>, vector<8x32xf32> -> vector<8x32xf32>
    %112 = arith.addf %92, %111 : vector<8x32xf32>
    %c0_40 = arith.constant 0 : index
    %c0_41 = arith.constant 0 : index
    %113 = vector.load %arg15[%c0_40, %c0_41] : memref<16x32xf32, #tpu.memory_space<vmem>>, vector<8x32xf32>
    tpu.vector_store %arg15[%c0_40, %c0_41], %112 {strides = array<i32>} : memref<16x32xf32, #tpu.memory_space<vmem>>, vector<8x32xf32>,
    %cst_42 = arith.constant 0.000000e+00 : f32
    %114 = vector.broadcast %cst_42 : f32 to vector<8x32xf32>
    %115 = vector.extract_strided_slice %31 {offsets = [8, 0], sizes = [8, 8], strides = [1, 1]} : vector<16x96xbf16> to vector<8x8xbf16>
    %116 = vector.extract_strided_slice %31 {offsets = [8, 32], sizes = [8, 8], strides = [1, 1]} : vector<16x96xbf16> to vector<8x8xbf16>
    %117 = vector.extract_strided_slice %31 {offsets = [8, 64], sizes = [8, 8], strides = [1, 1]} : vector<16x96xbf16> to vector<8x8xbf16>
    %cst_43 = arith.constant dense<0.000000e+00> : vector<8x8xf32>
    %118 = tpu.matmul %115, %116, %cst_43 {dimension_numbers = #tpu.dot_dimension_numbers<[1], [1], [0], [0], [0, 0, 1, 0], [], []>} : vector<8x8xbf16>, vector<8x8xbf16>, vector<8x8xf32> -> vector<8x8xf32>
    %cst_44 = arith.constant dense<0xFF800000> : vector<8xf32>
    %119 = vector.multi_reduction <maximumf>, %118, %cst_44 [1] : vector<8x8xf32> to vector<8xf32>
    %120 = vector.shape_cast %119 : vector<8xf32> to vector<8x1xf32>
    %121 = vector.broadcast %120 : vector<8x1xf32> to vector<8x8xf32>
    %122 = arith.subf %118, %121 : vector<8x8xf32>
    %123 = math.exp %122 : vector<8x8xf32>
    %cst_45 = arith.constant dense<0.000000e+00> : vector<8xf32>
    %124 = vector.multi_reduction <add>, %123, %cst_45 [1] : vector<8x8xf32> to vector<8xf32>
    %125 = vector.shape_cast %124 : vector<8xf32> to vector<8x1xf32>
    %126 = tpu.reciprocal %125 {approx = true} : vector<8x1xf32> -> vector<8x1xf32>
    %127 = arith.truncf %123 : vector<8x8xf32> to vector<8x8xbf16>
    %cst_46 = arith.constant dense<0.000000e+00> : vector<8x8xf32>
    %128 = tpu.matmul %127, %117, %cst_46 {dimension_numbers = #tpu.dot_dimension_numbers<[1], [0], [0], [1], [0, 0, 1, 1], [], []>} : vector<8x8xbf16>, vector<8x8xbf16>, vector<8x8xf32> -> vector<8x8xf32>
    %129 = vector.broadcast %126 : vector<8x1xf32> to vector<8x8xf32>
    %130 = arith.mulf %128, %129 : vector<8x8xf32>
    %131 = arith.truncf %130 : vector<8x8xf32> to vector<8x8xbf16>
    %c0_47 = arith.constant 0 : index
    %c0_48 = arith.constant 0 : index
    %132 = vector.load %arg6[%c0_47, %c0_48] : memref<32x32xbf16, #tpu.memory_space<vmem>>, vector<8x32xbf16>
    %cst_49 = arith.constant dense<0.000000e+00> : vector<8x32xf32>
    %133 = tpu.matmul %131, %132, %cst_49 {dimension_numbers = #tpu.dot_dimension_numbers<[1], [0], [0], [1], [0, 0, 1, 1], [], []>} : vector<8x8xbf16>, vector<8x32xbf16>, vector<8x32xf32> -> vector<8x32xf32>
    %134 = arith.addf %114, %133 : vector<8x32xf32>
    %135 = vector.extract_strided_slice %31 {offsets = [8, 8], sizes = [8, 8], strides = [1, 1]} : vector<16x96xbf16> to vector<8x8xbf16>
    %136 = vector.extract_strided_slice %31 {offsets = [8, 40], sizes = [8, 8], strides = [1, 1]} : vector<16x96xbf16> to vector<8x8xbf16>
    %137 = vector.extract_strided_slice %31 {offsets = [8, 72], sizes = [8, 8], strides = [1, 1]} : vector<16x96xbf16> to vector<8x8xbf16>
    %cst_50 = arith.constant dense<0.000000e+00> : vector<8x8xf32>
    %138 = tpu.matmul %135, %136, %cst_50 {dimension_numbers = #tpu.dot_dimension_numbers<[1], [1], [0], [0], [0, 0, 1, 0], [], []>} : vector<8x8xbf16>, vector<8x8xbf16>, vector<8x8xf32> -> vector<8x8xf32>
    %cst_51 = arith.constant dense<0xFF800000> : vector<8xf32>
    %139 = vector.multi_reduction <maximumf>, %138, %cst_51 [1] : vector<8x8xf32> to vector<8xf32>
    %140 = vector.shape_cast %139 : vector<8xf32> to vector<8x1xf32>
    %141 = vector.broadcast %140 : vector<8x1xf32> to vector<8x8xf32>
    %142 = arith.subf %138, %141 : vector<8x8xf32>
    %143 = math.exp %142 : vector<8x8xf32>
    %cst_52 = arith.constant dense<0.000000e+00> : vector<8xf32>
    %144 = vector.multi_reduction <add>, %143, %cst_52 [1] : vector<8x8xf32> to vector<8xf32>
    %145 = vector.shape_cast %144 : vector<8xf32> to vector<8x1xf32>
    %146 = tpu.reciprocal %145 {approx = true} : vector<8x1xf32> -> vector<8x1xf32>
    %147 = arith.truncf %143 : vector<8x8xf32> to vector<8x8xbf16>
    %cst_53 = arith.constant dense<0.000000e+00> : vector<8x8xf32>
    %148 = tpu.matmul %147, %137, %cst_53 {dimension_numbers = #tpu.dot_dimension_numbers<[1], [0], [0], [1], [0, 0, 1, 1], [], []>} : vector<8x8xbf16>, vector<8x8xbf16>, vector<8x8xf32> -> vector<8x8xf32>
    %149 = vector.broadcast %146 : vector<8x1xf32> to vector<8x8xf32>
    %150 = arith.mulf %148, %149 : vector<8x8xf32>
    %151 = arith.truncf %150 : vector<8x8xf32> to vector<8x8xbf16>
    %c8_54 = arith.constant 8 : index
    %c0_55 = arith.constant 0 : index
    %152 = vector.load %arg6[%c8_54, %c0_55] : memref<32x32xbf16, #tpu.memory_space<vmem>>, vector<8x32xbf16>
    %cst_56 = arith.constant dense<0.000000e+00> : vector<8x32xf32>
    %153 = tpu.matmul %151, %152, %cst_56 {dimension_numbers = #tpu.dot_dimension_numbers<[1], [0], [0], [1], [0, 0, 1, 1], [], []>} : vector<8x8xbf16>, vector<8x32xbf16>, vector<8x32xf32> -> vector<8x32xf32>
    %154 = arith.addf %134, %153 : vector<8x32xf32>
    %155 = vector.extract_strided_slice %31 {offsets = [8, 16], sizes = [8, 8], strides = [1, 1]} : vector<16x96xbf16> to vector<8x8xbf16>
    %156 = vector.extract_strided_slice %31 {offsets = [8, 48], sizes = [8, 8], strides = [1, 1]} : vector<16x96xbf16> to vector<8x8xbf16>
    %157 = vector.extract_strided_slice %31 {offsets = [8, 80], sizes = [8, 8], strides = [1, 1]} : vector<16x96xbf16> to vector<8x8xbf16>
    %cst_57 = arith.constant dense<0.000000e+00> : vector<8x8xf32>
    %158 = tpu.matmul %155, %156, %cst_57 {dimension_numbers = #tpu.dot_dimension_numbers<[1], [1], [0], [0], [0, 0, 1, 0], [], []>} : vector<8x8xbf16>, vector<8x8xbf16>, vector<8x8xf32> -> vector<8x8xf32>
    %cst_58 = arith.constant dense<0xFF800000> : vector<8xf32>
    %159 = vector.multi_reduction <maximumf>, %158, %cst_58 [1] : vector<8x8xf32> to vector<8xf32>
    %160 = vector.shape_cast %159 : vector<8xf32> to vector<8x1xf32>
    %161 = vector.broadcast %160 : vector<8x1xf32> to vector<8x8xf32>
    %162 = arith.subf %158, %161 : vector<8x8xf32>
    %163 = math.exp %162 : vector<8x8xf32>
    %cst_59 = arith.constant dense<0.000000e+00> : vector<8xf32>
    %164 = vector.multi_reduction <add>, %163, %cst_59 [1] : vector<8x8xf32> to vector<8xf32>
    %165 = vector.shape_cast %164 : vector<8xf32> to vector<8x1xf32>
    %166 = tpu.reciprocal %165 {approx = true} : vector<8x1xf32> -> vector<8x1xf32>
    %167 = arith.truncf %163 : vector<8x8xf32> to vector<8x8xbf16>
    %cst_60 = arith.constant dense<0.000000e+00> : vector<8x8xf32>
    %168 = tpu.matmul %167, %157, %cst_60 {dimension_numbers = #tpu.dot_dimension_numbers<[1], [0], [0], [1], [0, 0, 1, 1], [], []>} : vector<8x8xbf16>, vector<8x8xbf16>, vector<8x8xf32> -> vector<8x8xf32>
    %169 = vector.broadcast %166 : vector<8x1xf32> to vector<8x8xf32>
    %170 = arith.mulf %168, %169 : vector<8x8xf32>
    %171 = arith.truncf %170 : vector<8x8xf32> to vector<8x8xbf16>
    %c16_61 = arith.constant 16 : index
    %c0_62 = arith.constant 0 : index
    %172 = vector.load %arg6[%c16_61, %c0_62] : memref<32x32xbf16, #tpu.memory_space<vmem>>, vector<8x32xbf16>
    %cst_63 = arith.constant dense<0.000000e+00> : vector<8x32xf32>
    %173 = tpu.matmul %171, %172, %cst_63 {dimension_numbers = #tpu.dot_dimension_numbers<[1], [0], [0], [1], [0, 0, 1, 1], [], []>} : vector<8x8xbf16>, vector<8x32xbf16>, vector<8x32xf32> -> vector<8x32xf32>
    %174 = arith.addf %154, %173 : vector<8x32xf32>
    %175 = vector.extract_strided_slice %31 {offsets = [8, 24], sizes = [8, 8], strides = [1, 1]} : vector<16x96xbf16> to vector<8x8xbf16>
    %176 = vector.extract_strided_slice %31 {offsets = [8, 56], sizes = [8, 8], strides = [1, 1]} : vector<16x96xbf16> to vector<8x8xbf16>
    %177 = vector.extract_strided_slice %31 {offsets = [8, 88], sizes = [8, 8], strides = [1, 1]} : vector<16x96xbf16> to vector<8x8xbf16>
    %cst_64 = arith.constant dense<0.000000e+00> : vector<8x8xf32>
    %178 = tpu.matmul %175, %176, %cst_64 {dimension_numbers = #tpu.dot_dimension_numbers<[1], [1], [0], [0], [0, 0, 1, 0], [], []>} : vector<8x8xbf16>, vector<8x8xbf16>, vector<8x8xf32> -> vector<8x8xf32>
    %cst_65 = arith.constant dense<0xFF800000> : vector<8xf32>
    %179 = vector.multi_reduction <maximumf>, %178, %cst_65 [1] : vector<8x8xf32> to vector<8xf32>
    %180 = vector.shape_cast %179 : vector<8xf32> to vector<8x1xf32>
    %181 = vector.broadcast %180 : vector<8x1xf32> to vector<8x8xf32>
    %182 = arith.subf %178, %181 : vector<8x8xf32>
    %183 = math.exp %182 : vector<8x8xf32>
    %cst_66 = arith.constant dense<0.000000e+00> : vector<8xf32>
    %184 = vector.multi_reduction <add>, %183, %cst_66 [1] : vector<8x8xf32> to vector<8xf32>
    %185 = vector.shape_cast %184 : vector<8xf32> to vector<8x1xf32>
    %186 = tpu.reciprocal %185 {approx = true} : vector<8x1xf32> -> vector<8x1xf32>
    %187 = arith.truncf %183 : vector<8x8xf32> to vector<8x8xbf16>
    %cst_67 = arith.constant dense<0.000000e+00> : vector<8x8xf32>
    %188 = tpu.matmul %187, %177, %cst_67 {dimension_numbers = #tpu.dot_dimension_numbers<[1], [0], [0], [1], [0, 0, 1, 1], [], []>} : vector<8x8xbf16>, vector<8x8xbf16>, vector<8x8xf32> -> vector<8x8xf32>
    %189 = vector.broadcast %186 : vector<8x1xf32> to vector<8x8xf32>
    %190 = arith.mulf %188, %189 : vector<8x8xf32>
    %191 = arith.truncf %190 : vector<8x8xf32> to vector<8x8xbf16>
    %c24_68 = arith.constant 24 : index
    %c0_69 = arith.constant 0 : index
    %192 = vector.load %arg6[%c24_68, %c0_69] : memref<32x32xbf16, #tpu.memory_space<vmem>>, vector<8x32xbf16>
    %cst_70 = arith.constant dense<0.000000e+00> : vector<8x32xf32>
    %193 = tpu.matmul %191, %192, %cst_70 {dimension_numbers = #tpu.dot_dimension_numbers<[1], [0], [0], [1], [0, 0, 1, 1], [], []>} : vector<8x8xbf16>, vector<8x32xbf16>, vector<8x32xf32> -> vector<8x32xf32>
    %194 = arith.addf %174, %193 : vector<8x32xf32>
    %c8_71 = arith.constant 8 : index
    %c0_72 = arith.constant 0 : index
    %195 = vector.load %arg15[%c8_71, %c0_72] : memref<16x32xf32, #tpu.memory_space<vmem>>, vector<8x32xf32>
    tpu.vector_store %arg15[%c8_71, %c0_72], %194 {strides = array<i32>} : memref<16x32xf32, #tpu.memory_space<vmem>>, vector<8x32xf32>,
    %c0_73 = arith.constant 0 : index
    %c0_74 = arith.constant 0 : index
    %196 = vector.load %arg15[%c0_73, %c0_74] : memref<16x32xf32, #tpu.memory_space<vmem>>, vector<16x32xf32>
    %197 = arith.addf %0, %196 : vector<16x32xf32>
    %c0_75 = arith.constant 0 : index
    %c0_76 = arith.constant 0 : index
    %198 = vector.load %arg7[%c0_75, %c0_76] : memref<1x32xf32, #tpu.memory_space<vmem>>, vector<1x32xf32>
    %199 = vector.broadcast %198 : vector<1x32xf32> to vector<16x32xf32>
    %200 = arith.addf %197, %199 : vector<16x32xf32>
    %c0_77 = arith.constant 0 : index
    %c0_78 = arith.constant 0 : index
    %201 = vector.load %arg8[%c0_77, %c0_78] : memref<1x32xf32, #tpu.memory_space<vmem>>, vector<1x32xf32>
    %c0_79 = arith.constant 0 : index
    %c0_80 = arith.constant 0 : index
    %202 = vector.load %arg9[%c0_79, %c0_80] : memref<1x32xf32, #tpu.memory_space<vmem>>, vector<1x32xf32>
    %cst_81 = arith.constant dense<0.000000e+00> : vector<16xf32>
    %203 = vector.multi_reduction <add>, %200, %cst_81 [1] : vector<16x32xf32> to vector<16xf32>
    %204 = vector.shape_cast %203 : vector<16xf32> to vector<16x1xf32>
    %cst_82 = arith.constant 3.200000e+01 : f32
    %205 = vector.broadcast %cst_82 : f32 to vector<16x1xf32>
    %206 = arith.divf %204, %205 : vector<16x1xf32>
    %207 = vector.broadcast %206 : vector<16x1xf32> to vector<16x32xf32>
    %208 = arith.subf %200, %207 : vector<16x32xf32>
    %209 = arith.mulf %208, %208 : vector<16x32xf32>
    %cst_83 = arith.constant dense<0.000000e+00> : vector<16xf32>
    %210 = vector.multi_reduction <add>, %209, %cst_83 [1] : vector<16x32xf32> to vector<16xf32>
    %211 = vector.shape_cast %210 : vector<16xf32> to vector<16x1xf32>
    %cst_84 = arith.constant 3.200000e+01 : f32
    %212 = vector.broadcast %cst_84 : f32 to vector<16x1xf32>
    %213 = arith.divf %211, %212 : vector<16x1xf32>
    %214 = vector.broadcast %206 : vector<16x1xf32> to vector<16x32xf32>
    %215 = arith.subf %200, %214 : vector<16x32xf32>
    %cst_85 = arith.constant 9.99999974E-6 : f32
    %216 = vector.broadcast %cst_85 : f32 to vector<16x1xf32>
    %217 = arith.addf %213, %216 : vector<16x1xf32>
    %218 = math.rsqrt %217 : vector<16x1xf32>
    %219 = vector.broadcast %218 : vector<16x1xf32> to vector<16x32xf32>
    %220 = arith.mulf %215, %219 : vector<16x32xf32>
    %221 = vector.broadcast %201 : vector<1x32xf32> to vector<16x32xf32>
    %222 = arith.mulf %220, %221 : vector<16x32xf32>
    %223 = vector.broadcast %202 : vector<1x32xf32> to vector<16x32xf32>
    %224 = arith.addf %222, %223 : vector<16x32xf32>
    %225 = arith.truncf %224 : vector<16x32xf32> to vector<16x32xbf16>
    %c0_86 = arith.constant 0 : index
    %c0_87 = arith.constant 0 : index
    %226 = vector.load %arg10[%c0_86, %c0_87] : memref<32x128xbf16, #tpu.memory_space<vmem>>, vector<32x128xbf16>
    %cst_88 = arith.constant dense<0.000000e+00> : vector<16x128xf32>
    %227 = tpu.matmul %225, %226, %cst_88 {dimension_numbers = #tpu.dot_dimension_numbers<[1], [0], [0], [1], [0, 0, 1, 1], [], []>} : vector<16x32xbf16>, vector<32x128xbf16>, vector<16x128xf32> -> vector<16x128xf32>
    %c0_89 = arith.constant 0 : index
    %c0_90 = arith.constant 0 : index
    %228 = vector.load %arg11[%c0_89, %c0_90] : memref<1x128xf32, #tpu.memory_space<vmem>>, vector<1x128xf32>
    %229 = vector.broadcast %228 : vector<1x128xf32> to vector<16x128xf32>
    %230 = arith.addf %227, %229 : vector<16x128xf32>
    %cst_91 = arith.constant 0.000000e+00 : f32
    %231 = vector.broadcast %cst_91 : f32 to vector<16x128xf32>
    %232 = arith.maximumf %230, %231 : vector<16x128xf32>
    %233 = arith.truncf %232 : vector<16x128xf32> to vector<16x128xbf16>
    %c0_92 = arith.constant 0 : index
    %c0_93 = arith.constant 0 : index
    %234 = vector.load %arg12[%c0_92, %c0_93] : memref<128x32xbf16, #tpu.memory_space<vmem>>, vector<128x32xbf16>
    %cst_94 = arith.constant dense<0.000000e+00> : vector<16x32xf32>
    %235 = tpu.matmul %233, %234, %cst_94 {dimension_numbers = #tpu.dot_dimension_numbers<[1], [0], [0], [1], [0, 0, 1, 1], [], []>} : vector<16x128xbf16>, vector<128x32xbf16>, vector<16x32xf32> -> vector<16x32xf32>
    %c0_95 = arith.constant 0 : index
    %c0_96 = arith.constant 0 : index
    %236 = vector.load %arg13[%c0_95, %c0_96] : memref<1x32xf32, #tpu.memory_space<vmem>>, vector<1x32xf32>
    %237 = vector.broadcast %236 : vector<1x32xf32> to vector<16x32xf32>
    %238 = arith.addf %235, %237 : vector<16x32xf32>
    %239 = arith.addf %200, %238 : vector<16x32xf32>
    %c0_97 = arith.constant 0 : index
    %c0_98 = arith.constant 0 : index
    %240 = vector.load %arg14[%c0_97, %c0_98] : memref<16x32xf32, #tpu.memory_space<vmem>>, vector<16x32xf32>
    tpu.vector_store %arg14[%c0_97, %c0_98], %239 {strides = array<i32>} : memref<16x32xf32, #tpu.memory_space<vmem>>, vector<16x32xf32>,
    return
  }
  func.func @transform_0(%arg0: i32) -> (i32, i32) {
    %c0_i32 = arith.constant 0 : i32
    %c0_i32_0 = arith.constant 0 : i32
    return %arg0, %c0_i32 : i32, i32
  }
  func.func @transform_1(%arg0: i32) -> (i32, i32) {
    %c0_i32 = arith.constant 0 : i32
    %c0_i32_0 = arith.constant 0 : i32
    %c0_i32_1 = arith.constant 0 : i32
    return %c0_i32, %c0_i32_0 : i32, i32
  }
  func.func @transform_2(%arg0: i32) -> (i32, i32) {
    %c0_i32 = arith.constant 0 : i32
    %c0_i32_0 = arith.constant 0 : i32
    %c0_i32_1 = arith.constant 0 : i32
    return %c0_i32, %c0_i32_0 : i32, i32
  }
  func.func @transform_3(%arg0: i32) -> (i32, i32) {
    %c0_i32 = arith.constant 0 : i32
    %c0_i32_0 = arith.constant 0 : i32
    %c0_i32_1 = arith.constant 0 : i32
    return %c0_i32, %c0_i32_0 : i32, i32
  }
  func.func @transform_4(%arg0: i32) -> (i32, i32) {
    %c0_i32 = arith.constant 0 : i32
    %c0_i32_0 = arith.constant 0 : i32
    %c0_i32_1 = arith.constant 0 : i32
    return %c0_i32, %c0_i32_0 : i32, i32
  }
  func.func @transform_5(%arg0: i32) -> (i32, i32) {
    %c0_i32 = arith.constant 0 : i32
    %c0_i32_0 = arith.constant 0 : i32
    %c0_i32_1 = arith.constant 0 : i32
    return %c0_i32, %c0_i32_0 : i32, i32
  }
  func.func @transform_6(%arg0: i32) -> (i32, i32) {
    %c0_i32 = arith.constant 0 : i32
    %c0_i32_0 = arith.constant 0 : i32
    %c0_i32_1 = arith.constant 0 : i32
    return %c0_i32, %c0_i32_0 : i32, i32
  }
  func.func @transform_7(%arg0: i32) -> (i32, i32) {
    %c0_i32 = arith.constant 0 : i32
    %c0_i32_0 = arith.constant 0 : i32
    %c0_i32_1 = arith.constant 0 : i32
    return %c0_i32, %c0_i32_0 : i32, i32
  }
  func.func @transform_8(%arg0: i32) -> (i32, i32) {
    %c0_i32 = arith.constant 0 : i32
    %c0_i32_0 = arith.constant 0 : i32
    %c0_i32_1 = arith.constant 0 : i32
    return %c0_i32, %c0_i32_0 : i32, i32
  }
  func.func @transform_9(%arg0: i32) -> (i32, i32) {
    %c0_i32 = arith.constant 0 : i32
    %c0_i32_0 = arith.constant 0 : i32
    %c0_i32_1 = arith.constant 0 : i32
    return %c0_i32, %c0_i32_0 : i32, i32
  }
  func.func @transform_10(%arg0: i32) -> (i32, i32) {
    %c0_i32 = arith.constant 0 : i32
    %c0_i32_0 = arith.constant 0 : i32
    %c0_i32_1 = arith.constant 0 : i32
    return %c0_i32, %c0_i32_0 : i32, i32
  }
  func.func @transform_11(%arg0: i32) -> (i32, i32) {
    %c0_i32 = arith.constant 0 : i32
    %c0_i32_0 = arith.constant 0 : i32
    %c0_i32_1 = arith.constant 0 : i32
    return %c0_i32, %c0_i32_0 : i32, i32
  }
  func.func @transform_12(%arg0: i32) -> (i32, i32) {
    %c0_i32 = arith.constant 0 : i32
    %c0_i32_0 = arith.constant 0 : i32
    %c0_i32_1 = arith.constant 0 : i32
    return %c0_i32, %c0_i32_0 : i32, i32
  }
  func.func @transform_13(%arg0: i32) -> (i32, i32) {
    %c0_i32 = arith.constant 0 : i32
    %c0_i32_0 = arith.constant 0 : i32
    return %arg0, %c0_i32 : i32, i32
  }
}

</mosaic_0001>

<bundles_post_ra>
// kernel: tpu_custom_call.1
= control target key start
LH: loop header
LB: loop body
LE: loop exit
PB: predicated region body
PF: predicated region fallthrough
CT: control target
= control target key end

     0   :  { %vm50_vm0 = vcmask 261120   ;;  %s2502_s0 = inlined_call_operand.vmem [shape: f32[16,32], index: 0, kind: input, shape index: {}]   ;;  %s2503_s1 = inlined_call_operand.vmem [shape: f32[1,32], index: 1, kind: input, shape index: {}]   ;;  %s2504_s2 = inlined_call_operand.vmem [shape: f32[1,32], index: 2, kind: input, shape index: {}]   ;;  %s2505_s3 = inlined_call_operand.vmem [shape: bf16[32,96], index: 3, kind: input, shape index: {}]   ;;  %s2506_s4 = inlined_call_operand.vmem [shape: f32[1,96], index: 4, kind: input, shape index: {}]   ;;  %s2507_s5 = inlined_call_operand.vmem [shape: bf16[32,32], index: 5, kind: input, shape index: {}]   ;;  %s2508_s6 = inlined_call_operand.vmem [shape: f32[1,32], index: 6, kind: input, shape index: {}]   ;;  %s2509_s7 = inlined_call_operand.vmem [shape: f32[1,32], index: 7, kind: input, shape index: {}]   ;;  %s2510_s8 = inlined_call_operand.vmem [shape: f32[1,32], index: 8, kind: input, shape index: {}]   ;;  %s2511_s9 = inlined_call_operand.vmem [shape: bf16[32,128], index: 9, kind: input, shape index: {}]   ;;  %s2512_s10 = inlined_call_operand.vmem [shape: f32[1,128], index: 10, kind: input, shape index: {}]   ;;  %s2513_s11 = inlined_call_operand.vmem [shape: bf16[128,32], index: 11, kind: input, shape index: {}]   ;;  %s2514_s12 = inlined_call_operand.vmem [shape: f32[1,32], index: 12, kind: input, shape index: {}]   ;;  %s2515_s13 = inlined_call_operand.hbm [shape: f32[16,32], index: 13, kind: output, shape index: {}]  }
   0x1   :  { %v2161_v0 = vld [vmem:[%s2502_s0] sm:$0xff]  ;;  %v2166_v1 = vld [vmem:[%s2502_s0 + $0x8] sm:$0xff] }
   0x2   :  { %v51_v2 = vsel %vm50_vm0, %v2161_v0, 0.0  ;;  %v54_v3 = vsel %vm50_vm0, %v2166_v1, 0.0 }
   0x3   :  { %52 = vadd.xlane.f32.xlu0 %v51_v2 }
   0x7   :  { %55 = vadd.xlane.f32.xlu0 %v54_v3 }
   0x8   :  { %18 = vsyncpa [#allocation4], 0  ;;  %v1998_v14 = vld [vmem:[%s2505_s3 + $0x8] sm:$0xff]   ;;  %v2072_v15 = vmov 0.0   ;;  %vm2073_vm1 = vmmov 0   ;;  %v1999_v16 = vld [vmem:[%s2505_s3] sm:$0xff]  }
   0x9   :  { %1802 = vmatprep.subr.bf16.mxu1 %v2072_v15  ;;  %1806 = vmatprep.mubr.msk.bf16.mxu1 %vm2073_vm1, %v2072_v15  ;;  %v1693_v25 = vld [vmem:[%s2503_s1] ss:$0 sm:$0xff]  ;;  %s2074_s1 = smov 64   ;;  %s2076_s20 = smov 120   ;;  %vm166_vm2 = vcmask 64512   ;;  %vm229_vm3 = vcmask 1043456  }
   0xa   :  { %1803 = vmatpush3.bf16.msra.mxu1 %v1998_v14  ;;  %1828 = vmatprep.subr.bf16.mxu0 %v2072_v15  ;;  %v1694_v29 = vld [vmem:[%s2504_s2] ss:$0 sm:$0xff]  ;;  %s2075_s2 = smov 96   ;;  %s2078_s21 = smov 88  }
   0xb   :  { %1804 = vmatprep.subr.bf16.mxu1 %v2072_v15  ;;  %1830 = vmatprep.mubr.msk.bf16.mxu0 %vm2073_vm1, %v2072_v15  ;;  %v1695_v35 = vld [vmem:[%s2506_s4] ss:$0 sm:$0xff]  ;;  %s2077_s4 = smov 56   ;;  %s2079_s22 = smov 112  }
   0xc   :  { %s2080_s23 = smov 72   ;;  %s2081_s24 = smov 104  }
   0xd   :  { %s2082_s0 = smov 80   ;;  %s2083_s29 = smov 48  }
   0xe   :  { %1805 = vmatpush3.bf16.msra.mxu1 %v1999_v16  ;;  %s2084_s3 = smov 40  }
   0xf   :  { %1810 = vmatprep.subr.bf16.mxu1 %v2072_v15 }
  0x8c   :  { %v53_v4 = vpop.xlane.xlu0 %52 }
  0x8d   :  { %v58_v5 = vmul.f32 0.03125, %v53_v4 }
  0x8f   :  { %v60_v6 = vsub.f32 %v2161_v0, %v58_v5 }
  0x90   :  { %v56_v7 = vpop.xlane.xlu0 %55 }
  0x91   :  { %v59_v8 = vmul.f32 0.03125, %v56_v7  ;;  %v62_v9 = vmul.f32 %v60_v6, %v60_v6 }
  0x93   :  { %v61_v10 = vsub.f32 %v2166_v1, %v59_v8  ;;  %v64_v11 = vsel %vm50_vm0, %v62_v9, 0.0 }
  0x94   :  { %65 = vadd.xlane.f32.xlu1 %v64_v11 }
  0x95   :  { %v63_v12 = vmul.f32 %v61_v10, %v61_v10 }
  0x97   :  { %v67_v13 = vsel %vm50_vm0, %v63_v12, 0.0  ;;  %v275_v12 = vld [vmem:[%s2507_s5] sm:$0xf] }
  0x98   :  { %68 = vadd.xlane.f32.xlu1 %v67_v13 }
 0x11d   :  { %v66_v17 = vpop.xlane.xlu1 %65 }
 0x11e   :  { %v70_v18 = vmul.f32 0.03125, %v66_v17  ;;  %v438_v17 = vsel %vm229_vm3, %v275_v12, 0 }
 0x120   :  { %v72_v19 = vadd.f32 1e-05, %v70_v18  ;;  %v387_v18 = vld [vmem:[%s2507_s5 + $0x4] sm:$0xf] }
 0x121   :  { %v69_v20 = vpop.xlane.xlu1 %68 }
 0x122   :  { %2010 = vrsqrt.f32 %v72_v19  ;;  %v71_v21 = vmul.f32 0.03125, %v69_v20  ;;  %v392_v19 = vsel %vm229_vm3, %v387_v18, 0 }
 0x124   :  { %v73_v22 = vadd.f32 1e-05, %v71_v21 }
 0x126   :  { %2012 = vrsqrt.f32 %v73_v22 }
 0x12f   :  { %v2011_v23 = vpop.eup %2010 }
 0x130   :  { %v76_v24 = vmul.f32 %v2011_v23, %v60_v6 }
 0x132   :  { %v84_v28 = vmul.f32 %v1693_v25, %v76_v24 }
 0x133   :  { %v2013_v26 = vpop.eup %2012 }
 0x134   :  { %v77_v27 = vmul.f32 %v2013_v26, %v61_v10  ;;  %v92_v31 = vadd.f32 %v1694_v29, %v84_v28 }
 0x136   :  { %v85_v30 = vmul.f32 %v1693_v25, %v77_v27 }
 0x138   :  { %v93_v32 = vadd.f32 %v1694_v29, %v85_v30 }
 0x13a   :  { %v94_v33 = vpack.c.bf16 %v93_v32, %v92_v31 }
 0x13c   :  { %1807 = vmatmul.mubr.msk.bf16.vlgmr.msra.gmra.mxu1 %vm50_vm0, %v94_v33 }
 0x13d   :  { %1812 = vmatprep.mubr.msk.bf16.mxu1 %vm2073_vm1, %v2072_v15 }
 0x1fc   :  { %v155_v34 = vpop.f32.mrf.mxu1 }
 0x1fd   :  { %v156_v38 = vadd.f32 %v1695_v35, %v155_v34 }
 0x1fe   :  { %v1808_v36 = vpop.f32.mrf.mxu1 }
 0x200   :  { %v158_v37 = vpop.f32.mrf.mxu1 }
 0x201   :  { %v159_v39 = vadd.f32 %v1695_v35, %v158_v37 }
 0x202   :  { %v1809_v40 = vpop.f32.mrf.mxu1 }
 0x203   :  { %v2202_v41 = vpack.c.bf16 %v159_v39, %v156_v38 }
 0x205   :  { %224 = vrot.lane.b32.xlu1 %v2202_v41, %s2074_s1  ;;  %164 = vrot.lane.b32.xlu0 %v2202_v41, %s2075_s2 }
 0x209   :  { %276 = vrot.lane.b32.xlu0 %v2202_v41, %s2076_s20 }
 0x20d   :  { %337 = vrot.lane.b32.xlu0 %v2202_v41, %s2077_s4 }
 0x277   :  { %v165_v42 = vpop.permute.xlu0 %164  ;;  %v225_v45 = vpop.permute.xlu1 %224 }
 0x278   :  { %v171_v43 = vsel %vm166_vm2, %v165_v42, 0  ;;  %v231_v47 = vsel %vm229_vm3, %v225_v45, 0 }
 0x279   :  { %1811 = vmatpush3.bf16.xpose.msra.mxu1 %v171_v43 }
 0x27a   :  { %1816 = vmatprep.subr.bf16.mxu1 %v2072_v15 }
 0x27b   :  { %v277_v44 = vpop.permute.xlu0 %276 }
 0x27f   :  { %v338_v46 = vpop.permute.xlu0 %337 }
 0x280   :  { %1813 = vmatmul.mubr.msk.bf16.vlgmr.msra.gmra.mxu1 %vm166_vm2, %v2202_v41  ;;  %v343_v48 = vsel %vm229_vm3, %v338_v46, 0 }
 0x281   :  { %1817 = vmatpush3.bf16.msra.mxu1 %v231_v47  ;;  %1829 = vmatpush3.bf16.msra.mxu0 %v343_v48 }
 0x282   :  { %1818 = vmatprep.mubr.msk.bf16.mxu1 %vm2073_vm1, %v2072_v15  ;;  %1822 = vmatprep.subr.bf16.mxu1 %v2072_v15 }
 0x283   :  { %1840 = vmatprep.subr.bf16.mxu0 %v2072_v15 }
 0x340   :  { %v207_v49 = vpop.f32.mrf.mxu1 }
 0x341   :  { %v213_v50 = vsel %vm166_vm2, %v207_v49, -inf }
 0x342   :  { %214 = vmax.xlane.f32.xlu1 %v213_v50  ;;  %v1814_v51 = vpop.f32.mrf.mxu1 }
 0x344   :  { %v210_v52 = vpop.f32.mrf.mxu1 }
 0x346   :  { %v1815_v53 = vpop.f32.mrf.mxu1 }
 0x353   :  { %278 = vrot.lane.b32.xlu1 %v2202_v41, %s2078_s21 }
 0x3cb   :  { %v215_v54 = vpop.xlane.xlu1 %214 }
 0x3cc   :  { %v216_v55 = vsub.f32 %v207_v49, %v215_v54 }
 0x3ce   :  { %v217_v56 = vmul.f32 1.442695, %v216_v55 }
 0x3cf   :  { %v279_v58 = vpop.permute.xlu1 %278 }
 0x3d0   :  { %2014 = vpow2.f32 %v217_v56  ;;  %v284_v60 = vsel %vm166_vm2, %v279_v58, 0 }
 0x3dd   :  { %v2015_v57 = vpop.eup %2014 }
 0x3de   :  { %v223_v59 = vpack.c.bf16 %v2015_v57, %v2015_v57  ;;  %v219_v8 = vsel %vm166_vm2, %v2015_v57, 0.0 }
 0x3e0   :  { %1819 = vmatmul.mubr.msk.bf16.vlgmr.msra.gmra.mxu1 %vm166_vm2, %v223_v59 }
 0x3e1   :  { %1823 = vmatpush3.bf16.xpose.msra.mxu1 %v284_v60  ;;  %1824 = vmatprep.mubr.msk.bf16.mxu1 %vm2073_vm1, %v2072_v15  ;;  %v2287_v60 = vrot.slane %v2202_v41, 4 }
 0x3e2   :  { %1834 = vmatprep.subr.bf16.mxu1 %v2072_v15 }
 0x3e8   :  { %1825 = vmatmul.mubr.msk.bf16.vlgmr.msra.gmra.mxu1 %vm166_vm2, %v277_v44 }
 0x3e9   :  { %1836 = vmatprep.mubr.msk.bf16.mxu1 %vm2073_vm1, %v2072_v15  ;;  %1835 = vmatpush3.bf16.msra.mxu1 %v392_v19 }
 0x3ea   :  { %1846 = vmatprep.subr.bf16.mxu1 %v2072_v15 }
 0x4a0   :  { %v267_v61 = vpop.f32.mrf.mxu1 }
 0x4a2   :  { %v1820_v62 = vpop.f32.mrf.mxu1 }
 0x4a4   :  { %v270_v63 = vpop.f32.mrf.mxu1 }
 0x4a6   :  { %v1821_v2 = vpop.f32.mrf.mxu1 }
 0x4a8   :  { %v320_v3 = vpop.f32.mrf.mxu1 }
 0x4a9   :  { %v326_v4 = vsel %vm166_vm2, %v320_v3, -inf }
 0x4aa   :  { %327 = vmax.xlane.f32.xlu1 %v326_v4  ;;  %v1826_v5 = vpop.f32.mrf.mxu1 }
 0x4ac   :  { %v323_v6 = vpop.f32.mrf.mxu1 }
 0x4ae   :  { %v1827_v7 = vpop.f32.mrf.mxu1 }
 0x4bb   :  { %480 = vrot.lane.b32.xlu1 %v2202_v41, %s2079_s22 }
 0x4df   :  { %220 = vadd.xlane.f32.xlu1 %v219_v8 }
 0x4f0   :  { %641 = vrot.lane.b32.xlu1 %v2202_v41, %s2080_s23 }
 0x4f4   :  { %639 = vrot.lane.b32.xlu1 %v2202_v41, %s2081_s24 }
 0x533   :  { %v328_v9 = vpop.xlane.xlu1 %327 }
 0x534   :  { %v329_v10 = vsub.f32 %v320_v3, %v328_v9 }
 0x536   :  { %v330_v11 = vmul.f32 1.442695, %v329_v10 }
 0x537   :  { %v481_v20 = vpop.permute.xlu1 %480 }
 0x538   :  { %2016 = vpow2.f32 %v330_v11 }
 0x545   :  { %v2017_v13 = vpop.eup %2016 }
 0x546   :  { %v332_v14 = vsel %vm166_vm2, %v2017_v13, 0.0  ;;  %v336_v16 = vpack.c.bf16 %v2017_v13, %v2017_v13 }
 0x547   :  { %333 = vadd.xlane.f32.xlu0 %v332_v14 }
 0x548   :  { %1831 = vmatmul.mubr.msk.bf16.vlgmr.msra.gmra.mxu0 %vm166_vm2, %v336_v16 }
 0x549   :  { %1841 = vmatpush3.bf16.msra.mxu0 %v438_v17  ;;  %1842 = vmatprep.mubr.msk.bf16.mxu0 %vm2073_vm1, %v2072_v15 }
 0x54a   :  { %1852 = vmatprep.subr.bf16.mxu0 %v2072_v15 }
 0x55d   :  { %482 = vrot.lane.b32.xlu0 %v2202_v41, %s2082_s0 }
 0x568   :  { %v221_v21 = vpop.xlane.xlu1 %220 }
 0x569   :  { %2018 = vrcp.f32 %v221_v21 }
 0x56c   :  { %v642_v55 = vpop.permute.xlu1 %641 }
 0x56d   :  { %v647_v58 = vsel %vm166_vm2, %v642_v55, 0 }
 0x570   :  { %v640_v59 = vpop.permute.xlu1 %639 }
 0x576   :  { %v2019_v22 = vpop.eup %2018 }
 0x577   :  { %v273_v23 = vmul.f32 %v2019_v22, %v267_v61  ;;  %v591_v61 = vld [vmem:[%s2507_s5 + $0x8] sm:$0xf] }
 0x578   :  { %v596_v62 = vsel %vm229_vm3, %v591_v61, 0 }
 0x579   :  { %v274_v24 = vpack.c.bf16 %v273_v23, %v273_v23 }
 0x57b   :  { %1843 = vmatmul.mubr.msk.bf16.vlgmr.msra.gmra.mxu0 %vm166_vm2, %v274_v24 }
 0x57c   :  { %1854 = vmatprep.mubr.msk.bf16.mxu0 %vm2073_vm1, %v2072_v15 }
 0x5d0   :  { %v334_v25 = vpop.xlane.xlu0 %333 }
 0x5d1   :  { %2020 = vrcp.f32 %v334_v25 }
 0x5d4   :  { %v483_v29 = vpop.permute.xlu0 %482 }
 0x5d5   :  { %v488_v33 = vsel %vm166_vm2, %v483_v29, 0 }
 0x5de   :  { %v2021_v26 = vpop.eup %2020 }
 0x608   :  { %v379_v27 = vpop.f32.mrf.mxu0 }
 0x609   :  { %v385_v28 = vmul.f32 %v2021_v26, %v379_v27 }
 0x60a   :  { %v1832_v30 = vpop.f32.mrf.mxu0 }
 0x60b   :  { %v386_v31 = vpack.c.bf16 %v385_v28, %v385_v28 }
 0x60c   :  { %v382_v32 = vpop.f32.mrf.mxu0 }
 0x60d   :  { %1837 = vmatmul.mubr.msk.bf16.vlgmr.msra.gmra.mxu1 %vm166_vm2, %v386_v31 }
 0x60e   :  { %1847 = vmatpush3.bf16.xpose.msra.mxu1 %v488_v33  ;;  %v1833_v34 = vpop.f32.mrf.mxu0  ;;  %1848 = vmatprep.mubr.msk.bf16.mxu1 %vm2073_vm1, %v2072_v15  ;;  %v750_v33 = vld [vmem:[%s2507_s5 + $0xc] sm:$0xf] }
 0x60f   :  { %1858 = vmatprep.subr.bf16.mxu1 %v2072_v15  ;;  %v755_v34 = vsel %vm229_vm3, %v750_v33, 0 }
 0x615   :  { %1849 = vmatmul.mubr.msk.bf16.vlgmr.msra.gmra.mxu1 %vm166_vm2, %v481_v20 }
 0x616   :  { %1860 = vmatprep.mubr.msk.bf16.mxu1 %vm2073_vm1, %v2072_v15  ;;  %1859 = vmatpush3.bf16.msra.mxu1 %v596_v62 }
 0x617   :  { %1870 = vmatprep.subr.bf16.mxu1 %v2072_v15 }
 0x63b   :  { %v2268_v35 = vpop.f32.mrf.mxu0 }
 0x63d   :  { %v1844_v36 = vpop.f32.mrf.mxu0 }
 0x63f   :  { %v477_v37 = vpop.f32.mrf.mxu0 }
 0x641   :  { %v1845_v38 = vpop.f32.mrf.mxu0 }
 0x6cd   :  { %v2270_v39 = vpop.f32.mrf.mxu1 }
 0x6ce   :  { %v475_v27 = vadd.f32 %v2268_v35, %v2270_v39 }
 0x6cf   :  { %v1838_v40 = vpop.f32.mrf.mxu1 }
 0x6d1   :  { %v431_v42 = vpop.f32.mrf.mxu1 }
 0x6d3   :  { %v1839_v43 = vpop.f32.mrf.mxu1 }
 0x6d5   :  { %v524_v44 = vpop.f32.mrf.mxu1 }
 0x6d6   :  { %v530_v45 = vsel %vm166_vm2, %v524_v44, -inf }
 0x6d7   :  { %531 = vmax.xlane.f32.xlu0 %v530_v45  ;;  %v1850_v46 = vpop.f32.mrf.mxu1 }
 0x6d9   :  { %v527_v47 = vpop.f32.mrf.mxu1 }
 0x6db   :  { %v1851_v48 = vpop.f32.mrf.mxu1 }
 0x6ed   :  { %541 = vrot.lane.b32.xlu0 %v2202_v41, %s2083_s29 }
 0x760   :  { %v532_v49 = vpop.xlane.xlu0 %531 }
 0x761   :  { %v533_v50 = vsub.f32 %v524_v44, %v532_v49 }
 0x763   :  { %v534_v51 = vmul.f32 1.442695, %v533_v50 }
 0x764   :  { %v542_v52 = vpop.permute.xlu0 %541 }
 0x765   :  { %2022 = vpow2.f32 %v534_v51  ;;  %v547_v53 = vsel %vm229_vm3, %v542_v52, 0 }
 0x766   :  { %1853 = vmatpush3.bf16.msra.mxu0 %v547_v53 }
 0x767   :  { %1864 = vmatprep.subr.bf16.mxu0 %v2072_v15 }
 0x772   :  { %v2023_v54 = vpop.eup %2022 }
 0x773   :  { %v536_v56 = vsel %vm166_vm2, %v2023_v54, 0.0  ;;  %v540_v57 = vpack.c.bf16 %v2023_v54, %v2023_v54 }
 0x774   :  { %537 = vadd.xlane.f32.xlu1 %v536_v56 }
 0x775   :  { %1855 = vmatmul.mubr.msk.bf16.vlgmr.msra.gmra.mxu0 %vm166_vm2, %v540_v57 }
 0x776   :  { %1865 = vmatpush3.bf16.xpose.msra.mxu0 %v647_v58  ;;  %1866 = vmatprep.mubr.msk.bf16.mxu0 %vm2073_vm1, %v2072_v15 }
 0x777   :  { %1876 = vmatprep.subr.bf16.mxu0 %v2072_v15 }
 0x77d   :  { %1867 = vmatmul.mubr.msk.bf16.vlgmr.msra.gmra.mxu0 %vm166_vm2, %v640_v59 }
 0x77e   :  { %1878 = vmatprep.mubr.msk.bf16.mxu0 %vm2073_vm1, %v2072_v15  ;;  %1877 = vmatpush3.bf16.msra.mxu0 %v755_v34 }
 0x77f   :  { %1888 = vmatprep.subr.bf16.mxu0 %v2072_v15 }
 0x785   :  { %800 = vrot.lane.b32.xlu1 %v2287_v60, %s2075_s2 }
 0x789   :  { %912 = vrot.lane.b32.xlu1 %v2287_v60, %s2078_s21 }
 0x7fd   :  { %v538_v63 = vpop.xlane.xlu1 %537 }
 0x7fe   :  { %2024 = vrcp.f32 %v538_v63 }
 0x801   :  { %v801_v21 = vpop.permute.xlu1 %800 }
 0x805   :  { %v913_v24 = vpop.permute.xlu1 %912 }
 0x806   :  { %v918_v25 = vsel %vm166_vm2, %v913_v24, 0 }
 0x80b   :  { %v2025_v2 = vpop.eup %2024 }
 0x835   :  { %v583_v3 = vpop.f32.mrf.mxu0 }
 0x836   :  { %v589_v4 = vmul.f32 %v2025_v2, %v583_v3 }
 0x837   :  { %v1856_v5 = vpop.f32.mrf.mxu0 }
 0x838   :  { %v590_v6 = vpack.c.bf16 %v589_v4, %v589_v4 }
 0x839   :  { %v586_v7 = vpop.f32.mrf.mxu0 }
 0x83a   :  { %1861 = vmatmul.mubr.msk.bf16.vlgmr.msra.gmra.mxu1 %vm166_vm2, %v590_v6 }
 0x83b   :  { %v1857_v8 = vpop.f32.mrf.mxu0  ;;  %1872 = vmatprep.mubr.msk.bf16.mxu1 %vm2073_vm1, %v2072_v15 }
 0x83d   :  { %v683_v9 = vpop.f32.mrf.mxu0 }
 0x83e   :  { %v689_v10 = vsel %vm166_vm2, %v683_v9, -inf }
 0x83f   :  { %690 = vmax.xlane.f32.xlu0 %v689_v10  ;;  %v1868_v11 = vpop.f32.mrf.mxu0 }
 0x841   :  { %v686_v12 = vpop.f32.mrf.mxu0 }
 0x843   :  { %v1869_v13 = vpop.f32.mrf.mxu0 }
 0x855   :  { %700 = vrot.lane.b32.xlu0 %v2202_v41, %s2084_s3  ;;  %v806_v41 = vsel %vm166_vm2, %v801_v21, 0 }
 0x859   :  { %910 = vrot.lane.b32.xlu0 %v2287_v60, %s2076_s20 }
 0x8c8   :  { %v691_v14 = vpop.xlane.xlu0 %690 }
 0x8c9   :  { %v692_v16 = vsub.f32 %v683_v9, %v691_v14  ;;  %v909_v14 = vld [vmem:[%s2507_s5] sm:$0xf] }
 0x8cb   :  { %v693_v17 = vmul.f32 1.442695, %v692_v16  ;;  %v1072_v16 = vsel %vm229_vm3, %v909_v14, 0 }
 0x8cc   :  { %v701_v18 = vpop.permute.xlu0 %700 }
 0x8cd   :  { %2026 = vpow2.f32 %v693_v17  ;;  %v706_v19 = vsel %vm229_vm3, %v701_v18, 0  ;;  %v1021_v17 = vld [vmem:[%s2507_s5 + $0x4] sm:$0xf] }
 0x8ce   :  { %1871 = vmatpush3.bf16.msra.mxu1 %v706_v19  ;;  %v1026_v18 = vsel %vm229_vm3, %v1021_v17, 0 }
 0x8cf   :  { %1882 = vmatprep.subr.bf16.mxu1 %v2072_v15 }
 0x8d0   :  { %v911_v26 = vpop.permute.xlu0 %910 }
 0x8da   :  { %v2027_v20 = vpop.eup %2026 }
 0x8db   :  { %v695_v22 = vsel %vm166_vm2, %v2027_v20, 0.0  ;;  %v699_v23 = vpack.c.bf16 %v2027_v20, %v2027_v20 }
 0x8dc   :  { %696 = vadd.xlane.f32.xlu1 %v695_v22 }
 0x8dd   :  { %1873 = vmatmul.mubr.msk.bf16.vlgmr.msra.gmra.mxu1 %vm166_vm2, %v699_v23 }
 0x8de   :  { %1883 = vmatpush3.bf16.xpose.msra.mxu1 %v806_v41  ;;  %1884 = vmatprep.mubr.msk.bf16.mxu1 %vm2073_vm1, %v2072_v15 }
 0x8df   :  { %1894 = vmatprep.subr.bf16.mxu1 %v2072_v15 }
 0x8e5   :  { %1885 = vmatmul.mubr.msk.bf16.vlgmr.msra.gmra.mxu1 %vm166_vm2, %v2287_v60 }
 0x8e6   :  { %1895 = vmatpush3.bf16.xpose.msra.mxu1 %v918_v25  ;;  %1896 = vmatprep.mubr.msk.bf16.mxu1 %vm2073_vm1, %v2072_v15 }
 0x8e7   :  { %1906 = vmatprep.subr.bf16.mxu1 %v2072_v15 }
 0x8ed   :  { %971 = vrot.lane.b32.xlu1 %v2287_v60, %s2077_s4  ;;  %1897 = vmatmul.mubr.msk.bf16.vlgmr.msra.gmra.mxu1 %vm166_vm2, %v911_v26 }
 0x8ee   :  { %1908 = vmatprep.mubr.msk.bf16.mxu1 %vm2073_vm1, %v2072_v15  ;;  %1907 = vmatpush3.bf16.msra.mxu1 %v1026_v18 }
 0x8ef   :  { %1918 = vmatprep.subr.bf16.mxu1 %v2072_v15 }
 0x8fa   :  { %v632_v28 = vpop.f32.mrf.mxu1 }
 0x8fb   :  { %v2327_v29 = vadd.f32 %v632_v28, %v475_v27 }
 0x8fc   :  { %v1862_v30 = vpop.f32.mrf.mxu1 }
 0x8fe   :  { %v635_v31 = vpop.f32.mrf.mxu1 }
 0x900   :  { %v1863_v32 = vpop.f32.mrf.mxu1 }
 0x965   :  { %v697_v36 = vpop.xlane.xlu1 %696 }
 0x966   :  { %2028 = vrcp.f32 %v697_v36 }
 0x969   :  { %v972_v2 = vpop.permute.xlu1 %971 }
 0x96a   :  { %v977_v5 = vsel %vm229_vm3, %v972_v2, 0  ;;  %v1225_v2 = vld [vmem:[%s2507_s5 + $0x8] sm:$0xf] }
 0x973   :  { %v2029_v37 = vpop.eup %2028 }
 0x99d   :  { %v742_v38 = vpop.f32.mrf.mxu1 }
 0x99e   :  { %v748_v35 = vmul.f32 %v2029_v37, %v742_v38 }
 0x99f   :  { %v1874_v39 = vpop.f32.mrf.mxu1 }
 0x9a0   :  { %v749_v40 = vpack.c.bf16 %v748_v35, %v748_v35 }
 0x9a1   :  { %v745_v42 = vpop.f32.mrf.mxu1 }
 0x9a2   :  { %1879 = vmatmul.mubr.msk.bf16.vlgmr.msra.gmra.mxu0 %vm166_vm2, %v749_v40 }
 0x9a3   :  { %v1875_v43 = vpop.f32.mrf.mxu1  ;;  %1890 = vmatprep.mubr.msk.bf16.mxu0 %vm2073_vm1, %v2072_v15 }
 0x9a5   :  { %v842_v44 = vpop.f32.mrf.mxu1 }
 0x9a6   :  { %v848_v45 = vsel %vm166_vm2, %v842_v44, -inf }
 0x9a7   :  { %849 = vmax.xlane.f32.xlu0 %v848_v45  ;;  %v1886_v46 = vpop.f32.mrf.mxu1 }
 0x9a9   :  { %v845_v47 = vpop.f32.mrf.mxu1 }
 0x9ab   :  { %v1887_v48 = vpop.f32.mrf.mxu1 }
 0x9ad   :  { %v954_v49 = vpop.f32.mrf.mxu1 }
 0x9ae   :  { %v960_v50 = vsel %vm166_vm2, %v954_v49, -inf }
 0x9af   :  { %961 = vmax.xlane.f32.xlu0 %v960_v50  ;;  %v1898_v51 = vpop.f32.mrf.mxu1 }
 0x9b1   :  { %v957_v52 = vpop.f32.mrf.mxu1 }
 0x9b3   :  { %v1899_v53 = vpop.f32.mrf.mxu1 }
 0x9c5   :  { %859 = vrot.lane.b32.xlu0 %v2287_v60, %s2074_s1 }
 0x9c9   :  { %1116 = vrot.lane.b32.xlu0 %v2287_v60, %s2082_s0 }
 0x9cd   :  { %1114 = vrot.lane.b32.xlu0 %v2287_v60, %s2079_s22 }
 0xa30   :  { %v850_v54 = vpop.xlane.xlu0 %849 }
 0xa31   :  { %v851_v55 = vsub.f32 %v842_v44, %v850_v54 }
 0xa33   :  { %v852_v56 = vmul.f32 1.442695, %v851_v55 }
 0xa35   :  { %2030 = vpow2.f32 %v852_v56 }
 0xa38   :  { %v962_v57 = vpop.xlane.xlu0 %961 }
 0xa39   :  { %v963_v58 = vsub.f32 %v954_v49, %v962_v57 }
 0xa3b   :  { %v964_v59 = vmul.f32 1.442695, %v963_v58 }
 0xa3c   :  { %v860_v61 = vpop.permute.xlu0 %859 }
 0xa3d   :  { %2032 = vpow2.f32 %v964_v59  ;;  %v865_v62 = vsel %vm229_vm3, %v860_v61, 0 }
 0xa3e   :  { %1889 = vmatpush3.bf16.msra.mxu0 %v865_v62 }
 0xa3f   :  { %1900 = vmatprep.subr.bf16.mxu0 %v2072_v15 }
 0xa40   :  { %v1117_v19 = vpop.permute.xlu0 %1116 }
 0xa41   :  { %v1122_v36 = vsel %vm166_vm2, %v1117_v19, 0 }
 0xa42   :  { %v2031_v63 = vpop.eup %2030 }
 0xa43   :  { %v854_v3 = vsel %vm166_vm2, %v2031_v63, 0.0  ;;  %v858_v4 = vpack.c.bf16 %v2031_v63, %v2031_v63 }
 0xa44   :  { %855 = vadd.xlane.f32.xlu0 %v854_v3  ;;  %v1115_v20 = vpop.permute.xlu0 %1114  ;;  %v1230_v3 = vsel %vm229_vm3, %v1225_v2, 0  ;;  %v2001_v2 = vld [vmem:[%s2511_s9] sm:$0xff]  }
 0xa45   :  { %1891 = vmatmul.mubr.msk.bf16.vlgmr.msra.gmra.mxu0 %vm166_vm2, %v858_v4 }
 0xa46   :  { %1901 = vmatpush3.bf16.msra.mxu0 %v977_v5  ;;  %1902 = vmatprep.mubr.msk.bf16.mxu0 %vm2073_vm1, %v2072_v15 }
 0xa47   :  { %1912 = vmatprep.subr.bf16.mxu0 %v2072_v15 }
 0xa4a   :  { %v2033_v6 = vpop.eup %2032 }
 0xa4b   :  { %v966_v7 = vsel %vm166_vm2, %v2033_v6, 0.0  ;;  %v970_v8 = vpack.c.bf16 %v2033_v6, %v2033_v6 }
 0xa4c   :  { %967 = vadd.xlane.f32.xlu1 %v966_v7 }
 0xa4d   :  { %1903 = vmatmul.mubr.msk.bf16.vlgmr.msra.gmra.mxu0 %vm166_vm2, %v970_v8 }
 0xa4e   :  { %1914 = vmatprep.mubr.msk.bf16.mxu0 %vm2073_vm1, %v2072_v15  ;;  %1913 = vmatpush3.bf16.msra.mxu0 %v1072_v16 }
 0xa4f   :  { %1924 = vmatprep.subr.bf16.mxu0 %v2072_v15 }
 0xa5a   :  { %1275 = vrot.lane.b32.xlu0 %v2287_v60, %s2080_s23 }
 0xa62   :  { %v791_v9 = vpop.f32.mrf.mxu0 }
 0xa63   :  { %v797_v10 = vadd.f32 %v791_v9, %v2327_v29 }
 0xa64   :  { %v1880_v11 = vpop.f32.mrf.mxu0 }
 0xa65   :  { %798 = vst.msk [vmem:[#allocation2] sm:$0xff] %vm50_vm0, %v797_v10 }
 0xa66   :  { %v794_v12 = vpop.f32.mrf.mxu0 }
 0xa68   :  { %v1881_v13 = vpop.f32.mrf.mxu0 }
 0xacd   :  { %v856_v21 = vpop.xlane.xlu0 %855 }
 0xace   :  { %2034 = vrcp.f32 %v856_v21 }
 0xad1   :  { %v1276_v58 = vpop.permute.xlu0 %1275 }
 0xad2   :  { %v1281_v62 = vsel %vm166_vm2, %v1276_v58, 0 }
 0xad5   :  { %v968_v22 = vpop.xlane.xlu1 %967 }
 0xad6   :  { %2036 = vrcp.f32 %v968_v22 }
 0xadb   :  { %v2035_v23 = vpop.eup %2034 }
 0xae3   :  { %v2037_v29 = vpop.eup %2036 }
 0xb05   :  { %v901_v41 = vpop.f32.mrf.mxu0 }
 0xb06   :  { %v907_v24 = vmul.f32 %v2035_v23, %v901_v41  ;;  %v1433_v23 = vld [vmem:[#allocation2] sm:$0xff] }
 0xb07   :  { %v1892_v25 = vpop.f32.mrf.mxu0  ;;  %v1435_v41 = vadd.f32 %v1433_v23, %v2161_v0  ;;  %v1384_v0 = vld [vmem:[%s2507_s5 + $0xc] sm:$0xf] }
 0xb08   :  { %v908_v26 = vpack.c.bf16 %v907_v24, %v907_v24  ;;  %v1723_v24 = vld [vmem:[%s2508_s6] ss:$0 sm:$0xff] }
 0xb09   :  { %v904_v27 = vpop.f32.mrf.mxu0 }
 0xb0a   :  { %1915 = vmatmul.mubr.msk.bf16.vlgmr.msra.gmra.mxu0 %vm166_vm2, %v908_v26  ;;  %v2418_v27 = vadd.f32 %v1723_v24, %v1435_v41 }
 0xb0b   :  { %v1893_v28 = vpop.f32.mrf.mxu0  ;;  %1926 = vmatprep.mubr.msk.bf16.mxu0 %vm2073_vm1, %v2072_v15 }
 0xb0c   :  { %v1448_v28 = vsel %vm50_vm0, %v2418_v27, 0.0 }
 0xb0d   :  { %v1013_v30 = vpop.f32.mrf.mxu0 }
 0xb0e   :  { %v1019_v31 = vmul.f32 %v2037_v29, %v1013_v30  ;;  %v1389_v29 = vsel %vm229_vm3, %v1384_v0, 0 }
 0xb0f   :  { %v1904_v32 = vpop.f32.mrf.mxu0 }
 0xb10   :  { %v1020_v33 = vpack.c.bf16 %v1019_v31, %v1019_v31 }
 0xb11   :  { %v1016_v34 = vpop.f32.mrf.mxu0 }
 0xb12   :  { %1909 = vmatmul.mubr.msk.bf16.vlgmr.msra.gmra.mxu1 %vm166_vm2, %v1020_v33 }
 0xb13   :  { %1919 = vmatpush3.bf16.xpose.msra.mxu1 %v1122_v36  ;;  %v1905_v37 = vpop.f32.mrf.mxu0  ;;  %1920 = vmatprep.mubr.msk.bf16.mxu1 %vm2073_vm1, %v2072_v15 }
 0xb14   :  { %1930 = vmatprep.subr.bf16.mxu1 %v2072_v15 }
 0xb1a   :  { %1921 = vmatmul.mubr.msk.bf16.vlgmr.msra.gmra.mxu1 %vm166_vm2, %v1115_v20 }
 0xb1b   :  { %1932 = vmatprep.mubr.msk.bf16.mxu1 %vm2073_vm1, %v2072_v15  ;;  %1931 = vmatpush3.bf16.msra.mxu1 %v1230_v3  ;;  %v2002_v3 = vld [vmem:[%s2513_s11 + $0x38] sm:$0xff]  }
 0xb1c   :  { %1942 = vmatprep.subr.bf16.mxu1 %v2072_v15 }
 0xbca   :  { %v1108_v38 = vpop.f32.mrf.mxu0 }
 0xbcc   :  { %v1916_v35 = vpop.f32.mrf.mxu0 }
 0xbce   :  { %v1111_v39 = vpop.f32.mrf.mxu0 }
 0xbd0   :  { %v1917_v40 = vpop.f32.mrf.mxu0 }
 0xbd2   :  { %v1062_v42 = vpop.f32.mrf.mxu1 }
 0xbd3   :  { %v2382_v43 = vadd.f32 %v1108_v38, %v1062_v42 }
 0xbd4   :  { %v1910_v44 = vpop.f32.mrf.mxu1 }
 0xbd6   :  { %v1065_v45 = vpop.f32.mrf.mxu1 }
 0xbd8   :  { %v1911_v46 = vpop.f32.mrf.mxu1 }
 0xbda   :  { %v1158_v47 = vpop.f32.mrf.mxu1 }
 0xbdb   :  { %v1164_v48 = vsel %vm166_vm2, %v1158_v47, -inf }
 0xbdc   :  { %1165 = vmax.xlane.f32.xlu1 %v1164_v48  ;;  %v1922_v49 = vpop.f32.mrf.mxu1 }
 0xbde   :  { %v1161_v50 = vpop.f32.mrf.mxu1 }
 0xbe0   :  { %v1923_v51 = vpop.f32.mrf.mxu1 }
 0xbed   :  { %1175 = vrot.lane.b32.xlu1 %v2287_v60, %s2083_s29 }
 0xbf1   :  { %1273 = vrot.lane.b32.xlu1 %v2287_v60, %s2081_s24 }
 0xc65   :  { %v1166_v52 = vpop.xlane.xlu1 %1165 }
 0xc66   :  { %v1167_v53 = vsub.f32 %v1158_v47, %v1166_v52 }
 0xc68   :  { %v1168_v54 = vmul.f32 1.442695, %v1167_v53 }
 0xc69   :  { %v1176_v55 = vpop.permute.xlu1 %1175 }
 0xc6a   :  { %2038 = vpow2.f32 %v1168_v54  ;;  %v1181_v56 = vsel %vm229_vm3, %v1176_v55, 0 }
 0xc6b   :  { %1925 = vmatpush3.bf16.msra.mxu0 %v1181_v56 }
 0xc6c   :  { %1936 = vmatprep.subr.bf16.mxu0 %v2072_v15 }
 0xc6d   :  { %v1274_v63 = vpop.permute.xlu1 %1273 }
 0xc77   :  { %v2039_v57 = vpop.eup %2038 }
 0xc78   :  { %v1170_v59 = vsel %vm166_vm2, %v2039_v57, 0.0  ;;  %v1174_v61 = vpack.c.bf16 %v2039_v57, %v2039_v57 }
 0xc79   :  { %1171 = vadd.xlane.f32.xlu1 %v1170_v59 }
 0xc7a   :  { %1927 = vmatmul.mubr.msk.bf16.vlgmr.msra.gmra.mxu0 %vm166_vm2, %v1174_v61 }
 0xc7b   :  { %1937 = vmatpush3.bf16.xpose.msra.mxu0 %v1281_v62  ;;  %1938 = vmatprep.mubr.msk.bf16.mxu0 %vm2073_vm1, %v2072_v15 }
 0xc7c   :  { %1948 = vmatprep.subr.bf16.mxu0 %v2072_v15 }
 0xc82   :  { %1939 = vmatmul.mubr.msk.bf16.vlgmr.msra.gmra.mxu0 %vm166_vm2, %v1274_v63 }
 0xc83   :  { %1950 = vmatprep.mubr.msk.bf16.mxu0 %vm2073_vm1, %v2072_v15  ;;  %1949 = vmatpush3.bf16.msra.mxu0 %v1389_v29 }
 0xc84   :  { %1962 = vmatprep.subr.bf16.mxu0 %v2072_v15 }
 0xd02   :  { %v1172_v4 = vpop.xlane.xlu1 %1171 }
 0xd03   :  { %2040 = vrcp.f32 %v1172_v4  ;;  %v2003_v4 = vld [vmem:[%s2513_s11 + $0x30] sm:$0xff]  }
 0xd10   :  { %v2041_v5 = vpop.eup %2040 }
 0xd3a   :  { %v1217_v6 = vpop.f32.mrf.mxu0 }
 0xd3b   :  { %v1223_v7 = vmul.f32 %v2041_v5, %v1217_v6  ;;  %v2004_v5 = vld [vmem:[%s2513_s11 + $0x28] sm:$0xff]   ;;  %v2005_v6 = vld [vmem:[%s2513_s11 + $0x20] sm:$0xff]  }
 0xd3c   :  { %v1928_v8 = vpop.f32.mrf.mxu0 }
 0xd3d   :  { %v1224_v9 = vpack.c.bf16 %v1223_v7, %v1223_v7  ;;  %v2006_v7 = vld [vmem:[%s2513_s11 + $0x18] sm:$0xff]  }
 0xd3e   :  { %v1220_v10 = vpop.f32.mrf.mxu0 }
 0xd3f   :  { %1933 = vmatmul.mubr.msk.bf16.vlgmr.msra.gmra.mxu1 %vm166_vm2, %v1224_v9 }
 0xd40   :  { %v1929_v11 = vpop.f32.mrf.mxu0  ;;  %1944 = vmatprep.mubr.msk.bf16.mxu1 %vm2073_vm1, %v2072_v15 }
 0xd42   :  { %v1317_v12 = vpop.f32.mrf.mxu0 }
 0xd43   :  { %v1323_v13 = vsel %vm166_vm2, %v1317_v12, -inf }
 0xd44   :  { %1324 = vmax.xlane.f32.xlu0 %v1323_v13  ;;  %v1940_v14 = vpop.f32.mrf.mxu0 }
 0xd46   :  { %v1320_v16 = vpop.f32.mrf.mxu0 }
 0xd48   :  { %v1941_v17 = vpop.f32.mrf.mxu0 }
 0xd49   :  { %v1724_v17 = vld [vmem:[%s2509_s7] ss:$0 sm:$0xff] }
 0xd5a   :  { %1334 = vrot.lane.b32.xlu0 %v2287_v60, %s2084_s3 }
 0xdcd   :  { %v1325_v18 = vpop.xlane.xlu0 %1324 }
 0xdce   :  { %v1326_v19 = vsub.f32 %v1317_v12, %v1325_v18 }
 0xdd0   :  { %v1327_v20 = vmul.f32 1.442695, %v1326_v19 }
 0xdd1   :  { %v1335_v21 = vpop.permute.xlu0 %1334 }
 0xdd2   :  { %2042 = vpow2.f32 %v1327_v20  ;;  %v1340_v22 = vsel %vm229_vm3, %v1335_v21, 0  ;;  %v1725_v21 = vld [vmem:[%s2510_s8] ss:$0 sm:$0xff] }
 0xdd3   :  { %1943 = vmatpush3.bf16.msra.mxu1 %v1340_v22 }
 0xdd4   :  { %1954 = vmatprep.subr.bf16.mxu1 %v2072_v15 }
 0xddf   :  { %v2043_v25 = vpop.eup %2042 }
 0xde0   :  { %v1329_v60 = vsel %vm166_vm2, %v2043_v25, 0.0  ;;  %v1333_v26 = vpack.c.bf16 %v2043_v25, %v2043_v25  ;;  %v2007_v25 = vld [vmem:[%s2513_s11 + $0x10] sm:$0xff]  }
 0xde1   :  { %1330 = vadd.xlane.f32.xlu1 %v1329_v60  ;;  %v2008_v60 = vld [vmem:[%s2513_s11 + $0x8] sm:$0xff]  }
 0xde2   :  { %1945 = vmatmul.mubr.msk.bf16.vlgmr.msra.gmra.mxu1 %vm166_vm2, %v1333_v26  ;;  %v2009_v26 = vld [vmem:[%s2513_s11] sm:$0xff]  }
 0xde3   :  { %1958 = vmatprep.mubr.msk.bf16.mxu1 %vm2073_vm1, %v2072_v15 }
 0xde5   :  { %1449 = vadd.xlane.f32.xlu1 %v1448_v28  ;;  %v1726_v28 = vld [vmem:[%s2512_s10] ss:$0 sm:$0xff]  ;;  %s2085_s10 = smov [#allocation3]  }
 0xde6   :  { %s1682_s11 = sshll.u32 %s2085_s10, 4  ;;  %s1683_s11 = int_to_ptr.vmem [resolvable:$true] %s1682_s11 }
 0xde7   :  { %s2050_s6 = scalar_lea.vmem %s1683_s11, 256  ;;  %p2055_p1 = scmp.lt.s32.totalorder %s1683_s11, %s1683_s11 }
 0xde8   :  { %p2051_p0 = scmp.ne.s32.totalorder %s1683_s11, %s2050_s6  ;;  %p2056_p2 = scmp.lt.s32.totalorder %s2050_s6, %s2050_s6 }
 0xdea   :  { %p2057_p3 = por %p2056_p2, %p2055_p1 }
 0xdec   :  { %p2058_p4 = pnand %p2057_p3, %p2051_p0 }
 0xdff   :  { %v1266_v30 = vpop.f32.mrf.mxu1 }
 0xe00   :  { %v1272_v31 = vadd.f32 %v1266_v30, %v2382_v43 }
 0xe01   :  { %v1934_v32 = vpop.f32.mrf.mxu1 }
 0xe03   :  { %v1269_v33 = vpop.f32.mrf.mxu1 }
 0xe05   :  { %v1935_v34 = vpop.f32.mrf.mxu1 }
 0xe6a   :  { %v1331_v36 = vpop.xlane.xlu1 %1330 }
 0xe6b   :  { %2044 = vrcp.f32 %v1331_v36 }
 0xe6e   :  { %v1450_v47 = vpop.xlane.xlu1 %1449 }
 0xe6f   :  { %v1454_v50 = vmul.f32 0.03125, %v1450_v47 }
 0xe71   :  { %v1456_v52 = vsub.f32 %v2418_v27, %v1454_v50 }
 0xe73   :  { %v1458_v56 = vmul.f32 %v1456_v52, %v1456_v52 }
 0xe75   :  { %v1460_v57 = vsel %vm50_vm0, %v1458_v56, 0.0 }
 0xe78   :  { %v2045_v37 = vpop.eup %2044 }
 0xea2   :  { %v1376_v38 = vpop.f32.mrf.mxu1 }
 0xea3   :  { %v1382_v35 = vmul.f32 %v2045_v37, %v1376_v38 }
 0xea4   :  { %v1946_v39 = vpop.f32.mrf.mxu1 }
 0xea5   :  { %v1383_v40 = vpack.c.bf16 %v1382_v35, %v1382_v35 }
 0xea6   :  { %v1379_v42 = vpop.f32.mrf.mxu1 }
 0xea7   :  { %1951 = vmatmul.mubr.msk.bf16.vlgmr.msra.gmra.mxu0 %vm166_vm2, %v1383_v40 }
 0xea8   :  { %v1947_v44 = vpop.f32.mrf.mxu1  ;;  %1978 = vmatprep.mubr.msk.bf16.mxu0 %vm2073_vm1, %v2072_v15  ;;  %1963 = vmatpush3.bf16.msra.mxu0 %v2002_v3 }
 0xea9   :  { %1964 = vmatprep.subr.bf16.mxu0 %v2072_v15 }
 0xeac   :  { %1965 = vmatpush3.bf16.msra.mxu0 %v2003_v4 }
 0xead   :  { %1966 = vmatprep.subr.bf16.mxu0 %v2072_v15 }
 0xeb0   :  { %1967 = vmatpush3.bf16.msra.mxu0 %v2004_v5 }
 0xeb1   :  { %1968 = vmatprep.subr.bf16.mxu0 %v2072_v15 }
 0xeb4   :  { %1969 = vmatpush3.bf16.msra.mxu0 %v2005_v6 }
 0xeb5   :  { %1970 = vmatprep.subr.bf16.mxu0 %v2072_v15 }
 0xeb8   :  { %1971 = vmatpush3.bf16.msra.mxu0 %v2006_v7 }
 0xeb9   :  { %1972 = vmatprep.subr.bf16.mxu0 %v2072_v15 }
 0xebc   :  { %1973 = vmatpush3.bf16.msra.mxu0 %v2007_v25 }
 0xebd   :  { %1974 = vmatprep.subr.bf16.mxu0 %v2072_v15 }
 0xec0   :  { %1975 = vmatpush3.bf16.msra.mxu0 %v2008_v60 }
 0xec1   :  { %1976 = vmatprep.subr.bf16.mxu0 %v2072_v15 }
 0xec4   :  { %1977 = vmatpush3.bf16.msra.mxu0 %v2009_v26 }
 0xf67   :  { %v1425_v45 = vpop.f32.mrf.mxu0 }
 0xf68   :  { %v1431_v46 = vadd.f32 %v1425_v45, %v1272_v31 }
 0xf69   :  { %v1952_v43 = vpop.f32.mrf.mxu0 }
 0xf6a   :  { %1432 = vst.msk [vmem:[#allocation2 + $0x8] sm:$0xff] %vm50_vm0, %v1431_v46 }
 0xf6b   :  { %v1428_v48 = vpop.f32.mrf.mxu0 }
 0xf6d   :  { %v1953_v49 = vpop.f32.mrf.mxu0 }
 0xf71   :  { %v1434_v51 = vld [vmem:[#allocation2 + $0x8] sm:$0xff] }
 0xf72   :  { %v1436_v53 = vadd.f32 %v1434_v51, %v2166_v1  ;;  %v2000_v1 = vld [vmem:[%s2511_s9 + $0x8] sm:$0xff]  }
 0xf73   :  { %1955 = vmatpush3.bf16.msra.mxu1 %v2000_v1 }
 0xf74   :  { %v2437_v54 = vadd.f32 %v1723_v24, %v1436_v53  ;;  %1956 = vmatprep.subr.bf16.mxu1 %v2072_v15  ;;  %v1730_v15 = vld [vmem:[%s2514_s12] ss:$0 sm:$0xff] }
 0xf76   :  { %v1451_v55 = vsel %vm50_vm0, %v2437_v54, 0.0 }
 0xf77   :  { %1452 = vadd.xlane.f32.xlu1 %v1451_v55  ;;  %1957 = vmatpush3.bf16.msra.mxu1 %v2001_v2 }
 0xf7b   :  { %1461 = vadd.xlane.f32.xlu1 %v1460_v57 }
0x1000   :  { %v1453_v58 = vpop.xlane.xlu1 %1452 }
0x1001   :  { %v1455_v59 = vmul.f32 0.03125, %v1453_v58 }
0x1003   :  { %v1457_v61 = vsub.f32 %v2437_v54, %v1455_v59 }
0x1004   :  { %v1462_v8 = vpop.xlane.xlu1 %1461 }
0x1005   :  { %v1459_v62 = vmul.f32 %v1457_v61, %v1457_v61  ;;  %v1466_v9 = vmul.f32 0.03125, %v1462_v8 }
0x1007   :  { %v1463_v63 = vsel %vm50_vm0, %v1459_v62, 0.0  ;;  %v1468_v10 = vadd.f32 1e-05, %v1466_v9 }
0x1008   :  { %1464 = vadd.xlane.f32.xlu1 %v1463_v63 }
0x1009   :  { %2046 = vrsqrt.f32 %v1468_v10 }
0x1016   :  { %v2047_v14 = vpop.eup %2046 }
0x1017   :  { %v1472_v16 = vmul.f32 %v2047_v14, %v1456_v52 }
0x1019   :  { %v1480_v20 = vmul.f32 %v1724_v17, %v1472_v16 }
0x101b   :  { %v1488_v23 = vadd.f32 %v1725_v21, %v1480_v20 }
0x1091   :  { %v1465_v11 = vpop.xlane.xlu1 %1464 }
0x1092   :  { %v1467_v12 = vmul.f32 0.03125, %v1465_v11 }
0x1094   :  { %v1469_v13 = vadd.f32 1e-05, %v1467_v12 }
0x1096   :  { %2048 = vrsqrt.f32 %v1469_v13 }
0x10a3   :  { %v2049_v18 = vpop.eup %2048 }
0x10a4   :  { %v1473_v19 = vmul.f32 %v2049_v18, %v1457_v61 }
0x10a6   :  { %v1481_v22 = vmul.f32 %v1724_v17, %v1473_v19 }
0x10a8   :  { %v1489_v41 = vadd.f32 %v1725_v21, %v1481_v22 }
0x10aa   :  { %v1490_v24 = vpack.c.bf16 %v1489_v41, %v1488_v23 }
0x10ac   :  { %1959 = vmatmul.mubr.msk.bf16.vlgmr.msra.gmra.mxu1 %vm50_vm0, %v1490_v24 }
0x116c   :  { %v1551_v0 = vpop.f32.mrf.mxu1 }
0x116d   :  { %v1552_v30 = vadd.f32 %v1726_v28, %v1551_v0 }
0x116e   :  { %v1960_v29 = vpop.f32.mrf.mxu1 }
0x116f   :  { %v1558_v34 = vmax.f32 %v1552_v30, 0.0 }
0x1170   :  { %v1554_v31 = vpop.f32.mrf.mxu1 }
0x1171   :  { %v1555_v32 = vadd.f32 %v1726_v28, %v1554_v31 }
0x1172   :  { %v1961_v33 = vpop.f32.mrf.mxu1 }
0x1173   :  { %v1559_v36 = vmax.f32 %v1555_v32, 0.0 }
0x1175   :  { %v1560_v37 = vpack.c.bf16 %v1559_v36, %v1558_v34 }
0x1177   :  { %1979 = vmatmul.mubr.bf16.vlgmr.msra.gmra.mxu0 %v1560_v37 }
0x1237   :  { %v1666_v38 = vpop.f32.mrf.mxu0 }
0x1238   :  { %v1667_v35 = vadd.f32 %v1730_v15, %v1666_v38 }
0x1239   :  { %v1980_v39 = vpop.f32.mrf.mxu0 }
0x123a   :  { %v1673_v40 = vadd.f32 %v1667_v35, %v2418_v27 }
0x123b   :  { %v1669_v42 = vpop.f32.mrf.mxu0 }
0x123c   :  { %1675 = vst.msk [vmem:[#allocation3] sm:$0xff] %vm50_vm0, %v1673_v40  ;;  %v1670_v44 = vadd.f32 %v1730_v15, %v1669_v42 }
0x123d   :  { %v1981_v45 = vpop.f32.mrf.mxu0 }
0x123e   :  { %v1674_v46 = vadd.f32 %v1670_v44, %v2437_v54 }
0x1240   :  { %1676 = vst.msk [vmem:[#allocation3 + $0x8] sm:$0xff] %vm50_vm0, %v1674_v46 }
0x1241   :  { %2061 = shalt.err (!%p2058_p4)
}
0x1242   :  { %s2086_s12 = smov 128   ;;  %s2087_s24 = smov 8  }
0x1243   :  { %1688 = dma.vmem_to_hbm [thread:$0]  %s1683_s11, 256, %s2515_s13, [#allocation4], %s2086_s12, %s2086_s12, %s2087_s24  }
0x1244   :  { %2070 = dma.done.wait [#allocation4], 256  }
0x1245   :  { %2071 = vsyncadd [#allocation4], 4294967040 }
0x1246   :  { %1692 = vsyncpa [#allocation4], 1 }

// kernel: tpu_custom_call.1
= control target key start
LH: loop header
LB: loop body
LE: loop exit
PB: predicated region body
PF: predicated region fallthrough
CT: control target
= control target key end

     0   :  { %vm50_vm0 = vcmask 261120   ;;  %s2502_s0 = inlined_call_operand.vmem [shape: f32[16,32], index: 0, kind: input, shape index: {}]   ;;  %s2503_s1 = inlined_call_operand.vmem [shape: f32[1,32], index: 1, kind: input, shape index: {}]   ;;  %s2504_s2 = inlined_call_operand.vmem [shape: f32[1,32], index: 2, kind: input, shape index: {}]   ;;  %s2505_s3 = inlined_call_operand.vmem [shape: bf16[32,96], index: 3, kind: input, shape index: {}]   ;;  %s2506_s4 = inlined_call_operand.vmem [shape: f32[1,96], index: 4, kind: input, shape index: {}]   ;;  %s2507_s5 = inlined_call_operand.vmem [shape: bf16[32,32], index: 5, kind: input, shape index: {}]   ;;  %s2508_s6 = inlined_call_operand.vmem [shape: f32[1,32], index: 6, kind: input, shape index: {}]   ;;  %s2509_s7 = inlined_call_operand.vmem [shape: f32[1,32], index: 7, kind: input, shape index: {}]   ;;  %s2510_s8 = inlined_call_operand.vmem [shape: f32[1,32], index: 8, kind: input, shape index: {}]   ;;  %s2511_s9 = inlined_call_operand.vmem [shape: bf16[32,128], index: 9, kind: input, shape index: {}]   ;;  %s2512_s10 = inlined_call_operand.vmem [shape: f32[1,128], index: 10, kind: input, shape index: {}]   ;;  %s2513_s11 = inlined_call_operand.vmem [shape: bf16[128,32], index: 11, kind: input, shape index: {}]   ;;  %s2514_s12 = inlined_call_operand.vmem [shape: f32[1,32], index: 12, kind: input, shape index: {}]   ;;  %s2515_s13 = inlined_call_operand.hbm [shape: f32[16,32], index: 13, kind: output, shape index: {}]  }
   0x1   :  { %v2161_v0 = vld [vmem:[%s2502_s0] sm:$0xff]  ;;  %v2166_v1 = vld [vmem:[%s2502_s0 + $0x8] sm:$0xff] }
   0x2   :  { %v51_v2 = vsel %vm50_vm0, %v2161_v0, 0.0  ;;  %v54_v3 = vsel %vm50_vm0, %v2166_v1, 0.0 }
   0x3   :  { %52 = vadd.xlane.f32.xlu0 %v51_v2 }
   0x7   :  { %55 = vadd.xlane.f32.xlu0 %v54_v3 }
   0x8   :  { %18 = vsyncpa [#allocation4], 0  ;;  %v1998_v14 = vld [vmem:[%s2505_s3 + $0x8] sm:$0xff]   ;;  %v2072_v15 = vmov 0.0   ;;  %vm2073_vm1 = vmmov 0   ;;  %v1999_v16 = vld [vmem:[%s2505_s3] sm:$0xff]  }
   0x9   :  { %1802 = vmatprep.subr.bf16.mxu1 %v2072_v15  ;;  %1806 = vmatprep.mubr.msk.bf16.mxu1 %vm2073_vm1, %v2072_v15  ;;  %v1693_v25 = vld [vmem:[%s2503_s1] ss:$0 sm:$0xff]  ;;  %s2074_s1 = smov 64   ;;  %s2076_s20 = smov 120   ;;  %vm166_vm2 = vcmask 64512   ;;  %vm229_vm3 = vcmask 1043456  }
   0xa   :  { %1803 = vmatpush3.bf16.msra.mxu1 %v1998_v14  ;;  %1828 = vmatprep.subr.bf16.mxu0 %v2072_v15  ;;  %v1694_v29 = vld [vmem:[%s2504_s2] ss:$0 sm:$0xff]  ;;  %s2075_s2 = smov 96   ;;  %s2078_s21 = smov 88  }
   0xb   :  { %1804 = vmatprep.subr.bf16.mxu1 %v2072_v15  ;;  %1830 = vmatprep.mubr.msk.bf16.mxu0 %vm2073_vm1, %v2072_v15  ;;  %v1695_v35 = vld [vmem:[%s2506_s4] ss:$0 sm:$0xff]  ;;  %s2077_s4 = smov 56   ;;  %s2079_s22 = smov 112  }
   0xc   :  { %s2080_s23 = smov 72   ;;  %s2081_s24 = smov 104  }
   0xd   :  { %s2082_s0 = smov 80   ;;  %s2083_s29 = smov 48  }
   0xe   :  { %1805 = vmatpush3.bf16.msra.mxu1 %v1999_v16  ;;  %s2084_s3 = smov 40  }
   0xf   :  { %1810 = vmatprep.subr.bf16.mxu1 %v2072_v15 }
  0x8c   :  { %v53_v4 = vpop.xlane.xlu0 %52 }
  0x8d   :  { %v58_v5 = vmul.f32 0.03125, %v53_v4 }
  0x8f   :  { %v60_v6 = vsub.f32 %v2161_v0, %v58_v5 }
  0x90   :  { %v56_v7 = vpop.xlane.xlu0 %55 }
  0x91   :  { %v59_v8 = vmul.f32 0.03125, %v56_v7  ;;  %v62_v9 = vmul.f32 %v60_v6, %v60_v6 }
  0x93   :  { %v61_v10 = vsub.f32 %v2166_v1, %v59_v8  ;;  %v64_v11 = vsel %vm50_vm0, %v62_v9, 0.0 }
  0x94   :  { %65 = vadd.xlane.f32.xlu1 %v64_v11 }
  0x95   :  { %v63_v12 = vmul.f32 %v61_v10, %v61_v10 }
  0x97   :  { %v67_v13 = vsel %vm50_vm0, %v63_v12, 0.0  ;;  %v275_v12 = vld [vmem:[%s2507_s5] sm:$0xf] }
  0x98   :  { %68 = vadd.xlane.f32.xlu1 %v67_v13 }
 0x11d   :  { %v66_v17 = vpop.xlane.xlu1 %65 }
 0x11e   :  { %v70_v18 = vmul.f32 0.03125, %v66_v17  ;;  %v438_v17 = vsel %vm229_vm3, %v275_v12, 0 }
 0x120   :  { %v72_v19 = vadd.f32 1e-05, %v70_v18  ;;  %v387_v18 = vld [vmem:[%s2507_s5 + $0x4] sm:$0xf] }
 0x121   :  { %v69_v20 = vpop.xlane.xlu1 %68 }
 0x122   :  { %2010 = vrsqrt.f32 %v72_v19  ;;  %v71_v21 = vmul.f32 0.03125, %v69_v20  ;;  %v392_v19 = vsel %vm229_vm3, %v387_v18, 0 }
 0x124   :  { %v73_v22 = vadd.f32 1e-05, %v71_v21 }
 0x126   :  { %2012 = vrsqrt.f32 %v73_v22 }
 0x12f   :  { %v2011_v23 = vpop.eup %2010 }
 0x130   :  { %v76_v24 = vmul.f32 %v2011_v23, %v60_v6 }
 0x132   :  { %v84_v28 = vmul.f32 %v1693_v25, %v76_v24 }
 0x133   :  { %v2013_v26 = vpop.eup %2012 }
 0x134   :  { %v77_v27 = vmul.f32 %v2013_v26, %v61_v10  ;;  %v92_v31 = vadd.f32 %v1694_v29, %v84_v28 }
 0x136   :  { %v85_v30 = vmul.f32 %v1693_v25, %v77_v27 }
 0x138   :  { %v93_v32 = vadd.f32 %v1694_v29, %v85_v30 }
 0x13a   :  { %v94_v33 = vpack.c.bf16 %v93_v32, %v92_v31 }
 0x13c   :  { %1807 = vmatmul.mubr.msk.bf16.vlgmr.msra.gmra.mxu1 %vm50_vm0, %v94_v33 }
 0x13d   :  { %1812 = vmatprep.mubr.msk.bf16.mxu1 %vm2073_vm1, %v2072_v15 }
 0x1fc   :  { %v155_v34 = vpop.f32.mrf.mxu1 }
 0x1fd   :  { %v156_v38 = vadd.f32 %v1695_v35, %v155_v34 }
 0x1fe   :  { %v1808_v36 = vpop.f32.mrf.mxu1 }
 0x200   :  { %v158_v37 = vpop.f32.mrf.mxu1 }
 0x201   :  { %v159_v39 = vadd.f32 %v1695_v35, %v158_v37 }
 0x202   :  { %v1809_v40 = vpop.f32.mrf.mxu1 }
 0x203   :  { %v2202_v41 = vpack.c.bf16 %v159_v39, %v156_v38 }
 0x205   :  { %224 = vrot.lane.b32.xlu1 %v2202_v41, %s2074_s1  ;;  %164 = vrot.lane.b32.xlu0 %v2202_v41, %s2075_s2 }
 0x209   :  { %276 = vrot.lane.b32.xlu0 %v2202_v41, %s2076_s20 }
 0x20d   :  { %337 = vrot.lane.b32.xlu0 %v2202_v41, %s2077_s4 }
 0x277   :  { %v165_v42 = vpop.permute.xlu0 %164  ;;  %v225_v45 = vpop.permute.xlu1 %224 }
 0x278   :  { %v171_v43 = vsel %vm166_vm2, %v165_v42, 0  ;;  %v231_v47 = vsel %vm229_vm3, %v225_v45, 0 }
 0x279   :  { %1811 = vmatpush3.bf16.xpose.msra.mxu1 %v171_v43 }
 0x27a   :  { %1816 = vmatprep.subr.bf16.mxu1 %v2072_v15 }
 0x27b   :  { %v277_v44 = vpop.permute.xlu0 %276 }
 0x27f   :  { %v338_v46 = vpop.permute.xlu0 %337 }
 0x280   :  { %1813 = vmatmul.mubr.msk.bf16.vlgmr.msra.gmra.mxu1 %vm166_vm2, %v2202_v41  ;;  %v343_v48 = vsel %vm229_vm3, %v338_v46, 0 }
 0x281   :  { %1817 = vmatpush3.bf16.msra.mxu1 %v231_v47  ;;  %1829 = vmatpush3.bf16.msra.mxu0 %v343_v48 }
 0x282   :  { %1818 = vmatprep.mubr.msk.bf16.mxu1 %vm2073_vm1, %v2072_v15  ;;  %1822 = vmatprep.subr.bf16.mxu1 %v2072_v15 }
 0x283   :  { %1840 = vmatprep.subr.bf16.mxu0 %v2072_v15 }
 0x340   :  { %v207_v49 = vpop.f32.mrf.mxu1 }
 0x341   :  { %v213_v50 = vsel %vm166_vm2, %v207_v49, -inf }
 0x342   :  { %214 = vmax.xlane.f32.xlu1 %v213_v50  ;;  %v1814_v51 = vpop.f32.mrf.mxu1 }
 0x344   :  { %v210_v52 = vpop.f32.mrf.mxu1 }
 0x346   :  { %v1815_v53 = vpop.f32.mrf.mxu1 }
 0x353   :  { %278 = vrot.lane.b32.xlu1 %v2202_v41, %s2078_s21 }
 0x3cb   :  { %v215_v54 = vpop.xlane.xlu1 %214 }
 0x3cc   :  { %v216_v55 = vsub.f32 %v207_v49, %v215_v54 }
 0x3ce   :  { %v217_v56 = vmul.f32 1.442695, %v216_v55 }
 0x3cf   :  { %v279_v58 = vpop.permute.xlu1 %278 }
 0x3d0   :  { %2014 = vpow2.f32 %v217_v56  ;;  %v284_v60 = vsel %vm166_vm2, %v279_v58, 0 }
 0x3dd   :  { %v2015_v57 = vpop.eup %2014 }
 0x3de   :  { %v223_v59 = vpack.c.bf16 %v2015_v57, %v2015_v57  ;;  %v219_v8 = vsel %vm166_vm2, %v2015_v57, 0.0 }
 0x3e0   :  { %1819 = vmatmul.mubr.msk.bf16.vlgmr.msra.gmra.mxu1 %vm166_vm2, %v223_v59 }
 0x3e1   :  { %1823 = vmatpush3.bf16.xpose.msra.mxu1 %v284_v60  ;;  %1824 = vmatprep.mubr.msk.bf16.mxu1 %vm2073_vm1, %v2072_v15  ;;  %v2287_v60 = vrot.slane %v2202_v41, 4 }
 0x3e2   :  { %1834 = vmatprep.subr.bf16.mxu1 %v2072_v15 }
 0x3e8   :  { %1825 = vmatmul.mubr.msk.bf16.vlgmr.msra.gmra.mxu1 %vm166_vm2, %v277_v44 }
 0x3e9   :  { %1836 = vmatprep.mubr.msk.bf16.mxu1 %vm2073_vm1, %v2072_v15  ;;  %1835 = vmatpush3.bf16.msra.mxu1 %v392_v19 }
 0x3ea   :  { %1846 = vmatprep.subr.bf16.mxu1 %v2072_v15 }
 0x4a0   :  { %v267_v61 = vpop.f32.mrf.mxu1 }
 0x4a2   :  { %v1820_v62 = vpop.f32.mrf.mxu1 }
 0x4a4   :  { %v270_v63 = vpop.f32.mrf.mxu1 }
 0x4a6   :  { %v1821_v2 = vpop.f32.mrf.mxu1 }
 0x4a8   :  { %v320_v3 = vpop.f32.mrf.mxu1 }
 0x4a9   :  { %v326_v4 = vsel %vm166_vm2, %v320_v3, -inf }
 0x4aa   :  { %327 = vmax.xlane.f32.xlu1 %v326_v4  ;;  %v1826_v5 = vpop.f32.mrf.mxu1 }
 0x4ac   :  { %v323_v6 = vpop.f32.mrf.mxu1 }
 0x4ae   :  { %v1827_v7 = vpop.f32.mrf.mxu1 }
 0x4bb   :  { %480 = vrot.lane.b32.xlu1 %v2202_v41, %s2079_s22 }
 0x4df   :  { %220 = vadd.xlane.f32.xlu1 %v219_v8 }
 0x4f0   :  { %641 = vrot.lane.b32.xlu1 %v2202_v41, %s2080_s23 }
 0x4f4   :  { %639 = vrot.lane.b32.xlu1 %v2202_v41, %s2081_s24 }
 0x533   :  { %v328_v9 = vpop.xlane.xlu1 %327 }
 0x534   :  { %v329_v10 = vsub.f32 %v320_v3, %v328_v9 }
 0x536   :  { %v330_v11 = vmul.f32 1.442695, %v329_v10 }
 0x537   :  { %v481_v20 = vpop.permute.xlu1 %480 }
 0x538   :  { %2016 = vpow2.f32 %v330_v11 }
 0x545   :  { %v2017_v13 = vpop.eup %2016 }
 0x546   :  { %v332_v14 = vsel %vm166_vm2, %v2017_v13, 0.0  ;;  %v336_v16 = vpack.c.bf16 %v2017_v13, %v2017_v13 }
 0x547   :  { %333 = vadd.xlane.f32.xlu0 %v332_v14 }
 0x548   :  { %1831 = vmatmul.mubr.msk.bf16.vlgmr.msra.gmra.mxu0 %vm166_vm2, %v336_v16 }
 0x549   :  { %1841 = vmatpush3.bf16.msra.mxu0 %v438_v17  ;;  %1842 = vmatprep.mubr.msk.bf16.mxu0 %vm2073_vm1, %v2072_v15 }
 0x54a   :  { %1852 = vmatprep.subr.bf16.mxu0 %v2072_v15 }
 0x55d   :  { %482 = vrot.lane.b32.xlu0 %v2202_v41, %s2082_s0 }
 0x568   :  { %v221_v21 = vpop.xlane.xlu1 %220 }
 0x569   :  { %2018 = vrcp.f32 %v221_v21 }
 0x56c   :  { %v642_v55 = vpop.permute.xlu1 %641 }
 0x56d   :  { %v647_v58 = vsel %vm166_vm2, %v642_v55, 0 }
 0x570   :  { %v640_v59 = vpop.permute.xlu1 %639 }
 0x576   :  { %v2019_v22 = vpop.eup %2018 }
 0x577   :  { %v273_v23 = vmul.f32 %v2019_v22, %v267_v61  ;;  %v591_v61 = vld [vmem:[%s2507_s5 + $0x8] sm:$0xf] }
 0x578   :  { %v596_v62 = vsel %vm229_vm3, %v591_v61, 0 }
 0x579   :  { %v274_v24 = vpack.c.bf16 %v273_v23, %v273_v23 }
 0x57b   :  { %1843 = vmatmul.mubr.msk.bf16.vlgmr.msra.gmra.mxu0 %vm166_vm2, %v274_v24 }
 0x57c   :  { %1854 = vmatprep.mubr.msk.bf16.mxu0 %vm2073_vm1, %v2072_v15 }
 0x5d0   :  { %v334_v25 = vpop.xlane.xlu0 %333 }
 0x5d1   :  { %2020 = vrcp.f32 %v334_v25 }
 0x5d4   :  { %v483_v29 = vpop.permute.xlu0 %482 }
 0x5d5   :  { %v488_v33 = vsel %vm166_vm2, %v483_v29, 0 }
 0x5de   :  { %v2021_v26 = vpop.eup %2020 }
 0x608   :  { %v379_v27 = vpop.f32.mrf.mxu0 }
 0x609   :  { %v385_v28 = vmul.f32 %v2021_v26, %v379_v27 }
 0x60a   :  { %v1832_v30 = vpop.f32.mrf.mxu0 }
 0x60b   :  { %v386_v31 = vpack.c.bf16 %v385_v28, %v385_v28 }
 0x60c   :  { %v382_v32 = vpop.f32.mrf.mxu0 }
 0x60d   :  { %1837 = vmatmul.mubr.msk.bf16.vlgmr.msra.gmra.mxu1 %vm166_vm2, %v386_v31 }
 0x60e   :  { %1847 = vmatpush3.bf16.xpose.msra.mxu1 %v488_v33  ;;  %v1833_v34 = vpop.f32.mrf.mxu0  ;;  %1848 = vmatprep.mubr.msk.bf16.mxu1 %vm2073_vm1, %v2072_v15  ;;  %v750_v33 = vld [vmem:[%s2507_s5 + $0xc] sm:$0xf] }
 0x60f   :  { %1858 = vmatprep.subr.bf16.mxu1 %v2072_v15  ;;  %v755_v34 = vsel %vm229_vm3, %v750_v33, 0 }
 0x615   :  { %1849 = vmatmul.mubr.msk.bf16.vlgmr.msra.gmra.mxu1 %vm166_vm2, %v481_v20 }
 0x616   :  { %1860 = vmatprep.mubr.msk.bf16.mxu1 %vm2073_vm1, %v2072_v15  ;;  %1859 = vmatpush3.bf16.msra.mxu1 %v596_v62 }
 0x617   :  { %1870 = vmatprep.subr.bf16.mxu1 %v2072_v15 }
 0x63b   :  { %v2268_v35 = vpop.f32.mrf.mxu0 }
 0x63d   :  { %v1844_v36 = vpop.f32.mrf.mxu0 }
 0x63f   :  { %v477_v37 = vpop.f32.mrf.mxu0 }
 0x641   :  { %v1845_v38 = vpop.f32.mrf.mxu0 }
 0x6cd   :  { %v2270_v39 = vpop.f32.mrf.mxu1 }
 0x6ce   :  { %v475_v27 = vadd.f32 %v2268_v35, %v2270_v39 }
 0x6cf   :  { %v1838_v40 = vpop.f32.mrf.mxu1 }
 0x6d1   :  { %v431_v42 = vpop.f32.mrf.mxu1 }
 0x6d3   :  { %v1839_v43 = vpop.f32.mrf.mxu1 }
 0x6d5   :  { %v524_v44 = vpop.f32.mrf.mxu1 }
 0x6d6   :  { %v530_v45 = vsel %vm166_vm2, %v524_v44, -inf }
 0x6d7   :  { %531 = vmax.xlane.f32.xlu0 %v530_v45  ;;  %v1850_v46 = vpop.f32.mrf.mxu1 }
 0x6d9   :  { %v527_v47 = vpop.f32.mrf.mxu1 }
 0x6db   :  { %v1851_v48 = vpop.f32.mrf.mxu1 }
 0x6ed   :  { %541 = vrot.lane.b32.xlu0 %v2202_v41, %s2083_s29 }
 0x760   :  { %v532_v49 = vpop.xlane.xlu0 %531 }
 0x761   :  { %v533_v50 = vsub.f32 %v524_v44, %v532_v49 }
 0x763   :  { %v534_v51 = vmul.f32 1.442695, %v533_v50 }
 0x764   :  { %v542_v52 = vpop.permute.xlu0 %541 }
 0x765   :  { %2022 = vpow2.f32 %v534_v51  ;;  %v547_v53 = vsel %vm229_vm3, %v542_v52, 0 }
 0x766   :  { %1853 = vmatpush3.bf16.msra.mxu0 %v547_v53 }
 0x767   :  { %1864 = vmatprep.subr.bf16.mxu0 %v2072_v15 }
 0x772   :  { %v2023_v54 = vpop.eup %2022 }
 0x773   :  { %v536_v56 = vsel %vm166_vm2, %v2023_v54, 0.0  ;;  %v540_v57 = vpack.c.bf16 %v2023_v54, %v2023_v54 }
 0x774   :  { %537 = vadd.xlane.f32.xlu1 %v536_v56 }
 0x775   :  { %1855 = vmatmul.mubr.msk.bf16.vlgmr.msra.gmra.mxu0 %vm166_vm2, %v540_v57 }
 0x776   :  { %1865 = vmatpush3.bf16.xpose.msra.mxu0 %v647_v58  ;;  %1866 = vmatprep.mubr.msk.bf16.mxu0 %vm2073_vm1, %v2072_v15 }
 0x777   :  { %1876 = vmatprep.subr.bf16.mxu0 %v2072_v15 }
 0x77d   :  { %1867 = vmatmul.mubr.msk.bf16.vlgmr.msra.gmra.mxu0 %vm166_vm2, %v640_v59 }
 0x77e   :  { %1878 = vmatprep.mubr.msk.bf16.mxu0 %vm2073_vm1, %v2072_v15  ;;  %1877 = vmatpush3.bf16.msra.mxu0 %v755_v34 }
 0x77f   :  { %1888 = vmatprep.subr.bf16.mxu0 %v2072_v15 }
 0x785   :  { %800 = vrot.lane.b32.xlu1 %v2287_v60, %s2075_s2 }
 0x789   :  { %912 = vrot.lane.b32.xlu1 %v2287_v60, %s2078_s21 }
 0x7fd   :  { %v538_v63 = vpop.xlane.xlu1 %537 }
 0x7fe   :  { %2024 = vrcp.f32 %v538_v63 }
 0x801   :  { %v801_v21 = vpop.permute.xlu1 %800 }
 0x805   :  { %v913_v24 = vpop.permute.xlu1 %912 }
 0x806   :  { %v918_v25 = vsel %vm166_vm2, %v913_v24, 0 }
 0x80b   :  { %v2025_v2 = vpop.eup %2024 }
 0x835   :  { %v583_v3 = vpop.f32.mrf.mxu0 }
 0x836   :  { %v589_v4 = vmul.f32 %v2025_v2, %v583_v3 }
 0x837   :  { %v1856_v5 = vpop.f32.mrf.mxu0 }
 0x838   :  { %v590_v6 = vpack.c.bf16 %v589_v4, %v589_v4 }
 0x839   :  { %v586_v7 = vpop.f32.mrf.mxu0 }
 0x83a   :  { %1861 = vmatmul.mubr.msk.bf16.vlgmr.msra.gmra.mxu1 %vm166_vm2, %v590_v6 }
 0x83b   :  { %v1857_v8 = vpop.f32.mrf.mxu0  ;;  %1872 = vmatprep.mubr.msk.bf16.mxu1 %vm2073_vm1, %v2072_v15 }
 0x83d   :  { %v683_v9 = vpop.f32.mrf.mxu0 }
 0x83e   :  { %v689_v10 = vsel %vm166_vm2, %v683_v9, -inf }
 0x83f   :  { %690 = vmax.xlane.f32.xlu0 %v689_v10  ;;  %v1868_v11 = vpop.f32.mrf.mxu0 }
 0x841   :  { %v686_v12 = vpop.f32.mrf.mxu0 }
 0x843   :  { %v1869_v13 = vpop.f32.mrf.mxu0 }
 0x855   :  { %700 = vrot.lane.b32.xlu0 %v2202_v41, %s2084_s3  ;;  %v806_v41 = vsel %vm166_vm2, %v801_v21, 0 }
 0x859   :  { %910 = vrot.lane.b32.xlu0 %v2287_v60, %s2076_s20 }
 0x8c8   :  { %v691_v14 = vpop.xlane.xlu0 %690 }
 0x8c9   :  { %v692_v16 = vsub.f32 %v683_v9, %v691_v14  ;;  %v909_v14 = vld [vmem:[%s2507_s5] sm:$0xf] }
 0x8cb   :  { %v693_v17 = vmul.f32 1.442695, %v692_v16  ;;  %v1072_v16 = vsel %vm229_vm3, %v909_v14, 0 }
 0x8cc   :  { %v701_v18 = vpop.permute.xlu0 %700 }
 0x8cd   :  { %2026 = vpow2.f32 %v693_v17  ;;  %v706_v19 = vsel %vm229_vm3, %v701_v18, 0  ;;  %v1021_v17 = vld [vmem:[%s2507_s5 + $0x4] sm:$0xf] }
 0x8ce   :  { %1871 = vmatpush3.bf16.msra.mxu1 %v706_v19  ;;  %v1026_v18 = vsel %vm229_vm3, %v1021_v17, 0 }
 0x8cf   :  { %1882 = vmatprep.subr.bf16.mxu1 %v2072_v15 }
 0x8d0   :  { %v911_v26 = vpop.permute.xlu0 %910 }
 0x8da   :  { %v2027_v20 = vpop.eup %2026 }
 0x8db   :  { %v695_v22 = vsel %vm166_vm2, %v2027_v20, 0.0  ;;  %v699_v23 = vpack.c.bf16 %v2027_v20, %v2027_v20 }
 0x8dc   :  { %696 = vadd.xlane.f32.xlu1 %v695_v22 }
 0x8dd   :  { %1873 = vmatmul.mubr.msk.bf16.vlgmr.msra.gmra.mxu1 %vm166_vm2, %v699_v23 }
 0x8de   :  { %1883 = vmatpush3.bf16.xpose.msra.mxu1 %v806_v41  ;;  %1884 = vmatprep.mubr.msk.bf16.mxu1 %vm2073_vm1, %v2072_v15 }
 0x8df   :  { %1894 = vmatprep.subr.bf16.mxu1 %v2072_v15 }
 0x8e5   :  { %1885 = vmatmul.mubr.msk.bf16.vlgmr.msra.gmra.mxu1 %vm166_vm2, %v2287_v60 }
 0x8e6   :  { %1895 = vmatpush3.bf16.xpose.msra.mxu1 %v918_v25  ;;  %1896 = vmatprep.mubr.msk.bf16.mxu1 %vm2073_vm1, %v2072_v15 }
 0x8e7   :  { %1906 = vmatprep.subr.bf16.mxu1 %v2072_v15 }
 0x8ed   :  { %971 = vrot.lane.b32.xlu1 %v2287_v60, %s2077_s4  ;;  %1897 = vmatmul.mubr.msk.bf16.vlgmr.msra.gmra.mxu1 %vm166_vm2, %v911_v26 }
 0x8ee   :  { %1908 = vmatprep.mubr.msk.bf16.mxu1 %vm2073_vm1, %v2072_v15  ;;  %1907 = vmatpush3.bf16.msra.mxu1 %v1026_v18 }
 0x8ef   :  { %1918 = vmatprep.subr.bf16.mxu1 %v2072_v15 }
 0x8fa   :  { %v632_v28 = vpop.f32.mrf.mxu1 }
 0x8fb   :  { %v2327_v29 = vadd.f32 %v632_v28, %v475_v27 }
 0x8fc   :  { %v1862_v30 = vpop.f32.mrf.mxu1 }
 0x8fe   :  { %v635_v31 = vpop.f32.mrf.mxu1 }
 0x900   :  { %v1863_v32 = vpop.f32.mrf.mxu1 }
 0x965   :  { %v697_v36 = vpop.xlane.xlu1 %696 }
 0x966   :  { %2028 = vrcp.f32 %v697_v36 }
 0x969   :  { %v972_v2 = vpop.permute.xlu1 %971 }
 0x96a   :  { %v977_v5 = vsel %vm229_vm3, %v972_v2, 0  ;;  %v1225_v2 = vld [vmem:[%s2507_s5 + $0x8] sm:$0xf] }
 0x973   :  { %v2029_v37 = vpop.eup %2028 }
 0x99d   :  { %v742_v38 = vpop.f32.mrf.mxu1 }
 0x99e   :  { %v748_v35 = vmul.f32 %v2029_v37, %v742_v38 }
 0x99f   :  { %v1874_v39 = vpop.f32.mrf.mxu1 }
 0x9a0   :  { %v749_v40 = vpack.c.bf16 %v748_v35, %v748_v35 }
 0x9a1   :  { %v745_v42 = vpop.f32.mrf.mxu1 }
 0x9a2   :  { %1879 = vmatmul.mubr.msk.bf16.vlgmr.msra.gmra.mxu0 %vm166_vm2, %v749_v40 }
 0x9a3   :  { %v1875_v43 = vpop.f32.mrf.mxu1  ;;  %1890 = vmatprep.mubr.msk.bf16.mxu0 %vm2073_vm1, %v2072_v15 }
 0x9a5   :  { %v842_v44 = vpop.f32.mrf.mxu1 }
 0x9a6   :  { %v848_v45 = vsel %vm166_vm2, %v842_v44, -inf }
 0x9a7   :  { %849 = vmax.xlane.f32.xlu0 %v848_v45  ;;  %v1886_v46 = vpop.f32.mrf.mxu1 }
 0x9a9   :  { %v845_v47 = vpop.f32.mrf.mxu1 }
 0x9ab   :  { %v1887_v48 = vpop.f32.mrf.mxu1 }
 0x9ad   :  { %v954_v49 = vpop.f32.mrf.mxu1 }
 0x9ae   :  { %v960_v50 = vsel %vm166_vm2, %v954_v49, -inf }
 0x9af   :  { %961 = vmax.xlane.f32.xlu0 %v960_v50  ;;  %v1898_v51 = vpop.f32.mrf.mxu1 }
 0x9b1   :  { %v957_v52 = vpop.f32.mrf.mxu1 }
 0x9b3   :  { %v1899_v53 = vpop.f32.mrf.mxu1 }
 0x9c5   :  { %859 = vrot.lane.b32.xlu0 %v2287_v60, %s2074_s1 }
 0x9c9   :  { %1116 = vrot.lane.b32.xlu0 %v2287_v60, %s2082_s0 }
 0x9cd   :  { %1114 = vrot.lane.b32.xlu0 %v2287_v60, %s2079_s22 }
 0xa30   :  { %v850_v54 = vpop.xlane.xlu0 %849 }
 0xa31   :  { %v851_v55 = vsub.f32 %v842_v44, %v850_v54 }
 0xa33   :  { %v852_v56 = vmul.f32 1.442695, %v851_v55 }
 0xa35   :  { %2030 = vpow2.f32 %v852_v56 }
 0xa38   :  { %v962_v57 = vpop.xlane.xlu0 %961 }
 0xa39   :  { %v963_v58 = vsub.f32 %v954_v49, %v962_v57 }
 0xa3b   :  { %v964_v59 = vmul.f32 1.442695, %v963_v58 }
 0xa3c   :  { %v860_v61 = vpop.permute.xlu0 %859 }
 0xa3d   :  { %2032 = vpow2.f32 %v964_v59  ;;  %v865_v62 = vsel %vm229_vm3, %v860_v61, 0 }
 0xa3e   :  { %1889 = vmatpush3.bf16.msra.mxu0 %v865_v62 }
 0xa3f   :  { %1900 = vmatprep.subr.bf16.mxu0 %v2072_v15 }
 0xa40   :  { %v1117_v19 = vpop.permute.xlu0 %1116 }
 0xa41   :  { %v1122_v36 = vsel %vm166_vm2, %v1117_v19, 0 }
 0xa42   :  { %v2031_v63 = vpop.eup %2030 }
 0xa43   :  { %v854_v3 = vsel %vm166_vm2, %v2031_v63, 0.0  ;;  %v858_v4 = vpack.c.bf16 %v2031_v63, %v2031_v63 }
 0xa44   :  { %855 = vadd.xlane.f32.xlu0 %v854_v3  ;;  %v1115_v20 = vpop.permute.xlu0 %1114  ;;  %v1230_v3 = vsel %vm229_vm3, %v1225_v2, 0  ;;  %v2001_v2 = vld [vmem:[%s2511_s9] sm:$0xff]  }
 0xa45   :  { %1891 = vmatmul.mubr.msk.bf16.vlgmr.msra.gmra.mxu0 %vm166_vm2, %v858_v4 }
 0xa46   :  { %1901 = vmatpush3.bf16.msra.mxu0 %v977_v5  ;;  %1902 = vmatprep.mubr.msk.bf16.mxu0 %vm2073_vm1, %v2072_v15 }
 0xa47   :  { %1912 = vmatprep.subr.bf16.mxu0 %v2072_v15 }
 0xa4a   :  { %v2033_v6 = vpop.eup %2032 }
 0xa4b   :  { %v966_v7 = vsel %vm166_vm2, %v2033_v6, 0.0  ;;  %v970_v8 = vpack.c.bf16 %v2033_v6, %v2033_v6 }
 0xa4c   :  { %967 = vadd.xlane.f32.xlu1 %v966_v7 }
 0xa4d   :  { %1903 = vmatmul.mubr.msk.bf16.vlgmr.msra.gmra.mxu0 %vm166_vm2, %v970_v8 }
 0xa4e   :  { %1914 = vmatprep.mubr.msk.bf16.mxu0 %vm2073_vm1, %v2072_v15  ;;  %1913 = vmatpush3.bf16.msra.mxu0 %v1072_v16 }
 0xa4f   :  { %1924 = vmatprep.subr.bf16.mxu0 %v2072_v15 }
 0xa5a   :  { %1275 = vrot.lane.b32.xlu0 %v2287_v60, %s2080_s23 }
 0xa62   :  { %v791_v9 = vpop.f32.mrf.mxu0 }
 0xa63   :  { %v797_v10 = vadd.f32 %v791_v9, %v2327_v29 }
 0xa64   :  { %v1880_v11 = vpop.f32.mrf.mxu0 }
 0xa65   :  { %798 = vst.msk [vmem:[#allocation2] sm:$0xff] %vm50_vm0, %v797_v10 }
 0xa66   :  { %v794_v12 = vpop.f32.mrf.mxu0 }
 0xa68   :  { %v1881_v13 = vpop.f32.mrf.mxu0 }
 0xacd   :  { %v856_v21 = vpop.xlane.xlu0 %855 }
 0xace   :  { %2034 = vrcp.f32 %v856_v21 }
 0xad1   :  { %v1276_v58 = vpop.permute.xlu0 %1275 }
 0xad2   :  { %v1281_v62 = vsel %vm166_vm2, %v1276_v58, 0 }
 0xad5   :  { %v968_v22 = vpop.xlane.xlu1 %967 }
 0xad6   :  { %2036 = vrcp.f32 %v968_v22 }
 0xadb   :  { %v2035_v23 = vpop.eup %2034 }
 0xae3   :  { %v2037_v29 = vpop.eup %2036 }
 0xb05   :  { %v901_v41 = vpop.f32.mrf.mxu0 }
 0xb06   :  { %v907_v24 = vmul.f32 %v2035_v23, %v901_v41  ;;  %v1433_v23 = vld [vmem:[#allocation2] sm:$0xff] }
 0xb07   :  { %v1892_v25 = vpop.f32.mrf.mxu0  ;;  %v1435_v41 = vadd.f32 %v1433_v23, %v2161_v0  ;;  %v1384_v0 = vld [vmem:[%s2507_s5 + $0xc] sm:$0xf] }
 0xb08   :  { %v908_v26 = vpack.c.bf16 %v907_v24, %v907_v24  ;;  %v1723_v24 = vld [vmem:[%s2508_s6] ss:$0 sm:$0xff] }
 0xb09   :  { %v904_v27 = vpop.f32.mrf.mxu0 }
 0xb0a   :  { %1915 = vmatmul.mubr.msk.bf16.vlgmr.msra.gmra.mxu0 %vm166_vm2, %v908_v26  ;;  %v2418_v27 = vadd.f32 %v1723_v24, %v1435_v41 }
 0xb0b   :  { %v1893_v28 = vpop.f32.mrf.mxu0  ;;  %1926 = vmatprep.mubr.msk.bf16.mxu0 %vm2073_vm1, %v2072_v15 }
 0xb0c   :  { %v1448_v28 = vsel %vm50_vm0, %v2418_v27, 0.0 }
 0xb0d   :  { %v1013_v30 = vpop.f32.mrf.mxu0 }
 0xb0e   :  { %v1019_v31 = vmul.f32 %v2037_v29, %v1013_v30  ;;  %v1389_v29 = vsel %vm229_vm3, %v1384_v0, 0 }
 0xb0f   :  { %v1904_v32 = vpop.f32.mrf.mxu0 }
 0xb10   :  { %v1020_v33 = vpack.c.bf16 %v1019_v31, %v1019_v31 }
 0xb11   :  { %v1016_v34 = vpop.f32.mrf.mxu0 }
 0xb12   :  { %1909 = vmatmul.mubr.msk.bf16.vlgmr.msra.gmra.mxu1 %vm166_vm2, %v1020_v33 }
 0xb13   :  { %1919 = vmatpush3.bf16.xpose.msra.mxu1 %v1122_v36  ;;  %v1905_v37 = vpop.f32.mrf.mxu0  ;;  %1920 = vmatprep.mubr.msk.bf16.mxu1 %vm2073_vm1, %v2072_v15 }
 0xb14   :  { %1930 = vmatprep.subr.bf16.mxu1 %v2072_v15 }
 0xb1a   :  { %1921 = vmatmul.mubr.msk.bf16.vlgmr.msra.gmra.mxu1 %vm166_vm2, %v1115_v20 }
 0xb1b   :  { %1932 = vmatprep.mubr.msk.bf16.mxu1 %vm2073_vm1, %v2072_v15  ;;  %1931 = vmatpush3.bf16.msra.mxu1 %v1230_v3  ;;  %v2002_v3 = vld [vmem:[%s2513_s11 + $0x38] sm:$0xff]  }
 0xb1c   :  { %1942 = vmatprep.subr.bf16.mxu1 %v2072_v15 }
 0xbca   :  { %v1108_v38 = vpop.f32.mrf.mxu0 }
 0xbcc   :  { %v1916_v35 = vpop.f32.mrf.mxu0 }
 0xbce   :  { %v1111_v39 = vpop.f32.mrf.mxu0 }
 0xbd0   :  { %v1917_v40 = vpop.f32.mrf.mxu0 }
 0xbd2   :  { %v1062_v42 = vpop.f32.mrf.mxu1 }
 0xbd3   :  { %v2382_v43 = vadd.f32 %v1108_v38, %v1062_v42 }
 0xbd4   :  { %v1910_v44 = vpop.f32.mrf.mxu1 }
 0xbd6   :  { %v1065_v45 = vpop.f32.mrf.mxu1 }
 0xbd8   :  { %v1911_v46 = vpop.f32.mrf.mxu1 }
 0xbda   :  { %v1158_v47 = vpop.f32.mrf.mxu1 }
 0xbdb   :  { %v1164_v48 = vsel %vm166_vm2, %v1158_v47, -inf }
 0xbdc   :  { %1165 = vmax.xlane.f32.xlu1 %v1164_v48  ;;  %v1922_v49 = vpop.f32.mrf.mxu1 }
 0xbde   :  { %v1161_v50 = vpop.f32.mrf.mxu1 }
 0xbe0   :  { %v1923_v51 = vpop.f32.mrf.mxu1 }
 0xbed   :  { %1175 = vrot.lane.b32.xlu1 %v2287_v60, %s2083_s29 }
 0xbf1   :  { %1273 = vrot.lane.b32.xlu1 %v2287_v60, %s2081_s24 }
 0xc65   :  { %v1166_v52 = vpop.xlane.xlu1 %1165 }
 0xc66   :  { %v1167_v53 = vsub.f32 %v1158_v47, %v1166_v52 }
 0xc68   :  { %v1168_v54 = vmul.f32 1.442695, %v1167_v53 }
 0xc69   :  { %v1176_v55 = vpop.permute.xlu1 %1175 }
 0xc6a   :  { %2038 = vpow2.f32 %v1168_v54  ;;  %v1181_v56 = vsel %vm229_vm3, %v1176_v55, 0 }
 0xc6b   :  { %1925 = vmatpush3.bf16.msra.mxu0 %v1181_v56 }
 0xc6c   :  { %1936 = vmatprep.subr.bf16.mxu0 %v2072_v15 }
 0xc6d   :  { %v1274_v63 = vpop.permute.xlu1 %1273 }
 0xc77   :  { %v2039_v57 = vpop.eup %2038 }
 0xc78   :  { %v1170_v59 = vsel %vm166_vm2, %v2039_v57, 0.0  ;;  %v1174_v61 = vpack.c.bf16 %v2039_v57, %v2039_v57 }
 0xc79   :  { %1171 = vadd.xlane.f32.xlu1 %v1170_v59 }
 0xc7a   :  { %1927 = vmatmul.mubr.msk.bf16.vlgmr.msra.gmra.mxu0 %vm166_vm2, %v1174_v61 }
 0xc7b   :  { %1937 = vmatpush3.bf16.xpose.msra.mxu0 %v1281_v62  ;;  %1938 = vmatprep.mubr.msk.bf16.mxu0 %vm2073_vm1, %v2072_v15 }
 0xc7c   :  { %1948 = vmatprep.subr.bf16.mxu0 %v2072_v15 }
 0xc82   :  { %1939 = vmatmul.mubr.msk.bf16.vlgmr.msra.gmra.mxu0 %vm166_vm2, %v1274_v63 }
 0xc83   :  { %1950 = vmatprep.mubr.msk.bf16.mxu0 %vm2073_vm1, %v2072_v15  ;;  %1949 = vmatpush3.bf16.msra.mxu0 %v1389_v29 }
 0xc84   :  { %1962 = vmatprep.subr.bf16.mxu0 %v2072_v15 }
 0xd02   :  { %v1172_v4 = vpop.xlane.xlu1 %1171 }
 0xd03   :  { %2040 = vrcp.f32 %v1172_v4  ;;  %v2003_v4 = vld [vmem:[%s2513_s11 + $0x30] sm:$0xff]  }
 0xd10   :  { %v2041_v5 = vpop.eup %2040 }
 0xd3a   :  { %v1217_v6 = vpop.f32.mrf.mxu0 }
 0xd3b   :  { %v1223_v7 = vmul.f32 %v2041_v5, %v1217_v6  ;;  %v2004_v5 = vld [vmem:[%s2513_s11 + $0x28] sm:$0xff]   ;;  %v2005_v6 = vld [vmem:[%s2513_s11 + $0x20] sm:$0xff]  }
 0xd3c   :  { %v1928_v8 = vpop.f32.mrf.mxu0 }
 0xd3d   :  { %v1224_v9 = vpack.c.bf16 %v1223_v7, %v1223_v7  ;;  %v2006_v7 = vld [vmem:[%s2513_s11 + $0x18] sm:$0xff]  }
 0xd3e   :  { %v1220_v10 = vpop.f32.mrf.mxu0 }
 0xd3f   :  { %1933 = vmatmul.mubr.msk.bf16.vlgmr.msra.gmra.mxu1 %vm166_vm2, %v1224_v9 }
 0xd40   :  { %v1929_v11 = vpop.f32.mrf.mxu0  ;;  %1944 = vmatprep.mubr.msk.bf16.mxu1 %vm2073_vm1, %v2072_v15 }
 0xd42   :  { %v1317_v12 = vpop.f32.mrf.mxu0 }
 0xd43   :  { %v1323_v13 = vsel %vm166_vm2, %v1317_v12, -inf }
 0xd44   :  { %1324 = vmax.xlane.f32.xlu0 %v1323_v13  ;;  %v1940_v14 = vpop.f32.mrf.mxu0 }
 0xd46   :  { %v1320_v16 = vpop.f32.mrf.mxu0 }
 0xd48   :  { %v1941_v17 = vpop.f32.mrf.mxu0 }
 0xd49   :  { %v1724_v17 = vld [vmem:[%s2509_s7] ss:$0 sm:$0xff] }
 0xd5a   :  { %1334 = vrot.lane.b32.xlu0 %v2287_v60, %s2084_s3 }
 0xdcd   :  { %v1325_v18 = vpop.xlane.xlu0 %1324 }
 0xdce   :  { %v1326_v19 = vsub.f32 %v1317_v12, %v1325_v18 }
 0xdd0   :  { %v1327_v20 = vmul.f32 1.442695, %v1326_v19 }
 0xdd1   :  { %v1335_v21 = vpop.permute.xlu0 %1334 }
 0xdd2   :  { %2042 = vpow2.f32 %v1327_v20  ;;  %v1340_v22 = vsel %vm229_vm3, %v1335_v21, 0  ;;  %v1725_v21 = vld [vmem:[%s2510_s8] ss:$0 sm:$0xff] }
 0xdd3   :  { %1943 = vmatpush3.bf16.msra.mxu1 %v1340_v22 }
 0xdd4   :  { %1954 = vmatprep.subr.bf16.mxu1 %v2072_v15 }
 0xddf   :  { %v2043_v25 = vpop.eup %2042 }
 0xde0   :  { %v1329_v60 = vsel %vm166_vm2, %v2043_v25, 0.0  ;;  %v1333_v26 = vpack.c.bf16 %v2043_v25, %v2043_v25  ;;  %v2007_v25 = vld [vmem:[%s2513_s11 + $0x10] sm:$0xff]  }
 0xde1   :  { %1330 = vadd.xlane.f32.xlu1 %v1329_v60  ;;  %v2008_v60 = vld [vmem:[%s2513_s11 + $0x8] sm:$0xff]  }
 0xde2   :  { %1945 = vmatmul.mubr.msk.bf16.vlgmr.msra.gmra.mxu1 %vm166_vm2, %v1333_v26  ;;  %v2009_v26 = vld [vmem:[%s2513_s11] sm:$0xff]  }
 0xde3   :  { %1958 = vmatprep.mubr.msk.bf16.mxu1 %vm2073_vm1, %v2072_v15 }
 0xde5   :  { %1449 = vadd.xlane.f32.xlu1 %v1448_v28  ;;  %v1726_v28 = vld [vmem:[%s2512_s10] ss:$0 sm:$0xff]  ;;  %s2085_s10 = smov [#allocation3]  }
 0xde6   :  { %s1682_s11 = sshll.u32 %s2085_s10, 4  ;;  %s1683_s11 = int_to_ptr.vmem [resolvable:$true] %s1682_s11 }
 0xde7   :  { %s2050_s6 = scalar_lea.vmem %s1683_s11, 256  ;;  %p2055_p1 = scmp.lt.s32.totalorder %s1683_s11, %s1683_s11 }
 0xde8   :  { %p2051_p0 = scmp.ne.s32.totalorder %s1683_s11, %s2050_s6  ;;  %p2056_p2 = scmp.lt.s32.totalorder %s2050_s6, %s2050_s6 }
 0xdea   :  { %p2057_p3 = por %p2056_p2, %p2055_p1 }
 0xdec   :  { %p2058_p4 = pnand %p2057_p3, %p2051_p0 }
 0xdff   :  { %v1266_v30 = vpop.f32.mrf.mxu1 }
 0xe00   :  { %v1272_v31 = vadd.f32 %v1266_v30, %v2382_v43 }
 0xe01   :  { %v1934_v32 = vpop.f32.mrf.mxu1 }
 0xe03   :  { %v1269_v33 = vpop.f32.mrf.mxu1 }
 0xe05   :  { %v1935_v34 = vpop.f32.mrf.mxu1 }
 0xe6a   :  { %v1331_v36 = vpop.xlane.xlu1 %1330 }
 0xe6b   :  { %2044 = vrcp.f32 %v1331_v36 }
 0xe6e   :  { %v1450_v47 = vpop.xlane.xlu1 %1449 }
 0xe6f   :  { %v1454_v50 = vmul.f32 0.03125, %v1450_v47 }
 0xe71   :  { %v1456_v52 = vsub.f32 %v2418_v27, %v1454_v50 }
 0xe73   :  { %v1458_v56 = vmul.f32 %v1456_v52, %v1456_v52 }
 0xe75   :  { %v1460_v57 = vsel %vm50_vm0, %v1458_v56, 0.0 }
 0xe78   :  { %v2045_v37 = vpop.eup %2044 }
 0xea2   :  { %v1376_v38 = vpop.f32.mrf.mxu1 }
 0xea3   :  { %v1382_v35 = vmul.f32 %v2045_v37, %v1376_v38 }
 0xea4   :  { %v1946_v39 = vpop.f32.mrf.mxu1 }
 0xea5   :  { %v1383_v40 = vpack.c.bf16 %v1382_v35, %v1382_v35 }
 0xea6   :  { %v1379_v42 = vpop.f32.mrf.mxu1 }
 0xea7   :  { %1951 = vmatmul.mubr.msk.bf16.vlgmr.msra.gmra.mxu0 %vm166_vm2, %v1383_v40 }
 0xea8   :  { %v1947_v44 = vpop.f32.mrf.mxu1  ;;  %1978 = vmatprep.mubr.msk.bf16.mxu0 %vm2073_vm1, %v2072_v15  ;;  %1963 = vmatpush3.bf16.msra.mxu0 %v2002_v3 }
 0xea9   :  { %1964 = vmatprep.subr.bf16.mxu0 %v2072_v15 }
 0xeac   :  { %1965 = vmatpush3.bf16.msra.mxu0 %v2003_v4 }
 0xead   :  { %1966 = vmatprep.subr.bf16.mxu0 %v2072_v15 }
 0xeb0   :  { %1967 = vmatpush3.bf16.msra.mxu0 %v2004_v5 }
 0xeb1   :  { %1968 = vmatprep.subr.bf16.mxu0 %v2072_v15 }
 0xeb4   :  { %1969 = vmatpush3.bf16.msra.mxu0 %v2005_v6 }
 0xeb5   :  { %1970 = vmatprep.subr.bf16.mxu0 %v2072_v15 }
 0xeb8   :  { %1971 = vmatpush3.bf16.msra.mxu0 %v2006_v7 }
 0xeb9   :  { %1972 = vmatprep.subr.bf16.mxu0 %v2072_v15 }
 0xebc   :  { %1973 = vmatpush3.bf16.msra.mxu0 %v2007_v25 }
 0xebd   :  { %1974 = vmatprep.subr.bf16.mxu0 %v2072_v15 }
 0xec0   :  { %1975 = vmatpush3.bf16.msra.mxu0 %v2008_v60 }
 0xec1   :  { %1976 = vmatprep.subr.bf16.mxu0 %v2072_v15 }
 0xec4   :  { %1977 = vmatpush3.bf16.msra.mxu0 %v2009_v26 }
 0xf67   :  { %v1425_v45 = vpop.f32.mrf.mxu0 }
 0xf68   :  { %v1431_v46 = vadd.f32 %v1425_v45, %v1272_v31 }
 0xf69   :  { %v1952_v43 = vpop.f32.mrf.mxu0 }
 0xf6a   :  { %1432 = vst.msk [vmem:[#allocation2 + $0x8] sm:$0xff] %vm50_vm0, %v1431_v46 }
 0xf6b   :  { %v1428_v48 = vpop.f32.mrf.mxu0 }
 0xf6d   :  { %v1953_v49 = vpop.f32.mrf.mxu0 }
 0xf71   :  { %v1434_v51 = vld [vmem:[#allocation2 + $0x8] sm:$0xff] }
 0xf72   :  { %v1436_v53 = vadd.f32 %v1434_v51, %v2166_v1  ;;  %v2000_v1 = vld [vmem:[%s2511_s9 + $0x8] sm:$0xff]  }
 0xf73   :  { %1955 = vmatpush3.bf16.msra.mxu1 %v2000_v1 }
 0xf74   :  { %v2437_v54 = vadd.f32 %v1723_v24, %v1436_v53  ;;  %1956 = vmatprep.subr.bf16.mxu1 %v2072_v15  ;;  %v1730_v15 = vld [vmem:[%s2514_s12] ss:$0 sm:$0xff] }
 0xf76   :  { %v1451_v55 = vsel %vm50_vm0, %v2437_v54, 0.0 }
 0xf77   :  { %1452 = vadd.xlane.f32.xlu1 %v1451_v55  ;;  %1957 = vmatpush3.bf16.msra.mxu1 %v2001_v2 }
 0xf7b   :  { %1461 = vadd.xlane.f32.xlu1 %v1460_v57 }
0x1000   :  { %v1453_v58 = vpop.xlane.xlu1 %1452 }
0x1001   :  { %v1455_v59 = vmul.f32 0.03125, %v1453_v58 }
0x1003   :  { %v1457_v61 = vsub.f32 %v2437_v54, %v1455_v59 }
0x1004   :  { %v1462_v8 = vpop.xlane.xlu1 %1461 }
0x1005   :  { %v1459_v62 = vmul.f32 %v1457_v61, %v1457_v61  ;;  %v1466_v9 = vmul.f32 0.03125, %v1462_v8 }
0x1007   :  { %v1463_v63 = vsel %vm50_vm0, %v1459_v62, 0.0  ;;  %v1468_v10 = vadd.f32 1e-05, %v1466_v9 }
0x1008   :  { %1464 = vadd.xlane.f32.xlu1 %v1463_v63 }
0x1009   :  { %2046 = vrsqrt.f32 %v1468_v10 }
0x1016   :  { %v2047_v14 = vpop.eup %2046 }
0x1017   :  { %v1472_v16 = vmul.f32 %v2047_v14, %v1456_v52 }
0x1019   :  { %v1480_v20 = vmul.f32 %v1724_v17, %v1472_v16 }
0x101b   :  { %v1488_v23 = vadd.f32 %v1725_v21, %v1480_v20 }
0x1091   :  { %v1465_v11 = vpop.xlane.xlu1 %1464 }
0x1092   :  { %v1467_v12 = vmul.f32 0.03125, %v1465_v11 }
0x1094   :  { %v1469_v13 = vadd.f32 1e-05, %v1467_v12 }
0x1096   :  { %2048 = vrsqrt.f32 %v1469_v13 }
0x10a3   :  { %v2049_v18 = vpop.eup %2048 }
0x10a4   :  { %v1473_v19 = vmul.f32 %v2049_v18, %v1457_v61 }
0x10a6   :  { %v1481_v22 = vmul.f32 %v1724_v17, %v1473_v19 }
0x10a8   :  { %v1489_v41 = vadd.f32 %v1725_v21, %v1481_v22 }
0x10aa   :  { %v1490_v24 = vpack.c.bf16 %v1489_v41, %v1488_v23 }
0x10ac   :  { %1959 = vmatmul.mubr.msk.bf16.vlgmr.msra.gmra.mxu1 %vm50_vm0, %v1490_v24 }
0x116c   :  { %v1551_v0 = vpop.f32.mrf.mxu1 }
0x116d   :  { %v1552_v30 = vadd.f32 %v1726_v28, %v1551_v0 }
0x116e   :  { %v1960_v29 = vpop.f32.mrf.mxu1 }
0x116f   :  { %v1558_v34 = vmax.f32 %v1552_v30, 0.0 }
0x1170   :  { %v1554_v31 = vpop.f32.mrf.mxu1 }
0x1171   :  { %v1555_v32 = vadd.f32 %v1726_v28, %v1554_v31 }
0x1172   :  { %v1961_v33 = vpop.f32.mrf.mxu1 }
0x1173   :  { %v1559_v36 = vmax.f32 %v1555_v32, 0.0 }
0x1175   :  { %v1560_v37 = vpack.c.bf16 %v1559_v36, %v1558_v34 }
0x1177   :  { %1979 = vmatmul.mubr.bf16.vlgmr.msra.gmra.mxu0 %v1560_v37 }
0x1237   :  { %v1666_v38 = vpop.f32.mrf.mxu0 }
0x1238   :  { %v1667_v35 = vadd.f32 %v1730_v15, %v1666_v38 }
0x1239   :  { %v1980_v39 = vpop.f32.mrf.mxu0 }
0x123a   :  { %v1673_v40 = vadd.f32 %v1667_v35, %v2418_v27 }
0x123b   :  { %v1669_v42 = vpop.f32.mrf.mxu0 }
0x123c   :  { %1675 = vst.msk [vmem:[#allocation3] sm:$0xff] %vm50_vm0, %v1673_v40  ;;  %v1670_v44 = vadd.f32 %v1730_v15, %v1669_v42 }
0x123d   :  { %v1981_v45 = vpop.f32.mrf.mxu0 }
0x123e   :  { %v1674_v46 = vadd.f32 %v1670_v44, %v2437_v54 }
0x1240   :  { %1676 = vst.msk [vmem:[#allocation3 + $0x8] sm:$0xff] %vm50_vm0, %v1674_v46 }
0x1241   :  { %2061 = shalt.err (!%p2058_p4)
}
0x1242   :  { %s2086_s12 = smov 128   ;;  %s2087_s24 = smov 8  }
0x1243   :  { %1688 = dma.vmem_to_hbm [thread:$0]  %s1683_s11, 256, %s2515_s13, [#allocation4], %s2086_s12, %s2086_s12, %s2087_s24  }
0x1244   :  { %2070 = dma.done.wait [#allocation4], 256  }
0x1245   :  { %2071 = vsyncadd [#allocation4], 4294967040 }
0x1246   :  { %1692 = vsyncpa [#allocation4], 1 }

</bundles_post_ra>
